<compile_context>
chip_gen: v6e
topology: v6e:2x2x1
jax: 0.10.0
libtpu: 0.0.40
codegen_flags: <defaults>
</compile_context>

<pallas_src>
import jax
import jax.numpy as jnp
from jax.experimental import pallas as pl
from jax.experimental.pallas import tpu as pltpu  # noqa: F401  (kept for TPU params if needed)


# ----------------------------------------------------------------------------
# Kernel: one call, all 4 modalities fused via block-diagonal gate weights.
# ----------------------------------------------------------------------------
def fused_lstm2_bn_kernel(x_ref, lens_ref, wih0_ref, whh0_ref, b0_ref,
                          wih1_ref, whh1_ref, b1_ref, bn_ref, out_ref):
    """2-layer LSTM over time (4 modalities lane-concatenated) + folded BN.

    x_ref:    [T*Bp, D_all]   bf16  time-major rows (t*Bp + b); modality m's
                                    features occupy lanes [m*Dpad, (m+1)*Dpad)
    lens_ref: [Bp, H_all]     int32 per-lane true length (per modality/sample)
    wih0_ref: [D_all, 4*H_all] bf16 block-diag, gate-major layer-0 input W
    whh0_ref: [H_all, 4*H_all] bf16 block-diag layer-0 recurrent W
    b0_ref:   [1, 4*H_all]    f32   layer-0 bias (b_ih + b_hh)
    wih1_ref: [H_all, 4*H_all] bf16 block-diag layer-1 input W
    whh1_ref: [H_all, 4*H_all] bf16 block-diag layer-1 recurrent W
    b1_ref:   [1, 4*H_all]    f32   layer-1 bias
    bn_ref:   [2, H_all]      f32   row 0: BN scale, row 1: BN shift (folded)
    out_ref:  [Bp, H_all]     f32   BatchNorm(h1 at each sample's true length)

    Gate-major column layout: col = gate*H_all + modality*Hpad + unit, so each
    gate slice is a 128-lane-aligned static view covering all modalities.
    """
    TB, _ = x_ref.shape
    Bp, Hall = lens_ref.shape
    T = TB // Bp
    G4 = 4 * Hall

    lens = lens_ref[...]                     # [Bp, H_all] int32
    whh0 = whh0_ref[...]                     # [H_all, 4H_all] bf16
    wih1 = wih1_ref[...]
    whh1 = whh1_ref[...]

    # Hoisted layer-0 input path: one MXU push over all T*Bp rows, bias folded.
    xg = jnp.dot(x_ref[...], wih0_ref[...], preferred_element_type=jnp.float32)
    xg = xg + b0_ref[...]                    # [T*Bp, 4H_all] f32

    # Hoisted broadcast of the layer-1 bias (avoid per-step broadcast_in_dim).
    b1b = jnp.broadcast_to(b1_ref[...], (Bp, G4))

    def gates(g, c_prev):
        i = jax.nn.sigmoid(g[:, 0 * Hall:1 * Hall])
        f = jax.nn.sigmoid(g[:, 1 * Hall:2 * Hall])
        gg = jnp.tanh(g[:, 2 * Hall:3 * Hall])
        o = jax.nn.sigmoid(g[:, 3 * Hall:4 * Hall])
        c_new = f * c_prev + i * gg
        return o * jnp.tanh(c_new), c_new

    z = jnp.zeros((Bp, Hall), jnp.float32)
    h0, c0, h1, c1 = z, z, z, z
    for t in range(T):                       # static unroll: T small & static
        # Layer-1 recurrent half depends only on previous h1 -> off the
        # layer-0 dependence chain (scheduler can overlap it).
        r1 = jnp.dot(h1.astype(jnp.bfloat16), whh1,
                     preferred_element_type=jnp.float32)
        # Layer 0: recurrent matmul only (input path precomputed above).
        g0 = xg[t * Bp:(t + 1) * Bp, :] + jnp.dot(
            h0.astype(jnp.bfloat16), whh0, preferred_element_type=jnp.float32)
        h0n, c0n = gates(g0, c0)
        # Layer 1: input half on the fresh h0n, no concat.
        g1 = jnp.dot(h0n.astype(jnp.bfloat16), wih1,
                     preferred_element_type=jnp.float32) + r1 + b1b
        h1n, c1n = gates(g1, c1)
        # Packed-sequence semantics: freeze states past each (sample, modality)
        # true length.  keep is a per-lane mask.
        keep = t < lens                      # [Bp, H_all] bool
        h0 = jnp.where(keep, h0n, h0)
        c0 = jnp.where(keep, c0n, c0)
        h1 = jnp.where(keep, h1n, h1)
        c1 = jnp.where(keep, c1n, c1)

    # BatchNorm1d(eval) folded to affine; Dropout(eval) is identity.
    out_ref[...] = h1 * bn_ref[0:1, :] + bn_ref[1:2, :]


def fused_lstm2_bn(x_p, lens_p, wih0, whh0, b0, wih1, whh1, b1, bn):
    """x_p: [T*Bp, D_all] bf16 -> [Bp, H_all] f32 (all modalities fused)."""
    Bp, Hall = lens_p.shape
    # No grid: every operand is a whole-array VMEM-resident block (all weights
    # combined are <1 MiB, xg temp is ~128 KiB -> far below any VMEM limit).
    return pl.pallas_call(
        fused_lstm2_bn_kernel,
        out_shape=jax.ShapeDtypeStruct((Bp, Hall), jnp.float32),
    )(x_p, lens_p, wih0, whh0, b0, wih1, whh1, b1, bn)


# ----------------------------------------------------------------------------
# Host-side packing: block-diagonal gate-major weights, lane-concatenated state
# ----------------------------------------------------------------------------
def _combine_gate_weight(w_list, Hs, Hpad, in_dims, in_pad):
    """Per-modality PyTorch [4*H_m, Din_m] -> block-diag [M*in_pad, 4*M*Hpad].

    out[m*in_pad + d, g*(M*Hpad) + m*Hpad + j] = w_list[m][g*H_m + j, d]
    (gate order i, f, g, o; gate-major combined columns).
    """
    M = len(w_list)
    out = jnp.zeros((M, in_pad, 4, M, Hpad), jnp.float32)
    for m, w in enumerate(w_list):
        H, Din = Hs[m], in_dims[m]
        w4 = jnp.transpose(w.reshape(4, H, Din), (2, 0, 1))      # [Din, 4, H]
        w4 = jnp.pad(w4, ((0, in_pad - Din), (0, 0), (0, Hpad - H)))
        out = out.at[m, :, :, m, :].set(w4)
    return out.reshape(M * in_pad, 4 * M * Hpad)


def _combine_gate_bias(b_list, Hs, Hpad):
    M = len(b_list)
    out = jnp.zeros((4, M, Hpad), jnp.float32)
    for m, b in enumerate(b_list):
        out = out.at[:, m, :Hs[m]].set(b.reshape(4, Hs[m]))
    return out.reshape(1, 4 * M * Hpad)


def pack_combined_params(params, dims, Hpad, Dpad, eps=1e-5):
    """Per-modality LSTM+BN params -> fused block-diagonal kernel operands."""
    Hs = [h for _, h in dims]
    Ds = [d for d, _ in dims]
    M = len(params)
    wih0 = _combine_gate_weight([p['w_ih_l0'] for p in params], Hs, Hpad, Ds, Dpad)
    whh0 = _combine_gate_weight([p['w_hh_l0'] for p in params], Hs, Hpad, Hs, Hpad)
    wih1 = _combine_gate_weight([p['w_ih_l1'] for p in params], Hs, Hpad, Hs, Hpad)
    whh1 = _combine_gate_weight([p['w_hh_l1'] for p in params], Hs, Hpad, Hs, Hpad)
    b0 = _combine_gate_bias([p['b_ih_l0'] + p['b_hh_l0'] for p in params], Hs, Hpad)
    b1 = _combine_gate_bias([p['b_ih_l1'] + p['b_hh_l1'] for p in params], Hs, Hpad)
    # BatchNorm1d (eval, running stats) folded to y = h * scale + shift.
    bn = jnp.zeros((2, M * Hpad), jnp.float32)
    for m, p in enumerate(params):
        H = Hs[m]
        scale = p['bn_gamma'] / jnp.sqrt(p['bn_var'] + eps)
        shift = p['bn_beta'] - p['bn_mean'] * scale
        bn = bn.at[0, m * Hpad:m * Hpad + H].set(scale)
        bn = bn.at[1, m * Hpad:m * Hpad + H].set(shift)
    return (wih0.astype(jnp.bfloat16), whh0.astype(jnp.bfloat16), b0,
            wih1.astype(jnp.bfloat16), whh1.astype(jnp.bfloat16), b1, bn)


def pack_sequences(feats, Dpad, Tmax, Bp):
    """list of [B, T_m, D_m] f32 -> [Tmax*Bp, M*Dpad] bf16 (row = t*Bp + b)."""
    cols = []
    for x in feats:
        B, T, D = x.shape
        xp = jnp.pad(x.astype(jnp.float32),
                     ((0, Bp - B), (0, Tmax - T), (0, Dpad - D)))
        cols.append(jnp.transpose(xp, (1, 0, 2)))                # [Tmax, Bp, Dpad]
    xcomb = jnp.concatenate(cols, axis=-1)                       # [Tmax, Bp, M*Dpad]
    return xcomb.reshape(Tmax * Bp, len(feats) * Dpad).astype(jnp.bfloat16)


def pack_lens(lens_list, Bp, Hpad):
    """list of [B] lens -> [Bp, M*Hpad] int32 (each len broadcast over its lanes)."""
    cols = []
    for l in lens_list:
        B = l.shape[0]
        lp = jnp.pad(l.astype(jnp.int32), (0, Bp - B))           # pad rows: len 0
        cols.append(jnp.broadcast_to(lp[:, None], (Bp, Hpad)))
    return jnp.concatenate(cols, axis=-1)


# ----------------------------------------------------------------------------
# Parameter init (mirrors PyTorch nn.LSTM / nn.BatchNorm1d defaults)
# ----------------------------------------------------------------------------
def init_lstm2_bn_params(key, D, H):
    ks = jax.random.split(key, 8)
    s = H ** -0.5
    u = lambda k, shape: jax.random.uniform(k, shape, jnp.float32, -s, s)
    return dict(
        w_ih_l0=u(ks[0], (4 * H, D)),
        w_hh_l0=u(ks[1], (4 * H, H)),
        b_ih_l0=u(ks[2], (4 * H,)),
        b_hh_l0=u(ks[3], (4 * H,)),
        w_ih_l1=u(ks[4], (4 * H, H)),   # layer-2 input size == H
        w_hh_l1=u(ks[5], (4 * H, H)),
        b_ih_l1=u(ks[6], (4 * H,)),
        b_hh_l1=u(ks[7], (4 * H,)),
        bn_gamma=jnp.ones((H,), jnp.float32),
        bn_beta=jnp.zeros((H,), jnp.float32),
        bn_mean=jnp.zeros((H,), jnp.float32),
        bn_var=jnp.ones((H,), jnp.float32),
    )


class SimpleModelPallas:
    """Eval-mode SimpleModel.forward; returned order (text, audio, video, gap)."""

    def __init__(self, key, D_a, D_v, vocab_size, embedding_dim, gap_dim,
                 H_a, H_v, H_t, H_g):
        keys = jax.random.split(key, 5)
        self.embedding = jax.random.normal(
            keys[0], (vocab_size, embedding_dim), jnp.float32)
        # Modality order matches the returned tuple: text, audio, video, gap.
        self.dims = [(embedding_dim, H_t), (D_a, H_a), (D_v, H_v), (gap_dim, H_g)]
        self.Hs = [h for _, h in self.dims]
        self.M = len(self.dims)
        # Per-modality pads chosen so combined widths are multiples of 128 lanes.
        self.Hpad = -(-max(self.Hs) // 32) * 32
        self.Dpad = -(-max(d for d, _ in self.dims) // 32) * 32
        self.Hall = self.M * self.Hpad
        params = [init_lstm2_bn_params(k, d, h)
                  for k, (d, h) in zip(keys[1:], self.dims)]
        (self.wih0, self.whh0, self.b0, self.wih1, self.whh1, self.b1,
         self.bn) = pack_combined_params(params, self.dims, self.Hpad, self.Dpad)

    def __call__(self, audio_info, video_info, text_info, gap_info):
        text_tok, text_lens = text_info
        audio_feat, audio_lens = audio_info
        video_feat, video_lens = video_info
        gap_feat, gap_lens = gap_info

        text_feat = jnp.take(self.embedding, text_tok, axis=0)   # embedding glue
        feats = [text_feat, audio_feat, video_feat, gap_feat]
        lens = [text_lens, audio_lens, video_lens, gap_lens]

        B = feats[0].shape[0]
        Bp = -(-B // 8) * 8                                      # 8-sublane batch
        Tmax = max(int(f.shape[1]) for f in feats)
        x_p = pack_sequences(feats, self.Dpad, Tmax, Bp)         # [T*Bp, 4*Dpad]
        lens_p = pack_lens(lens, Bp, self.Hpad)                  # [Bp, H_all]

        out = fused_lstm2_bn(x_p, lens_p, self.wih0, self.whh0, self.b0,
                             self.wih1, self.whh1, self.b1, self.bn)  # [Bp, H_all]
        return tuple(out[:B, m * self.Hpad:m * self.Hpad + h]
                     for m, h in enumerate(self.Hs))


if __name__ == "__main__":
    B, T = 2, 8
    D_a, D_v, gap_dim = 12, 20, 8
    vocab_size, embedding_dim = 50, 32
    H_a, H_v, H_t, H_g = 16, 16, 32, 8

    key = jax.random.PRNGKey(0)
    k_model, k_a, k_v, k_g, k_t = jax.random.split(key, 5)

    model = SimpleModelPallas(k_model, D_a, D_v, vocab_size, embedding_dim,
                              gap_dim, H_a, H_v, H_t, H_g)

    audio_feat = jax.random.normal(k_a, (B, T, D_a), jnp.float32)
    video_feat = jax.random.normal(k_v, (B, T, D_v), jnp.float32)
    gap_feat = jax.random.normal(k_g, (B, T, gap_dim), jnp.float32)
    text_tok = jax.random.randint(k_t, (B, T), 0, vocab_size, jnp.int32)

    audio_lens = jnp.array([8, 6], jnp.int32)
    video_lens = jnp.array([7, 8], jnp.int32)
    text_lens = jnp.array([8, 5], jnp.int32)
    gap_lens = jnp.array([8, 4], jnp.int32)

    outs = model((audio_feat, audio_lens),
                 (video_feat, video_lens),
                 (text_tok, text_lens),
                 (gap_feat, gap_lens))

    outs = jax.block_until_ready(outs)
    assert outs[0].shape == (B, H_t)
    assert outs[1].shape == (B, H_a)
    assert outs[2].shape == (B, H_v)
    assert outs[3].shape == (B, H_g)
    assert all(bool(jnp.all(jnp.isfinite(o))) for o in outs)
    print("KERNEL_OK")
</pallas_src>

<mosaic_0001>
module attributes {stable_mosaic.version = 11 : i64} {
  func.func @fused_lstm2_bn_kernel(%arg0: memref<64x128xbf16, #tpu.memory_space<vmem>>, %arg1: memref<8x128xi32, #tpu.memory_space<vmem>>, %arg2: memref<128x512xbf16, #tpu.memory_space<vmem>>, %arg3: memref<128x512xbf16, #tpu.memory_space<vmem>>, %arg4: memref<1x512xf32, #tpu.memory_space<vmem>>, %arg5: memref<128x512xbf16, #tpu.memory_space<vmem>>, %arg6: memref<128x512xbf16, #tpu.memory_space<vmem>>, %arg7: memref<1x512xf32, #tpu.memory_space<vmem>>, %arg8: memref<2x128xf32, #tpu.memory_space<vmem>>, %arg9: memref<8x128xf32, #tpu.memory_space<vmem>>) attributes {dimension_semantics = [], scalar_prefetch = 0 : i64, scratch_operands = 0 : i64, tpu.core_type = #tpu.core_type<tc>} {
    %c0 = arith.constant 0 : index
    %c0_0 = arith.constant 0 : index
    %0 = vector.load %arg1[%c0, %c0_0] : memref<8x128xi32, #tpu.memory_space<vmem>>, vector<8x128xi32>
    %c0_1 = arith.constant 0 : index
    %c0_2 = arith.constant 0 : index
    %1 = vector.load %arg3[%c0_1, %c0_2] : memref<128x512xbf16, #tpu.memory_space<vmem>>, vector<128x512xbf16>
    %c0_3 = arith.constant 0 : index
    %c0_4 = arith.constant 0 : index
    %2 = vector.load %arg5[%c0_3, %c0_4] : memref<128x512xbf16, #tpu.memory_space<vmem>>, vector<128x512xbf16>
    %c0_5 = arith.constant 0 : index
    %c0_6 = arith.constant 0 : index
    %3 = vector.load %arg6[%c0_5, %c0_6] : memref<128x512xbf16, #tpu.memory_space<vmem>>, vector<128x512xbf16>
    %c0_7 = arith.constant 0 : index
    %c0_8 = arith.constant 0 : index
    %4 = vector.load %arg0[%c0_7, %c0_8] : memref<64x128xbf16, #tpu.memory_space<vmem>>, vector<64x128xbf16>
    %c0_9 = arith.constant 0 : index
    %c0_10 = arith.constant 0 : index
    %5 = vector.load %arg2[%c0_9, %c0_10] : memref<128x512xbf16, #tpu.memory_space<vmem>>, vector<128x512xbf16>
    %cst = arith.constant dense<0.000000e+00> : vector<64x512xf32>
    %6 = tpu.matmul %4, %5, %cst {dimension_numbers = #tpu.dot_dimension_numbers<[1], [0], [0], [1], [0, 0, 1, 1], [], []>} : vector<64x128xbf16>, vector<128x512xbf16>, vector<64x512xf32> -> vector<64x512xf32>
    %c0_11 = arith.constant 0 : index
    %c0_12 = arith.constant 0 : index
    %7 = vector.load %arg4[%c0_11, %c0_12] : memref<1x512xf32, #tpu.memory_space<vmem>>, vector<1x512xf32>
    %8 = vector.broadcast %7 : vector<1x512xf32> to vector<64x512xf32>
    %9 = arith.addf %6, %8 : vector<64x512xf32>
    %c0_13 = arith.constant 0 : index
    %c0_14 = arith.constant 0 : index
    %10 = vector.load %arg7[%c0_13, %c0_14] : memref<1x512xf32, #tpu.memory_space<vmem>>, vector<1x512xf32>
    %11 = vector.shape_cast %10 : vector<1x512xf32> to vector<1x512xf32>
    %12 = vector.broadcast %11 : vector<1x512xf32> to vector<8x512xf32>
    %cst_15 = arith.constant 0.000000e+00 : f32
    %13 = vector.broadcast %cst_15 : f32 to vector<8x128xf32>
    %14 = arith.truncf %13 : vector<8x128xf32> to vector<8x128xbf16>
    %cst_16 = arith.constant dense<0.000000e+00> : vector<8x512xf32>
    %15 = tpu.matmul %14, %3, %cst_16 {dimension_numbers = #tpu.dot_dimension_numbers<[1], [0], [0], [1], [0, 0, 1, 1], [], []>} : vector<8x128xbf16>, vector<128x512xbf16>, vector<8x512xf32> -> vector<8x512xf32>
    %16 = vector.extract_strided_slice %9 {offsets = [0, 0], sizes = [8, 512], strides = [1, 1]} : vector<64x512xf32> to vector<8x512xf32>
    %17 = arith.truncf %13 : vector<8x128xf32> to vector<8x128xbf16>
    %cst_17 = arith.constant dense<0.000000e+00> : vector<8x512xf32>
    %18 = tpu.matmul %17, %1, %cst_17 {dimension_numbers = #tpu.dot_dimension_numbers<[1], [0], [0], [1], [0, 0, 1, 1], [], []>} : vector<8x128xbf16>, vector<128x512xbf16>, vector<8x512xf32> -> vector<8x512xf32>
    %19 = arith.addf %16, %18 : vector<8x512xf32>
    %20 = vector.extract_strided_slice %19 {offsets = [0, 0], sizes = [8, 128], strides = [1, 1]} : vector<8x512xf32> to vector<8x128xf32>
    %21 = arith.negf %20 : vector<8x128xf32>
    %22 = math.exp %21 : vector<8x128xf32>
    %cst_18 = arith.constant 1.000000e+00 : f32
    %23 = vector.broadcast %cst_18 : f32 to vector<8x128xf32>
    %24 = arith.addf %23, %22 : vector<8x128xf32>
    %25 = arith.divf %23, %24 : vector<8x128xf32>
    %26 = vector.extract_strided_slice %19 {offsets = [0, 128], sizes = [8, 128], strides = [1, 1]} : vector<8x512xf32> to vector<8x128xf32>
    %27 = arith.negf %26 : vector<8x128xf32>
    %28 = math.exp %27 : vector<8x128xf32>
    %cst_19 = arith.constant 1.000000e+00 : f32
    %29 = vector.broadcast %cst_19 : f32 to vector<8x128xf32>
    %30 = arith.addf %29, %28 : vector<8x128xf32>
    %31 = arith.divf %29, %30 : vector<8x128xf32>
    %32 = vector.extract_strided_slice %19 {offsets = [0, 256], sizes = [8, 128], strides = [1, 1]} : vector<8x512xf32> to vector<8x128xf32>
    %33 = math.tanh %32 : vector<8x128xf32>
    %34 = vector.extract_strided_slice %19 {offsets = [0, 384], sizes = [8, 128], strides = [1, 1]} : vector<8x512xf32> to vector<8x128xf32>
    %35 = arith.negf %34 : vector<8x128xf32>
    %36 = math.exp %35 : vector<8x128xf32>
    %cst_20 = arith.constant 1.000000e+00 : f32
    %37 = vector.broadcast %cst_20 : f32 to vector<8x128xf32>
    %38 = arith.addf %37, %36 : vector<8x128xf32>
    %39 = arith.divf %37, %38 : vector<8x128xf32>
    %40 = arith.mulf %31, %13 : vector<8x128xf32>
    %41 = arith.mulf %25, %33 : vector<8x128xf32>
    %42 = arith.addf %40, %41 : vector<8x128xf32>
    %43 = math.tanh %42 : vector<8x128xf32>
    %44 = arith.mulf %39, %43 : vector<8x128xf32>
    %45 = arith.truncf %44 : vector<8x128xf32> to vector<8x128xbf16>
    %cst_21 = arith.constant dense<0.000000e+00> : vector<8x512xf32>
    %46 = tpu.matmul %45, %2, %cst_21 {dimension_numbers = #tpu.dot_dimension_numbers<[1], [0], [0], [1], [0, 0, 1, 1], [], []>} : vector<8x128xbf16>, vector<128x512xbf16>, vector<8x512xf32> -> vector<8x512xf32>
    %47 = arith.addf %46, %15 : vector<8x512xf32>
    %48 = arith.addf %47, %12 : vector<8x512xf32>
    %49 = vector.extract_strided_slice %48 {offsets = [0, 0], sizes = [8, 128], strides = [1, 1]} : vector<8x512xf32> to vector<8x128xf32>
    %50 = arith.negf %49 : vector<8x128xf32>
    %51 = math.exp %50 : vector<8x128xf32>
    %cst_22 = arith.constant 1.000000e+00 : f32
    %52 = vector.broadcast %cst_22 : f32 to vector<8x128xf32>
    %53 = arith.addf %52, %51 : vector<8x128xf32>
    %54 = arith.divf %52, %53 : vector<8x128xf32>
    %55 = vector.extract_strided_slice %48 {offsets = [0, 128], sizes = [8, 128], strides = [1, 1]} : vector<8x512xf32> to vector<8x128xf32>
    %56 = arith.negf %55 : vector<8x128xf32>
    %57 = math.exp %56 : vector<8x128xf32>
    %cst_23 = arith.constant 1.000000e+00 : f32
    %58 = vector.broadcast %cst_23 : f32 to vector<8x128xf32>
    %59 = arith.addf %58, %57 : vector<8x128xf32>
    %60 = arith.divf %58, %59 : vector<8x128xf32>
    %61 = vector.extract_strided_slice %48 {offsets = [0, 256], sizes = [8, 128], strides = [1, 1]} : vector<8x512xf32> to vector<8x128xf32>
    %62 = math.tanh %61 : vector<8x128xf32>
    %63 = vector.extract_strided_slice %48 {offsets = [0, 384], sizes = [8, 128], strides = [1, 1]} : vector<8x512xf32> to vector<8x128xf32>
    %64 = arith.negf %63 : vector<8x128xf32>
    %65 = math.exp %64 : vector<8x128xf32>
    %cst_24 = arith.constant 1.000000e+00 : f32
    %66 = vector.broadcast %cst_24 : f32 to vector<8x128xf32>
    %67 = arith.addf %66, %65 : vector<8x128xf32>
    %68 = arith.divf %66, %67 : vector<8x128xf32>
    %69 = arith.mulf %60, %13 : vector<8x128xf32>
    %70 = arith.mulf %54, %62 : vector<8x128xf32>
    %71 = arith.addf %69, %70 : vector<8x128xf32>
    %72 = math.tanh %71 : vector<8x128xf32>
    %73 = arith.mulf %68, %72 : vector<8x128xf32>
    %c0_i32 = arith.constant 0 : i32
    %74 = vector.broadcast %c0_i32 : i32 to vector<8x128xi32>
    %75 = arith.cmpi sgt, %0, %74 : vector<8x128xi32>
    %76 = arith.select %75, %44, %13 : vector<8x128xi1>, vector<8x128xf32>
    %77 = arith.select %75, %42, %13 : vector<8x128xi1>, vector<8x128xf32>
    %78 = arith.select %75, %73, %13 : vector<8x128xi1>, vector<8x128xf32>
    %79 = arith.select %75, %71, %13 : vector<8x128xi1>, vector<8x128xf32>
    %80 = arith.truncf %78 : vector<8x128xf32> to vector<8x128xbf16>
    %cst_25 = arith.constant dense<0.000000e+00> : vector<8x512xf32>
    %81 = tpu.matmul %80, %3, %cst_25 {dimension_numbers = #tpu.dot_dimension_numbers<[1], [0], [0], [1], [0, 0, 1, 1], [], []>} : vector<8x128xbf16>, vector<128x512xbf16>, vector<8x512xf32> -> vector<8x512xf32>
    %82 = vector.extract_strided_slice %9 {offsets = [8, 0], sizes = [8, 512], strides = [1, 1]} : vector<64x512xf32> to vector<8x512xf32>
    %83 = arith.truncf %76 : vector<8x128xf32> to vector<8x128xbf16>
    %cst_26 = arith.constant dense<0.000000e+00> : vector<8x512xf32>
    %84 = tpu.matmul %83, %1, %cst_26 {dimension_numbers = #tpu.dot_dimension_numbers<[1], [0], [0], [1], [0, 0, 1, 1], [], []>} : vector<8x128xbf16>, vector<128x512xbf16>, vector<8x512xf32> -> vector<8x512xf32>
    %85 = arith.addf %82, %84 : vector<8x512xf32>
    %86 = vector.extract_strided_slice %85 {offsets = [0, 0], sizes = [8, 128], strides = [1, 1]} : vector<8x512xf32> to vector<8x128xf32>
    %87 = arith.negf %86 : vector<8x128xf32>
    %88 = math.exp %87 : vector<8x128xf32>
    %cst_27 = arith.constant 1.000000e+00 : f32
    %89 = vector.broadcast %cst_27 : f32 to vector<8x128xf32>
    %90 = arith.addf %89, %88 : vector<8x128xf32>
    %91 = arith.divf %89, %90 : vector<8x128xf32>
    %92 = vector.extract_strided_slice %85 {offsets = [0, 128], sizes = [8, 128], strides = [1, 1]} : vector<8x512xf32> to vector<8x128xf32>
    %93 = arith.negf %92 : vector<8x128xf32>
    %94 = math.exp %93 : vector<8x128xf32>
    %cst_28 = arith.constant 1.000000e+00 : f32
    %95 = vector.broadcast %cst_28 : f32 to vector<8x128xf32>
    %96 = arith.addf %95, %94 : vector<8x128xf32>
    %97 = arith.divf %95, %96 : vector<8x128xf32>
    %98 = vector.extract_strided_slice %85 {offsets = [0, 256], sizes = [8, 128], strides = [1, 1]} : vector<8x512xf32> to vector<8x128xf32>
    %99 = math.tanh %98 : vector<8x128xf32>
    %100 = vector.extract_strided_slice %85 {offsets = [0, 384], sizes = [8, 128], strides = [1, 1]} : vector<8x512xf32> to vector<8x128xf32>
    %101 = arith.negf %100 : vector<8x128xf32>
    %102 = math.exp %101 : vector<8x128xf32>
    %cst_29 = arith.constant 1.000000e+00 : f32
    %103 = vector.broadcast %cst_29 : f32 to vector<8x128xf32>
    %104 = arith.addf %103, %102 : vector<8x128xf32>
    %105 = arith.divf %103, %104 : vector<8x128xf32>
    %106 = arith.mulf %97, %77 : vector<8x128xf32>
    %107 = arith.mulf %91, %99 : vector<8x128xf32>
    %108 = arith.addf %106, %107 : vector<8x128xf32>
    %109 = math.tanh %108 : vector<8x128xf32>
    %110 = arith.mulf %105, %109 : vector<8x128xf32>
    %111 = arith.truncf %110 : vector<8x128xf32> to vector<8x128xbf16>
    %cst_30 = arith.constant dense<0.000000e+00> : vector<8x512xf32>
    %112 = tpu.matmul %111, %2, %cst_30 {dimension_numbers = #tpu.dot_dimension_numbers<[1], [0], [0], [1], [0, 0, 1, 1], [], []>} : vector<8x128xbf16>, vector<128x512xbf16>, vector<8x512xf32> -> vector<8x512xf32>
    %113 = arith.addf %112, %81 : vector<8x512xf32>
    %114 = arith.addf %113, %12 : vector<8x512xf32>
    %115 = vector.extract_strided_slice %114 {offsets = [0, 0], sizes = [8, 128], strides = [1, 1]} : vector<8x512xf32> to vector<8x128xf32>
    %116 = arith.negf %115 : vector<8x128xf32>
    %117 = math.exp %116 : vector<8x128xf32>
    %cst_31 = arith.constant 1.000000e+00 : f32
    %118 = vector.broadcast %cst_31 : f32 to vector<8x128xf32>
    %119 = arith.addf %118, %117 : vector<8x128xf32>
    %120 = arith.divf %118, %119 : vector<8x128xf32>
    %121 = vector.extract_strided_slice %114 {offsets = [0, 128], sizes = [8, 128], strides = [1, 1]} : vector<8x512xf32> to vector<8x128xf32>
    %122 = arith.negf %121 : vector<8x128xf32>
    %123 = math.exp %122 : vector<8x128xf32>
    %cst_32 = arith.constant 1.000000e+00 : f32
    %124 = vector.broadcast %cst_32 : f32 to vector<8x128xf32>
    %125 = arith.addf %124, %123 : vector<8x128xf32>
    %126 = arith.divf %124, %125 : vector<8x128xf32>
    %127 = vector.extract_strided_slice %114 {offsets = [0, 256], sizes = [8, 128], strides = [1, 1]} : vector<8x512xf32> to vector<8x128xf32>
    %128 = math.tanh %127 : vector<8x128xf32>
    %129 = vector.extract_strided_slice %114 {offsets = [0, 384], sizes = [8, 128], strides = [1, 1]} : vector<8x512xf32> to vector<8x128xf32>
    %130 = arith.negf %129 : vector<8x128xf32>
    %131 = math.exp %130 : vector<8x128xf32>
    %cst_33 = arith.constant 1.000000e+00 : f32
    %132 = vector.broadcast %cst_33 : f32 to vector<8x128xf32>
    %133 = arith.addf %132, %131 : vector<8x128xf32>
    %134 = arith.divf %132, %133 : vector<8x128xf32>
    %135 = arith.mulf %126, %79 : vector<8x128xf32>
    %136 = arith.mulf %120, %128 : vector<8x128xf32>
    %137 = arith.addf %135, %136 : vector<8x128xf32>
    %138 = math.tanh %137 : vector<8x128xf32>
    %139 = arith.mulf %134, %138 : vector<8x128xf32>
    %c1_i32 = arith.constant 1 : i32
    %140 = vector.broadcast %c1_i32 : i32 to vector<8x128xi32>
    %141 = arith.cmpi sgt, %0, %140 : vector<8x128xi32>
    %142 = arith.select %141, %110, %76 : vector<8x128xi1>, vector<8x128xf32>
    %143 = arith.select %141, %108, %77 : vector<8x128xi1>, vector<8x128xf32>
    %144 = arith.select %141, %139, %78 : vector<8x128xi1>, vector<8x128xf32>
    %145 = arith.select %141, %137, %79 : vector<8x128xi1>, vector<8x128xf32>
    %146 = arith.truncf %144 : vector<8x128xf32> to vector<8x128xbf16>
    %cst_34 = arith.constant dense<0.000000e+00> : vector<8x512xf32>
    %147 = tpu.matmul %146, %3, %cst_34 {dimension_numbers = #tpu.dot_dimension_numbers<[1], [0], [0], [1], [0, 0, 1, 1], [], []>} : vector<8x128xbf16>, vector<128x512xbf16>, vector<8x512xf32> -> vector<8x512xf32>
    %148 = vector.extract_strided_slice %9 {offsets = [16, 0], sizes = [8, 512], strides = [1, 1]} : vector<64x512xf32> to vector<8x512xf32>
    %149 = arith.truncf %142 : vector<8x128xf32> to vector<8x128xbf16>
    %cst_35 = arith.constant dense<0.000000e+00> : vector<8x512xf32>
    %150 = tpu.matmul %149, %1, %cst_35 {dimension_numbers = #tpu.dot_dimension_numbers<[1], [0], [0], [1], [0, 0, 1, 1], [], []>} : vector<8x128xbf16>, vector<128x512xbf16>, vector<8x512xf32> -> vector<8x512xf32>
    %151 = arith.addf %148, %150 : vector<8x512xf32>
    %152 = vector.extract_strided_slice %151 {offsets = [0, 0], sizes = [8, 128], strides = [1, 1]} : vector<8x512xf32> to vector<8x128xf32>
    %153 = arith.negf %152 : vector<8x128xf32>
    %154 = math.exp %153 : vector<8x128xf32>
    %cst_36 = arith.constant 1.000000e+00 : f32
    %155 = vector.broadcast %cst_36 : f32 to vector<8x128xf32>
    %156 = arith.addf %155, %154 : vector<8x128xf32>
    %157 = arith.divf %155, %156 : vector<8x128xf32>
    %158 = vector.extract_strided_slice %151 {offsets = [0, 128], sizes = [8, 128], strides = [1, 1]} : vector<8x512xf32> to vector<8x128xf32>
    %159 = arith.negf %158 : vector<8x128xf32>
    %160 = math.exp %159 : vector<8x128xf32>
    %cst_37 = arith.constant 1.000000e+00 : f32
    %161 = vector.broadcast %cst_37 : f32 to vector<8x128xf32>
    %162 = arith.addf %161, %160 : vector<8x128xf32>
    %163 = arith.divf %161, %162 : vector<8x128xf32>
    %164 = vector.extract_strided_slice %151 {offsets = [0, 256], sizes = [8, 128], strides = [1, 1]} : vector<8x512xf32> to vector<8x128xf32>
    %165 = math.tanh %164 : vector<8x128xf32>
    %166 = vector.extract_strided_slice %151 {offsets = [0, 384], sizes = [8, 128], strides = [1, 1]} : vector<8x512xf32> to vector<8x128xf32>
    %167 = arith.negf %166 : vector<8x128xf32>
    %168 = math.exp %167 : vector<8x128xf32>
    %cst_38 = arith.constant 1.000000e+00 : f32
    %169 = vector.broadcast %cst_38 : f32 to vector<8x128xf32>
    %170 = arith.addf %169, %168 : vector<8x128xf32>
    %171 = arith.divf %169, %170 : vector<8x128xf32>
    %172 = arith.mulf %163, %143 : vector<8x128xf32>
    %173 = arith.mulf %157, %165 : vector<8x128xf32>
    %174 = arith.addf %172, %173 : vector<8x128xf32>
    %175 = math.tanh %174 : vector<8x128xf32>
    %176 = arith.mulf %171, %175 : vector<8x128xf32>
    %177 = arith.truncf %176 : vector<8x128xf32> to vector<8x128xbf16>
    %cst_39 = arith.constant dense<0.000000e+00> : vector<8x512xf32>
    %178 = tpu.matmul %177, %2, %cst_39 {dimension_numbers = #tpu.dot_dimension_numbers<[1], [0], [0], [1], [0, 0, 1, 1], [], []>} : vector<8x128xbf16>, vector<128x512xbf16>, vector<8x512xf32> -> vector<8x512xf32>
    %179 = arith.addf %178, %147 : vector<8x512xf32>
    %180 = arith.addf %179, %12 : vector<8x512xf32>
    %181 = vector.extract_strided_slice %180 {offsets = [0, 0], sizes = [8, 128], strides = [1, 1]} : vector<8x512xf32> to vector<8x128xf32>
    %182 = arith.negf %181 : vector<8x128xf32>
    %183 = math.exp %182 : vector<8x128xf32>
    %cst_40 = arith.constant 1.000000e+00 : f32
    %184 = vector.broadcast %cst_40 : f32 to vector<8x128xf32>
    %185 = arith.addf %184, %183 : vector<8x128xf32>
    %186 = arith.divf %184, %185 : vector<8x128xf32>
    %187 = vector.extract_strided_slice %180 {offsets = [0, 128], sizes = [8, 128], strides = [1, 1]} : vector<8x512xf32> to vector<8x128xf32>
    %188 = arith.negf %187 : vector<8x128xf32>
    %189 = math.exp %188 : vector<8x128xf32>
    %cst_41 = arith.constant 1.000000e+00 : f32
    %190 = vector.broadcast %cst_41 : f32 to vector<8x128xf32>
    %191 = arith.addf %190, %189 : vector<8x128xf32>
    %192 = arith.divf %190, %191 : vector<8x128xf32>
    %193 = vector.extract_strided_slice %180 {offsets = [0, 256], sizes = [8, 128], strides = [1, 1]} : vector<8x512xf32> to vector<8x128xf32>
    %194 = math.tanh %193 : vector<8x128xf32>
    %195 = vector.extract_strided_slice %180 {offsets = [0, 384], sizes = [8, 128], strides = [1, 1]} : vector<8x512xf32> to vector<8x128xf32>
    %196 = arith.negf %195 : vector<8x128xf32>
    %197 = math.exp %196 : vector<8x128xf32>
    %cst_42 = arith.constant 1.000000e+00 : f32
    %198 = vector.broadcast %cst_42 : f32 to vector<8x128xf32>
    %199 = arith.addf %198, %197 : vector<8x128xf32>
    %200 = arith.divf %198, %199 : vector<8x128xf32>
    %201 = arith.mulf %192, %145 : vector<8x128xf32>
    %202 = arith.mulf %186, %194 : vector<8x128xf32>
    %203 = arith.addf %201, %202 : vector<8x128xf32>
    %204 = math.tanh %203 : vector<8x128xf32>
    %205 = arith.mulf %200, %204 : vector<8x128xf32>
    %c2_i32 = arith.constant 2 : i32
    %206 = vector.broadcast %c2_i32 : i32 to vector<8x128xi32>
    %207 = arith.cmpi sgt, %0, %206 : vector<8x128xi32>
    %208 = arith.select %207, %176, %142 : vector<8x128xi1>, vector<8x128xf32>
    %209 = arith.select %207, %174, %143 : vector<8x128xi1>, vector<8x128xf32>
    %210 = arith.select %207, %205, %144 : vector<8x128xi1>, vector<8x128xf32>
    %211 = arith.select %207, %203, %145 : vector<8x128xi1>, vector<8x128xf32>
    %212 = arith.truncf %210 : vector<8x128xf32> to vector<8x128xbf16>
    %cst_43 = arith.constant dense<0.000000e+00> : vector<8x512xf32>
    %213 = tpu.matmul %212, %3, %cst_43 {dimension_numbers = #tpu.dot_dimension_numbers<[1], [0], [0], [1], [0, 0, 1, 1], [], []>} : vector<8x128xbf16>, vector<128x512xbf16>, vector<8x512xf32> -> vector<8x512xf32>
    %214 = vector.extract_strided_slice %9 {offsets = [24, 0], sizes = [8, 512], strides = [1, 1]} : vector<64x512xf32> to vector<8x512xf32>
    %215 = arith.truncf %208 : vector<8x128xf32> to vector<8x128xbf16>
    %cst_44 = arith.constant dense<0.000000e+00> : vector<8x512xf32>
    %216 = tpu.matmul %215, %1, %cst_44 {dimension_numbers = #tpu.dot_dimension_numbers<[1], [0], [0], [1], [0, 0, 1, 1], [], []>} : vector<8x128xbf16>, vector<128x512xbf16>, vector<8x512xf32> -> vector<8x512xf32>
    %217 = arith.addf %214, %216 : vector<8x512xf32>
    %218 = vector.extract_strided_slice %217 {offsets = [0, 0], sizes = [8, 128], strides = [1, 1]} : vector<8x512xf32> to vector<8x128xf32>
    %219 = arith.negf %218 : vector<8x128xf32>
    %220 = math.exp %219 : vector<8x128xf32>
    %cst_45 = arith.constant 1.000000e+00 : f32
    %221 = vector.broadcast %cst_45 : f32 to vector<8x128xf32>
    %222 = arith.addf %221, %220 : vector<8x128xf32>
    %223 = arith.divf %221, %222 : vector<8x128xf32>
    %224 = vector.extract_strided_slice %217 {offsets = [0, 128], sizes = [8, 128], strides = [1, 1]} : vector<8x512xf32> to vector<8x128xf32>
    %225 = arith.negf %224 : vector<8x128xf32>
    %226 = math.exp %225 : vector<8x128xf32>
    %cst_46 = arith.constant 1.000000e+00 : f32
    %227 = vector.broadcast %cst_46 : f32 to vector<8x128xf32>
    %228 = arith.addf %227, %226 : vector<8x128xf32>
    %229 = arith.divf %227, %228 : vector<8x128xf32>
    %230 = vector.extract_strided_slice %217 {offsets = [0, 256], sizes = [8, 128], strides = [1, 1]} : vector<8x512xf32> to vector<8x128xf32>
    %231 = math.tanh %230 : vector<8x128xf32>
    %232 = vector.extract_strided_slice %217 {offsets = [0, 384], sizes = [8, 128], strides = [1, 1]} : vector<8x512xf32> to vector<8x128xf32>
    %233 = arith.negf %232 : vector<8x128xf32>
    %234 = math.exp %233 : vector<8x128xf32>
    %cst_47 = arith.constant 1.000000e+00 : f32
    %235 = vector.broadcast %cst_47 : f32 to vector<8x128xf32>
    %236 = arith.addf %235, %234 : vector<8x128xf32>
    %237 = arith.divf %235, %236 : vector<8x128xf32>
    %238 = arith.mulf %229, %209 : vector<8x128xf32>
    %239 = arith.mulf %223, %231 : vector<8x128xf32>
    %240 = arith.addf %238, %239 : vector<8x128xf32>
    %241 = math.tanh %240 : vector<8x128xf32>
    %242 = arith.mulf %237, %241 : vector<8x128xf32>
    %243 = arith.truncf %242 : vector<8x128xf32> to vector<8x128xbf16>
    %cst_48 = arith.constant dense<0.000000e+00> : vector<8x512xf32>
    %244 = tpu.matmul %243, %2, %cst_48 {dimension_numbers = #tpu.dot_dimension_numbers<[1], [0], [0], [1], [0, 0, 1, 1], [], []>} : vector<8x128xbf16>, vector<128x512xbf16>, vector<8x512xf32> -> vector<8x512xf32>
    %245 = arith.addf %244, %213 : vector<8x512xf32>
    %246 = arith.addf %245, %12 : vector<8x512xf32>
    %247 = vector.extract_strided_slice %246 {offsets = [0, 0], sizes = [8, 128], strides = [1, 1]} : vector<8x512xf32> to vector<8x128xf32>
    %248 = arith.negf %247 : vector<8x128xf32>
    %249 = math.exp %248 : vector<8x128xf32>
    %cst_49 = arith.constant 1.000000e+00 : f32
    %250 = vector.broadcast %cst_49 : f32 to vector<8x128xf32>
    %251 = arith.addf %250, %249 : vector<8x128xf32>
    %252 = arith.divf %250, %251 : vector<8x128xf32>
    %253 = vector.extract_strided_slice %246 {offsets = [0, 128], sizes = [8, 128], strides = [1, 1]} : vector<8x512xf32> to vector<8x128xf32>
    %254 = arith.negf %253 : vector<8x128xf32>
    %255 = math.exp %254 : vector<8x128xf32>
    %cst_50 = arith.constant 1.000000e+00 : f32
    %256 = vector.broadcast %cst_50 : f32 to vector<8x128xf32>
    %257 = arith.addf %256, %255 : vector<8x128xf32>
    %258 = arith.divf %256, %257 : vector<8x128xf32>
    %259 = vector.extract_strided_slice %246 {offsets = [0, 256], sizes = [8, 128], strides = [1, 1]} : vector<8x512xf32> to vector<8x128xf32>
    %260 = math.tanh %259 : vector<8x128xf32>
    %261 = vector.extract_strided_slice %246 {offsets = [0, 384], sizes = [8, 128], strides = [1, 1]} : vector<8x512xf32> to vector<8x128xf32>
    %262 = arith.negf %261 : vector<8x128xf32>
    %263 = math.exp %262 : vector<8x128xf32>
    %cst_51 = arith.constant 1.000000e+00 : f32
    %264 = vector.broadcast %cst_51 : f32 to vector<8x128xf32>
    %265 = arith.addf %264, %263 : vector<8x128xf32>
    %266 = arith.divf %264, %265 : vector<8x128xf32>
    %267 = arith.mulf %258, %211 : vector<8x128xf32>
    %268 = arith.mulf %252, %260 : vector<8x128xf32>
    %269 = arith.addf %267, %268 : vector<8x128xf32>
    %270 = math.tanh %269 : vector<8x128xf32>
    %271 = arith.mulf %266, %270 : vector<8x128xf32>
    %c3_i32 = arith.constant 3 : i32
    %272 = vector.broadcast %c3_i32 : i32 to vector<8x128xi32>
    %273 = arith.cmpi sgt, %0, %272 : vector<8x128xi32>
    %274 = arith.select %273, %242, %208 : vector<8x128xi1>, vector<8x128xf32>
    %275 = arith.select %273, %240, %209 : vector<8x128xi1>, vector<8x128xf32>
    %276 = arith.select %273, %271, %210 : vector<8x128xi1>, vector<8x128xf32>
    %277 = arith.select %273, %269, %211 : vector<8x128xi1>, vector<8x128xf32>
    %278 = arith.truncf %276 : vector<8x128xf32> to vector<8x128xbf16>
    %cst_52 = arith.constant dense<0.000000e+00> : vector<8x512xf32>
    %279 = tpu.matmul %278, %3, %cst_52 {dimension_numbers = #tpu.dot_dimension_numbers<[1], [0], [0], [1], [0, 0, 1, 1], [], []>} : vector<8x128xbf16>, vector<128x512xbf16>, vector<8x512xf32> -> vector<8x512xf32>
    %280 = vector.extract_strided_slice %9 {offsets = [32, 0], sizes = [8, 512], strides = [1, 1]} : vector<64x512xf32> to vector<8x512xf32>
    %281 = arith.truncf %274 : vector<8x128xf32> to vector<8x128xbf16>
    %cst_53 = arith.constant dense<0.000000e+00> : vector<8x512xf32>
    %282 = tpu.matmul %281, %1, %cst_53 {dimension_numbers = #tpu.dot_dimension_numbers<[1], [0], [0], [1], [0, 0, 1, 1], [], []>} : vector<8x128xbf16>, vector<128x512xbf16>, vector<8x512xf32> -> vector<8x512xf32>
    %283 = arith.addf %280, %282 : vector<8x512xf32>
    %284 = vector.extract_strided_slice %283 {offsets = [0, 0], sizes = [8, 128], strides = [1, 1]} : vector<8x512xf32> to vector<8x128xf32>
    %285 = arith.negf %284 : vector<8x128xf32>
    %286 = math.exp %285 : vector<8x128xf32>
    %cst_54 = arith.constant 1.000000e+00 : f32
    %287 = vector.broadcast %cst_54 : f32 to vector<8x128xf32>
    %288 = arith.addf %287, %286 : vector<8x128xf32>
    %289 = arith.divf %287, %288 : vector<8x128xf32>
    %290 = vector.extract_strided_slice %283 {offsets = [0, 128], sizes = [8, 128], strides = [1, 1]} : vector<8x512xf32> to vector<8x128xf32>
    %291 = arith.negf %290 : vector<8x128xf32>
    %292 = math.exp %291 : vector<8x128xf32>
    %cst_55 = arith.constant 1.000000e+00 : f32
    %293 = vector.broadcast %cst_55 : f32 to vector<8x128xf32>
    %294 = arith.addf %293, %292 : vector<8x128xf32>
    %295 = arith.divf %293, %294 : vector<8x128xf32>
    %296 = vector.extract_strided_slice %283 {offsets = [0, 256], sizes = [8, 128], strides = [1, 1]} : vector<8x512xf32> to vector<8x128xf32>
    %297 = math.tanh %296 : vector<8x128xf32>
    %298 = vector.extract_strided_slice %283 {offsets = [0, 384], sizes = [8, 128], strides = [1, 1]} : vector<8x512xf32> to vector<8x128xf32>
    %299 = arith.negf %298 : vector<8x128xf32>
    %300 = math.exp %299 : vector<8x128xf32>
    %cst_56 = arith.constant 1.000000e+00 : f32
    %301 = vector.broadcast %cst_56 : f32 to vector<8x128xf32>
    %302 = arith.addf %301, %300 : vector<8x128xf32>
    %303 = arith.divf %301, %302 : vector<8x128xf32>
    %304 = arith.mulf %295, %275 : vector<8x128xf32>
    %305 = arith.mulf %289, %297 : vector<8x128xf32>
    %306 = arith.addf %304, %305 : vector<8x128xf32>
    %307 = math.tanh %306 : vector<8x128xf32>
    %308 = arith.mulf %303, %307 : vector<8x128xf32>
    %309 = arith.truncf %308 : vector<8x128xf32> to vector<8x128xbf16>
    %cst_57 = arith.constant dense<0.000000e+00> : vector<8x512xf32>
    %310 = tpu.matmul %309, %2, %cst_57 {dimension_numbers = #tpu.dot_dimension_numbers<[1], [0], [0], [1], [0, 0, 1, 1], [], []>} : vector<8x128xbf16>, vector<128x512xbf16>, vector<8x512xf32> -> vector<8x512xf32>
    %311 = arith.addf %310, %279 : vector<8x512xf32>
    %312 = arith.addf %311, %12 : vector<8x512xf32>
    %313 = vector.extract_strided_slice %312 {offsets = [0, 0], sizes = [8, 128], strides = [1, 1]} : vector<8x512xf32> to vector<8x128xf32>
    %314 = arith.negf %313 : vector<8x128xf32>
    %315 = math.exp %314 : vector<8x128xf32>
    %cst_58 = arith.constant 1.000000e+00 : f32
    %316 = vector.broadcast %cst_58 : f32 to vector<8x128xf32>
    %317 = arith.addf %316, %315 : vector<8x128xf32>
    %318 = arith.divf %316, %317 : vector<8x128xf32>
    %319 = vector.extract_strided_slice %312 {offsets = [0, 128], sizes = [8, 128], strides = [1, 1]} : vector<8x512xf32> to vector<8x128xf32>
    %320 = arith.negf %319 : vector<8x128xf32>
    %321 = math.exp %320 : vector<8x128xf32>
    %cst_59 = arith.constant 1.000000e+00 : f32
    %322 = vector.broadcast %cst_59 : f32 to vector<8x128xf32>
    %323 = arith.addf %322, %321 : vector<8x128xf32>
    %324 = arith.divf %322, %323 : vector<8x128xf32>
    %325 = vector.extract_strided_slice %312 {offsets = [0, 256], sizes = [8, 128], strides = [1, 1]} : vector<8x512xf32> to vector<8x128xf32>
    %326 = math.tanh %325 : vector<8x128xf32>
    %327 = vector.extract_strided_slice %312 {offsets = [0, 384], sizes = [8, 128], strides = [1, 1]} : vector<8x512xf32> to vector<8x128xf32>
    %328 = arith.negf %327 : vector<8x128xf32>
    %329 = math.exp %328 : vector<8x128xf32>
    %cst_60 = arith.constant 1.000000e+00 : f32
    %330 = vector.broadcast %cst_60 : f32 to vector<8x128xf32>
    %331 = arith.addf %330, %329 : vector<8x128xf32>
    %332 = arith.divf %330, %331 : vector<8x128xf32>
    %333 = arith.mulf %324, %277 : vector<8x128xf32>
    %334 = arith.mulf %318, %326 : vector<8x128xf32>
    %335 = arith.addf %333, %334 : vector<8x128xf32>
    %336 = math.tanh %335 : vector<8x128xf32>
    %337 = arith.mulf %332, %336 : vector<8x128xf32>
    %c4_i32 = arith.constant 4 : i32
    %338 = vector.broadcast %c4_i32 : i32 to vector<8x128xi32>
    %339 = arith.cmpi sgt, %0, %338 : vector<8x128xi32>
    %340 = arith.select %339, %308, %274 : vector<8x128xi1>, vector<8x128xf32>
    %341 = arith.select %339, %306, %275 : vector<8x128xi1>, vector<8x128xf32>
    %342 = arith.select %339, %337, %276 : vector<8x128xi1>, vector<8x128xf32>
    %343 = arith.select %339, %335, %277 : vector<8x128xi1>, vector<8x128xf32>
    %344 = arith.truncf %342 : vector<8x128xf32> to vector<8x128xbf16>
    %cst_61 = arith.constant dense<0.000000e+00> : vector<8x512xf32>
    %345 = tpu.matmul %344, %3, %cst_61 {dimension_numbers = #tpu.dot_dimension_numbers<[1], [0], [0], [1], [0, 0, 1, 1], [], []>} : vector<8x128xbf16>, vector<128x512xbf16>, vector<8x512xf32> -> vector<8x512xf32>
    %346 = vector.extract_strided_slice %9 {offsets = [40, 0], sizes = [8, 512], strides = [1, 1]} : vector<64x512xf32> to vector<8x512xf32>
    %347 = arith.truncf %340 : vector<8x128xf32> to vector<8x128xbf16>
    %cst_62 = arith.constant dense<0.000000e+00> : vector<8x512xf32>
    %348 = tpu.matmul %347, %1, %cst_62 {dimension_numbers = #tpu.dot_dimension_numbers<[1], [0], [0], [1], [0, 0, 1, 1], [], []>} : vector<8x128xbf16>, vector<128x512xbf16>, vector<8x512xf32> -> vector<8x512xf32>
    %349 = arith.addf %346, %348 : vector<8x512xf32>
    %350 = vector.extract_strided_slice %349 {offsets = [0, 0], sizes = [8, 128], strides = [1, 1]} : vector<8x512xf32> to vector<8x128xf32>
    %351 = arith.negf %350 : vector<8x128xf32>
    %352 = math.exp %351 : vector<8x128xf32>
    %cst_63 = arith.constant 1.000000e+00 : f32
    %353 = vector.broadcast %cst_63 : f32 to vector<8x128xf32>
    %354 = arith.addf %353, %352 : vector<8x128xf32>
    %355 = arith.divf %353, %354 : vector<8x128xf32>
    %356 = vector.extract_strided_slice %349 {offsets = [0, 128], sizes = [8, 128], strides = [1, 1]} : vector<8x512xf32> to vector<8x128xf32>
    %357 = arith.negf %356 : vector<8x128xf32>
    %358 = math.exp %357 : vector<8x128xf32>
    %cst_64 = arith.constant 1.000000e+00 : f32
    %359 = vector.broadcast %cst_64 : f32 to vector<8x128xf32>
    %360 = arith.addf %359, %358 : vector<8x128xf32>
    %361 = arith.divf %359, %360 : vector<8x128xf32>
    %362 = vector.extract_strided_slice %349 {offsets = [0, 256], sizes = [8, 128], strides = [1, 1]} : vector<8x512xf32> to vector<8x128xf32>
    %363 = math.tanh %362 : vector<8x128xf32>
    %364 = vector.extract_strided_slice %349 {offsets = [0, 384], sizes = [8, 128], strides = [1, 1]} : vector<8x512xf32> to vector<8x128xf32>
    %365 = arith.negf %364 : vector<8x128xf32>
    %366 = math.exp %365 : vector<8x128xf32>
    %cst_65 = arith.constant 1.000000e+00 : f32
    %367 = vector.broadcast %cst_65 : f32 to vector<8x128xf32>
    %368 = arith.addf %367, %366 : vector<8x128xf32>
    %369 = arith.divf %367, %368 : vector<8x128xf32>
    %370 = arith.mulf %361, %341 : vector<8x128xf32>
    %371 = arith.mulf %355, %363 : vector<8x128xf32>
    %372 = arith.addf %370, %371 : vector<8x128xf32>
    %373 = math.tanh %372 : vector<8x128xf32>
    %374 = arith.mulf %369, %373 : vector<8x128xf32>
    %375 = arith.truncf %374 : vector<8x128xf32> to vector<8x128xbf16>
    %cst_66 = arith.constant dense<0.000000e+00> : vector<8x512xf32>
    %376 = tpu.matmul %375, %2, %cst_66 {dimension_numbers = #tpu.dot_dimension_numbers<[1], [0], [0], [1], [0, 0, 1, 1], [], []>} : vector<8x128xbf16>, vector<128x512xbf16>, vector<8x512xf32> -> vector<8x512xf32>
    %377 = arith.addf %376, %345 : vector<8x512xf32>
    %378 = arith.addf %377, %12 : vector<8x512xf32>
    %379 = vector.extract_strided_slice %378 {offsets = [0, 0], sizes = [8, 128], strides = [1, 1]} : vector<8x512xf32> to vector<8x128xf32>
    %380 = arith.negf %379 : vector<8x128xf32>
    %381 = math.exp %380 : vector<8x128xf32>
    %cst_67 = arith.constant 1.000000e+00 : f32
    %382 = vector.broadcast %cst_67 : f32 to vector<8x128xf32>
    %383 = arith.addf %382, %381 : vector<8x128xf32>
    %384 = arith.divf %382, %383 : vector<8x128xf32>
    %385 = vector.extract_strided_slice %378 {offsets = [0, 128], sizes = [8, 128], strides = [1, 1]} : vector<8x512xf32> to vector<8x128xf32>
    %386 = arith.negf %385 : vector<8x128xf32>
    %387 = math.exp %386 : vector<8x128xf32>
    %cst_68 = arith.constant 1.000000e+00 : f32
    %388 = vector.broadcast %cst_68 : f32 to vector<8x128xf32>
    %389 = arith.addf %388, %387 : vector<8x128xf32>
    %390 = arith.divf %388, %389 : vector<8x128xf32>
    %391 = vector.extract_strided_slice %378 {offsets = [0, 256], sizes = [8, 128], strides = [1, 1]} : vector<8x512xf32> to vector<8x128xf32>
    %392 = math.tanh %391 : vector<8x128xf32>
    %393 = vector.extract_strided_slice %378 {offsets = [0, 384], sizes = [8, 128], strides = [1, 1]} : vector<8x512xf32> to vector<8x128xf32>
    %394 = arith.negf %393 : vector<8x128xf32>
    %395 = math.exp %394 : vector<8x128xf32>
    %cst_69 = arith.constant 1.000000e+00 : f32
    %396 = vector.broadcast %cst_69 : f32 to vector<8x128xf32>
    %397 = arith.addf %396, %395 : vector<8x128xf32>
    %398 = arith.divf %396, %397 : vector<8x128xf32>
    %399 = arith.mulf %390, %343 : vector<8x128xf32>
    %400 = arith.mulf %384, %392 : vector<8x128xf32>
    %401 = arith.addf %399, %400 : vector<8x128xf32>
    %402 = math.tanh %401 : vector<8x128xf32>
    %403 = arith.mulf %398, %402 : vector<8x128xf32>
    %c5_i32 = arith.constant 5 : i32
    %404 = vector.broadcast %c5_i32 : i32 to vector<8x128xi32>
    %405 = arith.cmpi sgt, %0, %404 : vector<8x128xi32>
    %406 = arith.select %405, %374, %340 : vector<8x128xi1>, vector<8x128xf32>
    %407 = arith.select %405, %372, %341 : vector<8x128xi1>, vector<8x128xf32>
    %408 = arith.select %405, %403, %342 : vector<8x128xi1>, vector<8x128xf32>
    %409 = arith.select %405, %401, %343 : vector<8x128xi1>, vector<8x128xf32>
    %410 = arith.truncf %408 : vector<8x128xf32> to vector<8x128xbf16>
    %cst_70 = arith.constant dense<0.000000e+00> : vector<8x512xf32>
    %411 = tpu.matmul %410, %3, %cst_70 {dimension_numbers = #tpu.dot_dimension_numbers<[1], [0], [0], [1], [0, 0, 1, 1], [], []>} : vector<8x128xbf16>, vector<128x512xbf16>, vector<8x512xf32> -> vector<8x512xf32>
    %412 = vector.extract_strided_slice %9 {offsets = [48, 0], sizes = [8, 512], strides = [1, 1]} : vector<64x512xf32> to vector<8x512xf32>
    %413 = arith.truncf %406 : vector<8x128xf32> to vector<8x128xbf16>
    %cst_71 = arith.constant dense<0.000000e+00> : vector<8x512xf32>
    %414 = tpu.matmul %413, %1, %cst_71 {dimension_numbers = #tpu.dot_dimension_numbers<[1], [0], [0], [1], [0, 0, 1, 1], [], []>} : vector<8x128xbf16>, vector<128x512xbf16>, vector<8x512xf32> -> vector<8x512xf32>
    %415 = arith.addf %412, %414 : vector<8x512xf32>
    %416 = vector.extract_strided_slice %415 {offsets = [0, 0], sizes = [8, 128], strides = [1, 1]} : vector<8x512xf32> to vector<8x128xf32>
    %417 = arith.negf %416 : vector<8x128xf32>
    %418 = math.exp %417 : vector<8x128xf32>
    %cst_72 = arith.constant 1.000000e+00 : f32
    %419 = vector.broadcast %cst_72 : f32 to vector<8x128xf32>
    %420 = arith.addf %419, %418 : vector<8x128xf32>
    %421 = arith.divf %419, %420 : vector<8x128xf32>
    %422 = vector.extract_strided_slice %415 {offsets = [0, 128], sizes = [8, 128], strides = [1, 1]} : vector<8x512xf32> to vector<8x128xf32>
    %423 = arith.negf %422 : vector<8x128xf32>
    %424 = math.exp %423 : vector<8x128xf32>
    %cst_73 = arith.constant 1.000000e+00 : f32
    %425 = vector.broadcast %cst_73 : f32 to vector<8x128xf32>
    %426 = arith.addf %425, %424 : vector<8x128xf32>
    %427 = arith.divf %425, %426 : vector<8x128xf32>
    %428 = vector.extract_strided_slice %415 {offsets = [0, 256], sizes = [8, 128], strides = [1, 1]} : vector<8x512xf32> to vector<8x128xf32>
    %429 = math.tanh %428 : vector<8x128xf32>
    %430 = vector.extract_strided_slice %415 {offsets = [0, 384], sizes = [8, 128], strides = [1, 1]} : vector<8x512xf32> to vector<8x128xf32>
    %431 = arith.negf %430 : vector<8x128xf32>
    %432 = math.exp %431 : vector<8x128xf32>
    %cst_74 = arith.constant 1.000000e+00 : f32
    %433 = vector.broadcast %cst_74 : f32 to vector<8x128xf32>
    %434 = arith.addf %433, %432 : vector<8x128xf32>
    %435 = arith.divf %433, %434 : vector<8x128xf32>
    %436 = arith.mulf %427, %407 : vector<8x128xf32>
    %437 = arith.mulf %421, %429 : vector<8x128xf32>
    %438 = arith.addf %436, %437 : vector<8x128xf32>
    %439 = math.tanh %438 : vector<8x128xf32>
    %440 = arith.mulf %435, %439 : vector<8x128xf32>
    %441 = arith.truncf %440 : vector<8x128xf32> to vector<8x128xbf16>
    %cst_75 = arith.constant dense<0.000000e+00> : vector<8x512xf32>
    %442 = tpu.matmul %441, %2, %cst_75 {dimension_numbers = #tpu.dot_dimension_numbers<[1], [0], [0], [1], [0, 0, 1, 1], [], []>} : vector<8x128xbf16>, vector<128x512xbf16>, vector<8x512xf32> -> vector<8x512xf32>
    %443 = arith.addf %442, %411 : vector<8x512xf32>
    %444 = arith.addf %443, %12 : vector<8x512xf32>
    %445 = vector.extract_strided_slice %444 {offsets = [0, 0], sizes = [8, 128], strides = [1, 1]} : vector<8x512xf32> to vector<8x128xf32>
    %446 = arith.negf %445 : vector<8x128xf32>
    %447 = math.exp %446 : vector<8x128xf32>
    %cst_76 = arith.constant 1.000000e+00 : f32
    %448 = vector.broadcast %cst_76 : f32 to vector<8x128xf32>
    %449 = arith.addf %448, %447 : vector<8x128xf32>
    %450 = arith.divf %448, %449 : vector<8x128xf32>
    %451 = vector.extract_strided_slice %444 {offsets = [0, 128], sizes = [8, 128], strides = [1, 1]} : vector<8x512xf32> to vector<8x128xf32>
    %452 = arith.negf %451 : vector<8x128xf32>
    %453 = math.exp %452 : vector<8x128xf32>
    %cst_77 = arith.constant 1.000000e+00 : f32
    %454 = vector.broadcast %cst_77 : f32 to vector<8x128xf32>
    %455 = arith.addf %454, %453 : vector<8x128xf32>
    %456 = arith.divf %454, %455 : vector<8x128xf32>
    %457 = vector.extract_strided_slice %444 {offsets = [0, 256], sizes = [8, 128], strides = [1, 1]} : vector<8x512xf32> to vector<8x128xf32>
    %458 = math.tanh %457 : vector<8x128xf32>
    %459 = vector.extract_strided_slice %444 {offsets = [0, 384], sizes = [8, 128], strides = [1, 1]} : vector<8x512xf32> to vector<8x128xf32>
    %460 = arith.negf %459 : vector<8x128xf32>
    %461 = math.exp %460 : vector<8x128xf32>
    %cst_78 = arith.constant 1.000000e+00 : f32
    %462 = vector.broadcast %cst_78 : f32 to vector<8x128xf32>
    %463 = arith.addf %462, %461 : vector<8x128xf32>
    %464 = arith.divf %462, %463 : vector<8x128xf32>
    %465 = arith.mulf %456, %409 : vector<8x128xf32>
    %466 = arith.mulf %450, %458 : vector<8x128xf32>
    %467 = arith.addf %465, %466 : vector<8x128xf32>
    %468 = math.tanh %467 : vector<8x128xf32>
    %469 = arith.mulf %464, %468 : vector<8x128xf32>
    %c6_i32 = arith.constant 6 : i32
    %470 = vector.broadcast %c6_i32 : i32 to vector<8x128xi32>
    %471 = arith.cmpi sgt, %0, %470 : vector<8x128xi32>
    %472 = arith.select %471, %440, %406 : vector<8x128xi1>, vector<8x128xf32>
    %473 = arith.select %471, %438, %407 : vector<8x128xi1>, vector<8x128xf32>
    %474 = arith.select %471, %469, %408 : vector<8x128xi1>, vector<8x128xf32>
    %475 = arith.select %471, %467, %409 : vector<8x128xi1>, vector<8x128xf32>
    %476 = arith.truncf %474 : vector<8x128xf32> to vector<8x128xbf16>
    %cst_79 = arith.constant dense<0.000000e+00> : vector<8x512xf32>
    %477 = tpu.matmul %476, %3, %cst_79 {dimension_numbers = #tpu.dot_dimension_numbers<[1], [0], [0], [1], [0, 0, 1, 1], [], []>} : vector<8x128xbf16>, vector<128x512xbf16>, vector<8x512xf32> -> vector<8x512xf32>
    %478 = vector.extract_strided_slice %9 {offsets = [56, 0], sizes = [8, 512], strides = [1, 1]} : vector<64x512xf32> to vector<8x512xf32>
    %479 = arith.truncf %472 : vector<8x128xf32> to vector<8x128xbf16>
    %cst_80 = arith.constant dense<0.000000e+00> : vector<8x512xf32>
    %480 = tpu.matmul %479, %1, %cst_80 {dimension_numbers = #tpu.dot_dimension_numbers<[1], [0], [0], [1], [0, 0, 1, 1], [], []>} : vector<8x128xbf16>, vector<128x512xbf16>, vector<8x512xf32> -> vector<8x512xf32>
    %481 = arith.addf %478, %480 : vector<8x512xf32>
    %482 = vector.extract_strided_slice %481 {offsets = [0, 0], sizes = [8, 128], strides = [1, 1]} : vector<8x512xf32> to vector<8x128xf32>
    %483 = arith.negf %482 : vector<8x128xf32>
    %484 = math.exp %483 : vector<8x128xf32>
    %cst_81 = arith.constant 1.000000e+00 : f32
    %485 = vector.broadcast %cst_81 : f32 to vector<8x128xf32>
    %486 = arith.addf %485, %484 : vector<8x128xf32>
    %487 = arith.divf %485, %486 : vector<8x128xf32>
    %488 = vector.extract_strided_slice %481 {offsets = [0, 128], sizes = [8, 128], strides = [1, 1]} : vector<8x512xf32> to vector<8x128xf32>
    %489 = arith.negf %488 : vector<8x128xf32>
    %490 = math.exp %489 : vector<8x128xf32>
    %cst_82 = arith.constant 1.000000e+00 : f32
    %491 = vector.broadcast %cst_82 : f32 to vector<8x128xf32>
    %492 = arith.addf %491, %490 : vector<8x128xf32>
    %493 = arith.divf %491, %492 : vector<8x128xf32>
    %494 = vector.extract_strided_slice %481 {offsets = [0, 256], sizes = [8, 128], strides = [1, 1]} : vector<8x512xf32> to vector<8x128xf32>
    %495 = math.tanh %494 : vector<8x128xf32>
    %496 = vector.extract_strided_slice %481 {offsets = [0, 384], sizes = [8, 128], strides = [1, 1]} : vector<8x512xf32> to vector<8x128xf32>
    %497 = arith.negf %496 : vector<8x128xf32>
    %498 = math.exp %497 : vector<8x128xf32>
    %cst_83 = arith.constant 1.000000e+00 : f32
    %499 = vector.broadcast %cst_83 : f32 to vector<8x128xf32>
    %500 = arith.addf %499, %498 : vector<8x128xf32>
    %501 = arith.divf %499, %500 : vector<8x128xf32>
    %502 = arith.mulf %493, %473 : vector<8x128xf32>
    %503 = arith.mulf %487, %495 : vector<8x128xf32>
    %504 = arith.addf %502, %503 : vector<8x128xf32>
    %505 = math.tanh %504 : vector<8x128xf32>
    %506 = arith.mulf %501, %505 : vector<8x128xf32>
    %507 = arith.truncf %506 : vector<8x128xf32> to vector<8x128xbf16>
    %cst_84 = arith.constant dense<0.000000e+00> : vector<8x512xf32>
    %508 = tpu.matmul %507, %2, %cst_84 {dimension_numbers = #tpu.dot_dimension_numbers<[1], [0], [0], [1], [0, 0, 1, 1], [], []>} : vector<8x128xbf16>, vector<128x512xbf16>, vector<8x512xf32> -> vector<8x512xf32>
    %509 = arith.addf %508, %477 : vector<8x512xf32>
    %510 = arith.addf %509, %12 : vector<8x512xf32>
    %511 = vector.extract_strided_slice %510 {offsets = [0, 0], sizes = [8, 128], strides = [1, 1]} : vector<8x512xf32> to vector<8x128xf32>
    %512 = arith.negf %511 : vector<8x128xf32>
    %513 = math.exp %512 : vector<8x128xf32>
    %cst_85 = arith.constant 1.000000e+00 : f32
    %514 = vector.broadcast %cst_85 : f32 to vector<8x128xf32>
    %515 = arith.addf %514, %513 : vector<8x128xf32>
    %516 = arith.divf %514, %515 : vector<8x128xf32>
    %517 = vector.extract_strided_slice %510 {offsets = [0, 128], sizes = [8, 128], strides = [1, 1]} : vector<8x512xf32> to vector<8x128xf32>
    %518 = arith.negf %517 : vector<8x128xf32>
    %519 = math.exp %518 : vector<8x128xf32>
    %cst_86 = arith.constant 1.000000e+00 : f32
    %520 = vector.broadcast %cst_86 : f32 to vector<8x128xf32>
    %521 = arith.addf %520, %519 : vector<8x128xf32>
    %522 = arith.divf %520, %521 : vector<8x128xf32>
    %523 = vector.extract_strided_slice %510 {offsets = [0, 256], sizes = [8, 128], strides = [1, 1]} : vector<8x512xf32> to vector<8x128xf32>
    %524 = math.tanh %523 : vector<8x128xf32>
    %525 = vector.extract_strided_slice %510 {offsets = [0, 384], sizes = [8, 128], strides = [1, 1]} : vector<8x512xf32> to vector<8x128xf32>
    %526 = arith.negf %525 : vector<8x128xf32>
    %527 = math.exp %526 : vector<8x128xf32>
    %cst_87 = arith.constant 1.000000e+00 : f32
    %528 = vector.broadcast %cst_87 : f32 to vector<8x128xf32>
    %529 = arith.addf %528, %527 : vector<8x128xf32>
    %530 = arith.divf %528, %529 : vector<8x128xf32>
    %531 = arith.mulf %522, %475 : vector<8x128xf32>
    %532 = arith.mulf %516, %524 : vector<8x128xf32>
    %533 = arith.addf %531, %532 : vector<8x128xf32>
    %534 = math.tanh %533 : vector<8x128xf32>
    %535 = arith.mulf %530, %534 : vector<8x128xf32>
    %c7_i32 = arith.constant 7 : i32
    %536 = vector.broadcast %c7_i32 : i32 to vector<8x128xi32>
    %537 = arith.cmpi sgt, %0, %536 : vector<8x128xi32>
    %538 = arith.select %537, %535, %474 : vector<8x128xi1>, vector<8x128xf32>
    %c0_88 = arith.constant 0 : index
    %c0_89 = arith.constant 0 : index
    %539 = vector.load %arg8[%c0_88, %c0_89] : memref<2x128xf32, #tpu.memory_space<vmem>>, vector<1x128xf32>
    %540 = vector.broadcast %539 : vector<1x128xf32> to vector<8x128xf32>
    %541 = arith.mulf %538, %540 : vector<8x128xf32>
    %c1 = arith.constant 1 : index
    %c0_90 = arith.constant 0 : index
    %542 = vector.load %arg8[%c1, %c0_90] : memref<2x128xf32, #tpu.memory_space<vmem>>, vector<1x128xf32>
    %543 = vector.broadcast %542 : vector<1x128xf32> to vector<8x128xf32>
    %544 = arith.addf %541, %543 : vector<8x128xf32>
    %c0_91 = arith.constant 0 : index
    %c0_92 = arith.constant 0 : index
    %545 = vector.load %arg9[%c0_91, %c0_92] : memref<8x128xf32, #tpu.memory_space<vmem>>, vector<8x128xf32>
    tpu.vector_store %arg9[%c0_91, %c0_92], %544 {strides = array<i32>} : memref<8x128xf32, #tpu.memory_space<vmem>>, vector<8x128xf32>,
    return
  }
}

</mosaic_0001>

<bundles_post_ra>
// kernel: tpu_custom_call.1
= control target key start
LH: loop header
LB: loop body
LE: loop exit
PB: predicated region body
PF: predicated region fallthrough
CT: control target
= control target key end

     0   :  { %14 = vsyncpa [#allocation3], 0  ;;  %s6644_s0 = inlined_call_operand.hbm [shape: bf16[64,128], index: 0, kind: input, shape index: {}]   ;;  %s6645_s1 = inlined_call_operand.hbm [shape: s32[8,128], index: 1, kind: input, shape index: {}]   ;;  %s6646_s2 = inlined_call_operand.hbm [shape: bf16[128,512], index: 2, kind: input, shape index: {}]   ;;  %s6647_s3 = inlined_call_operand.hbm [shape: bf16[128,512], index: 3, kind: input, shape index: {}]   ;;  %s6648_s4 = inlined_call_operand.vmem [shape: f32[1,512], index: 4, kind: input, shape index: {}]   ;;  %s6649_s5 = inlined_call_operand.hbm [shape: bf16[128,512], index: 5, kind: input, shape index: {}]   ;;  %s6650_s6 = inlined_call_operand.hbm [shape: bf16[128,512], index: 6, kind: input, shape index: {}]   ;;  %s6651_s7 = inlined_call_operand.vmem [shape: f32[1,512], index: 7, kind: input, shape index: {}]   ;;  %s6652_s8 = inlined_call_operand.vmem [shape: f32[2,128], index: 8, kind: input, shape index: {}]   ;;  %s6653_s9 = inlined_call_operand.hbm [shape: f32[8,128], index: 9, kind: output, shape index: {}]  }
   0x1   :  { %15 = vsyncpa [#allocation6], 0 }
   0x2   :  { %16 = vsyncpa [#allocation9], 0 }
   0x3   :  { %17 = vsyncpa [#allocation12], 0 }
   0x4   :  { %18 = vsyncpa [#allocation4], 0  ;;  %s4613_s30 = smov [#allocation5]  }
   0x5   :  { %s37_s10 = sshll.u32 %s4613_s30, 4  ;;  %s38_s10 = int_to_ptr.vmem [resolvable:$true] %s37_s10 }
   0x6   :  { %s4471_s11 = scalar_lea.vmem %s38_s10, 128  ;;  %p4476_p1 = scmp.lt.s32.totalorder %s38_s10, %s38_s10 }
   0x7   :  { %p4472_p0 = scmp.ne.s32.totalorder %s38_s10, %s4471_s11  ;;  %p4477_p2 = scmp.lt.s32.totalorder %s4471_s11, %s4471_s11 }
   0x9   :  { %p4478_p3 = por %p4477_p2, %p4476_p1 }
   0xb   :  { %p4479_p4 = pnand %p4478_p3, %p4472_p0 }
   0xd   :  { %4482 = shalt.err (!%p4479_p4)
}
   0xe   :  { %40 = dma.hbm_to_vmem [thread:$0]  %s6645_s1, 128, %s38_s10, [#allocation6]  }
   0xf   :  { %s4614_s14 = smov [#allocation8]   ;;  %s4615_s16 = smov [#allocation2]  }
  0x10   :  { %s58_s15 = sshll.u32 %s4614_s14, 4  ;;  %s24_s17 = sshll.u32 %s4615_s16, 4  ;;  %s59_s15 = int_to_ptr.vmem [resolvable:$true] %s58_s15  ;;  %s25_s17 = int_to_ptr.vmem [resolvable:$true] %s24_s17 }
  0x11   :  { %s4491_s18 = scalar_lea.vmem %s59_s15, 4096  ;;  %p4496_p6 = scmp.lt.s32.totalorder %s59_s15, %s59_s15 }
  0x12   :  { %p4492_p5 = scmp.ne.s32.totalorder %s59_s15, %s4491_s18  ;;  %p4497_p7 = scmp.lt.s32.totalorder %s4491_s18, %s4491_s18 }
  0x14   :  { %p4498_p8 = por %p4497_p7, %p4496_p6 }
  0x16   :  { %p4499_p9 = pnand %p4498_p8, %p4492_p5 }
  0x18   :  { %4502 = shalt.err (!%p4499_p9)
}
  0x19   :  { %s4616_s19 = smov 256   ;;  %s4617_s20 = smov 16  }
  0x1a   :  { %64 = dma.hbm_to_vmem [thread:$0]  %s6647_s3, 4096, %s59_s15, [#allocation9], %s4616_s19, %s4616_s19, %s4617_s20  }
  0x1b   :  { %s4511_s1 = scalar_lea.vmem %s25_s17, 512  ;;  %p4516_p11 = scmp.lt.s32.totalorder %s25_s17, %s25_s17 }
  0x1c   :  { %p4512_p10 = scmp.ne.s32.totalorder %s25_s17, %s4511_s1  ;;  %p4517_p12 = scmp.lt.s32.totalorder %s4511_s1, %s4511_s1 }
  0x1e   :  { %p4518_p13 = por %p4517_p12, %p4516_p11 }
  0x20   :  { %p4519_p0 = pnand %p4518_p13, %p4512_p10 }
  0x22   :  { %4522 = shalt.err (!%p4519_p0)
}
  0x23   :  { %s4618_s23 = smov 64   ;;  %s4619_s24 = smov 4  }
  0x24   :  { %30 = dma.hbm_to_vmem [thread:$0]  %s6644_s0, 512, %s25_s17, [#allocation3], %s4618_s23, %s4618_s23, %s4619_s24  }
  0x25   :  { %s4620_s27 = smov [#allocation7]   ;;  %s4621_s29 = smov [#allocation10]  }
  0x26   :  { %s46_s28 = sshll.u32 %s4620_s27, 4  ;;  %s72_s30 = sshll.u32 %s4621_s29, 4  ;;  %s47_s28 = int_to_ptr.vmem [resolvable:$true] %s46_s28  ;;  %s73_s30 = int_to_ptr.vmem [resolvable:$true] %s72_s30 }
  0x27   :  { %s4531_s3 = scalar_lea.vmem %s47_s28, 4096  ;;  %p4536_p2 = scmp.lt.s32.totalorder %s47_s28, %s47_s28 }
  0x28   :  { %p4532_p1 = scmp.ne.s32.totalorder %s47_s28, %s4531_s3  ;;  %p4537_p3 = scmp.lt.s32.totalorder %s4531_s3, %s4531_s3 }
  0x2a   :  { %p4538_p4 = por %p4537_p3, %p4536_p2 }
  0x2c   :  { %p4539_p5 = pnand %p4538_p4, %p4532_p1 }
  0x2e   :  { %4542 = shalt.err (!%p4539_p5)
}
  0x2f   :  { %52 = dma.hbm_to_vmem [thread:$0]  %s6646_s2, 4096, %s47_s28, [#allocation6], %s4616_s19, %s4616_s19, %s4617_s20  }
  0x30   :  { %s4551_s0 = scalar_lea.vmem %s73_s30, 4096  ;;  %p4556_p7 = scmp.lt.s32.totalorder %s73_s30, %s73_s30 }
  0x31   :  { %p4552_p6 = scmp.ne.s32.totalorder %s73_s30, %s4551_s0  ;;  %p4557_p8 = scmp.lt.s32.totalorder %s4551_s0, %s4551_s0 }
  0x33   :  { %p4558_p9 = por %p4557_p8, %p4556_p7 }
  0x35   :  { %p4559_p10 = pnand %p4558_p9, %p4552_p6 }
  0x37   :  { %4562 = shalt.err (!%p4559_p10)
}
  0x38   :  { %78 = dma.hbm_to_vmem [thread:$0]  %s6649_s5, 4096, %s73_s30, [#allocation9], %s4616_s19, %s4616_s19, %s4617_s20  }
  0x39   :  { %s4622_s14 = smov [#allocation11]  }
  0x3a   :  { %s84_s15 = sshll.u32 %s4622_s14, 4  ;;  %s85_s15 = int_to_ptr.vmem [resolvable:$true] %s84_s15 }
  0x3b   :  { %s4571_s16 = scalar_lea.vmem %s85_s15, 4096  ;;  %p4576_p12 = scmp.lt.s32.totalorder %s85_s15, %s85_s15 }
  0x3c   :  { %p4572_p11 = scmp.ne.s32.totalorder %s85_s15, %s4571_s16  ;;  %p4577_p13 = scmp.lt.s32.totalorder %s4571_s16, %s4571_s16 }
  0x3e   :  { %p4578_p0 = por %p4577_p13, %p4576_p12 }
  0x40   :  { %p4579_p1 = pnand %p4578_p0, %p4572_p11 }
  0x42   :  { %4582 = shalt.err (!%p4579_p1)
}
  0x43   :  { %90 = dma.hbm_to_vmem [thread:$0]  %s6650_s6, 4096, %s85_s15, [#allocation12], %s4616_s19, %s4616_s19, %s4617_s20  }
  0x44   :  { %4603 = dma.done.wait [#allocation3], 512  }
  0x45   :  { %4604 = vsyncadd [#allocation3], 4294966784 }
  0x46   :  { %4605 = dma.done.wait [#allocation6], 4224  }
  0x47   :  { %4606 = vsyncadd [#allocation6], 4294963072 }
  0x48   :  { %4607 = dma.done.wait [#allocation9], 8192  }
  0x49   :  { %4608 = vsyncadd [#allocation9], 4294959104 }
  0x4a   :  { %4609 = dma.done.wait [#allocation12], 4096  }
  0x4b   :  { %4610 = vsyncadd [#allocation12], 4294963200  ;;  %v6654_v0 = vmov 0   ;;  %v3817_v1 = vld [vmem:[#allocation7 + $0xe4] ss:$16 sps:$4 sm:$0xff]   ;;  %v3865_v35 = vld [vmem:[#allocation2] sm:$0xff]  }
  0x4c   :  { %489 = vmatprep.mubr.bf16.mxu0 %v6654_v0  ;;  %562 = vmatprep.mubr.bf16.mxu1 %v6654_v0  ;;  %v3819_v2 = vld [vmem:[#allocation7 + $0xec] ss:$16 sps:$4 sm:$0xff]   ;;  %v3821_v3 = vld [vmem:[#allocation7 + $0xe0] ss:$16 sps:$4 sm:$0xff]   ;;  %v3822_v4 = vld [vmem:[#allocation7 + $0xe8] ss:$16 sps:$4 sm:$0xff]  }
  0x4d   :  { %457 = vmatprep.subr.bf16.mxu0 %v3817_v1  ;;  %530 = vmatprep.subr.bf16.mxu1 %v3819_v2  ;;  %v3823_v5 = vld [vmem:[#allocation7 + $0xc4] ss:$16 sps:$4 sm:$0xff]   ;;  %v3825_v6 = vld [vmem:[#allocation7 + $0xcc] ss:$16 sps:$4 sm:$0xff]   ;;  %v3827_v7 = vld [vmem:[#allocation7 + $0xc0] ss:$16 sps:$4 sm:$0xff]  }
  0x4e   :  { %458 = vmatpush1.bf16.msra.mxu0 %v3821_v3  ;;  %531 = vmatpush1.bf16.msra.mxu1 %v3822_v4  ;;  %v3828_v8 = vld [vmem:[#allocation7 + $0xc8] ss:$16 sps:$4 sm:$0xff]   ;;  %v3829_v9 = vld [vmem:[#allocation7 + $0xa4] ss:$16 sps:$4 sm:$0xff]   ;;  %v3831_v10 = vld [vmem:[#allocation7 + $0xac] ss:$16 sps:$4 sm:$0xff]  }
  0x4f   :  { %459 = vmatprep.subr.bf16.mxu0 %v3823_v5  ;;  %532 = vmatprep.subr.bf16.mxu1 %v3825_v6  ;;  %v3833_v11 = vld [vmem:[#allocation7 + $0xa0] ss:$16 sps:$4 sm:$0xff]   ;;  %v3834_v12 = vld [vmem:[#allocation7 + $0xa8] ss:$16 sps:$4 sm:$0xff]   ;;  %v3835_v13 = vld [vmem:[#allocation7 + $0x84] ss:$16 sps:$4 sm:$0xff]  }
  0x50   :  { %v3837_v14 = vld [vmem:[#allocation7 + $0x8c] ss:$16 sps:$4 sm:$0xff]   ;;  %v3839_v15 = vld [vmem:[#allocation7 + $0x80] ss:$16 sps:$4 sm:$0xff]   ;;  %v3840_v16 = vld [vmem:[#allocation7 + $0x88] ss:$16 sps:$4 sm:$0xff]  }
  0x51   :  { %v3841_v17 = vld [vmem:[#allocation7 + $0x64] ss:$16 sps:$4 sm:$0xff]   ;;  %v3843_v18 = vld [vmem:[#allocation7 + $0x6c] ss:$16 sps:$4 sm:$0xff]   ;;  %v3845_v19 = vld [vmem:[#allocation7 + $0x60] ss:$16 sps:$4 sm:$0xff]  }
  0x52   :  { %460 = vmatpush1.bf16.msra.mxu0 %v3827_v7  ;;  %533 = vmatpush1.bf16.msra.mxu1 %v3828_v8  ;;  %v3846_v20 = vld [vmem:[#allocation7 + $0x68] ss:$16 sps:$4 sm:$0xff]   ;;  %v3847_v21 = vld [vmem:[#allocation7 + $0x44] ss:$16 sps:$4 sm:$0xff]   ;;  %v3849_v22 = vld [vmem:[#allocation7 + $0x4c] ss:$16 sps:$4 sm:$0xff]  }
  0x53   :  { %461 = vmatprep.subr.bf16.mxu0 %v3829_v9  ;;  %534 = vmatprep.subr.bf16.mxu1 %v3831_v10  ;;  %v3851_v23 = vld [vmem:[#allocation7 + $0x40] ss:$16 sps:$4 sm:$0xff]   ;;  %v3852_v24 = vld [vmem:[#allocation7 + $0x48] ss:$16 sps:$4 sm:$0xff]   ;;  %v3853_v25 = vld [vmem:[#allocation7 + $0x24] ss:$16 sps:$4 sm:$0xff]  }
  0x54   :  { %v3855_v26 = vld [vmem:[#allocation7 + $0x2c] ss:$16 sps:$4 sm:$0xff]   ;;  %v3857_v27 = vld [vmem:[#allocation7 + $0x20] ss:$16 sps:$4 sm:$0xff]   ;;  %v3858_v28 = vld [vmem:[#allocation7 + $0x28] ss:$16 sps:$4 sm:$0xff]  }
  0x55   :  { %v3859_v29 = vld [vmem:[#allocation7 + $0x4] ss:$16 sps:$4 sm:$0xff]   ;;  %v3861_v30 = vld [vmem:[#allocation7 + $0xc] ss:$16 sps:$4 sm:$0xff]   ;;  %v3863_v31 = vld [vmem:[#allocation7] ss:$16 sps:$4 sm:$0xff]  }
  0x56   :  { %462 = vmatpush1.bf16.msra.mxu0 %v3833_v11  ;;  %535 = vmatpush1.bf16.msra.mxu1 %v3834_v12  ;;  %v3864_v32 = vld [vmem:[#allocation7 + $0x8] ss:$16 sps:$4 sm:$0xff]   ;;  %v4707_v33 = vld [vmem:[#allocation11 + $0xe4] ss:$16 sps:$4 sm:$0xff]   ;;  %v4709_v34 = vld [vmem:[#allocation11 + $0xec] ss:$16 sps:$4 sm:$0xff]  }
  0x57   :  { %463 = vmatprep.subr.bf16.mxu0 %v3835_v13  ;;  %536 = vmatprep.subr.bf16.mxu1 %v3837_v14  ;;  %v4711_v36 = vld [vmem:[#allocation11 + $0xe0] ss:$16 sps:$4 sm:$0xff]   ;;  %v4713_v37 = vld [vmem:[#allocation11 + $0xe8] ss:$16 sps:$4 sm:$0xff]   ;;  %v4717_v38 = vld [vmem:[#allocation11 + $0xc4] ss:$16 sps:$4 sm:$0xff]  }
  0x58   :  { %v4719_v39 = vld [vmem:[#allocation11 + $0xcc] ss:$16 sps:$4 sm:$0xff]   ;;  %v4721_v40 = vld [vmem:[#allocation11 + $0xc0] ss:$16 sps:$4 sm:$0xff]   ;;  %v4725_v41 = vld [vmem:[#allocation11 + $0xc8] ss:$16 sps:$4 sm:$0xff]  }
  0x59   :  { %v4729_v42 = vld [vmem:[#allocation11 + $0xa4] ss:$16 sps:$4 sm:$0xff]   ;;  %v4731_v43 = vld [vmem:[#allocation11 + $0xac] ss:$16 sps:$4 sm:$0xff]   ;;  %v4735_v45 = vld [vmem:[#allocation11 + $0xa0] ss:$16 sps:$4 sm:$0xff]  }
  0x5a   :  { %464 = vmatpush1.bf16.msra.mxu0 %v3839_v15  ;;  %537 = vmatpush1.bf16.msra.mxu1 %v3840_v16  ;;  %v3878_v44 = vld [vmem:[#allocation2 + $0x8] sm:$0xff]   ;;  %v4737_v46 = vld [vmem:[#allocation11 + $0xa8] ss:$16 sps:$4 sm:$0xff]   ;;  %v4745_v48 = vld [vmem:[#allocation11 + $0x8c] ss:$16 sps:$4 sm:$0xff]   ;;  %s4624_s22 = smov [#allocation13]  }
  0x5b   :  { %465 = vmatprep.subr.bf16.mxu0 %v3841_v17  ;;  %538 = vmatprep.subr.bf16.mxu1 %v3843_v18  ;;  %v4741_v47 = vld [vmem:[#allocation11 + $0x84] ss:$16 sps:$4 sm:$0xff]   ;;  %v4747_v49 = vld [vmem:[#allocation11 + $0x80] ss:$16 sps:$4 sm:$0xff]   ;;  %v4749_v50 = vld [vmem:[#allocation11 + $0x88] ss:$16 sps:$4 sm:$0xff]  }
  0x5c   :  { %v4753_v51 = vld [vmem:[#allocation11 + $0x64] ss:$16 sps:$4 sm:$0xff]   ;;  %v4757_v52 = vld [vmem:[#allocation11 + $0x6c] ss:$16 sps:$4 sm:$0xff]   ;;  %v4761_v54 = vld [vmem:[#allocation11 + $0x60] ss:$16 sps:$4 sm:$0xff]  }
  0x5d   :  { %v3891_v53 = vld [vmem:[#allocation2 + $0x10] sm:$0xff]   ;;  %v4767_v56 = vld [vmem:[#allocation11 + $0x44] ss:$16 sps:$4 sm:$0xff]   ;;  %v4773_v58 = vld [vmem:[#allocation11 + $0x40] ss:$16 sps:$4 sm:$0xff]   ;;  %s3599_s1 = sshll.u32 %s4624_s22, 4  ;;  %s3600_s1 = int_to_ptr.vmem [resolvable:$true] %s3599_s1 }
  0x5e   :  { %466 = vmatpush1.bf16.msra.mxu0 %v3845_v19  ;;  %539 = vmatpush1.bf16.msra.mxu1 %v3846_v20  ;;  %v4765_v55 = vld [vmem:[#allocation11 + $0x68] ss:$16 sps:$4 sm:$0xff]   ;;  %v4771_v57 = vld [vmem:[#allocation11 + $0x4c] ss:$16 sps:$4 sm:$0xff]   ;;  %v4779_v60 = vld [vmem:[#allocation11 + $0x24] ss:$16 sps:$4 sm:$0xff]   ;;  %p4588_p3 = scmp.lt.s32.totalorder %s3600_s1, %s3600_s1 }
  0x5f   :  { %467 = vmatprep.subr.bf16.mxu0 %v3847_v21  ;;  %540 = vmatprep.subr.bf16.mxu1 %v3849_v22  ;;  %v4775_v59 = vld [vmem:[#allocation11 + $0x48] ss:$16 sps:$4 sm:$0xff]   ;;  %v4783_v61 = vld [vmem:[#allocation11 + $0x2c] ss:$16 sps:$4 sm:$0xff]   ;;  %v3904_v62 = vld [vmem:[#allocation2 + $0x18] sm:$0xff]   ;;  %s4583_s23 = scalar_lea.vmem %s3600_s1, 128 }
  0x60   :  { %v4787_v63 = vld [vmem:[#allocation11 + $0x20] ss:$16 sps:$4 sm:$0xff]   ;;  %v4791_v1 = vld [vmem:[#allocation11 + $0x28] ss:$16 sps:$4 sm:$0xff]   ;;  %v4793_v2 = vld [vmem:[#allocation11 + $0x4] ss:$16 sps:$4 sm:$0xff]   ;;  %p4584_p2 = scmp.ne.s32.totalorder %s3600_s1, %s4583_s23  ;;  %p4589_p4 = scmp.lt.s32.totalorder %s4583_s23, %s4583_s23 }
  0x61   :  { %v4797_v3 = vld [vmem:[#allocation11 + $0xc] ss:$16 sps:$4 sm:$0xff]   ;;  %v4799_v4 = vld [vmem:[#allocation11] ss:$16 sps:$4 sm:$0xff]   ;;  %v4801_v5 = vld [vmem:[#allocation11 + $0x8] ss:$16 sps:$4 sm:$0xff]  }
  0x62   :  { %468 = vmatpush1.bf16.msra.mxu0 %v3851_v23  ;;  %541 = vmatpush1.bf16.msra.mxu1 %v3852_v24  ;;  %v4805_v6 = vld [vmem:[#allocation8 + $0xe4] ss:$16 sps:$4 sm:$0xff]   ;;  %v4809_v7 = vld [vmem:[#allocation8 + $0xec] ss:$16 sps:$4 sm:$0xff]   ;;  %v4813_v8 = vld [vmem:[#allocation8 + $0xe0] ss:$16 sps:$4 sm:$0xff]   ;;  %p4590_p5 = por %p4589_p4, %p4588_p3 }
  0x63   :  { %469 = vmatprep.subr.bf16.mxu0 %v3853_v25  ;;  %542 = vmatprep.subr.bf16.mxu1 %v3855_v26  ;;  %v4817_v9 = vld [vmem:[#allocation8 + $0xe8] ss:$16 sps:$4 sm:$0xff]   ;;  %v4819_v10 = vld [vmem:[#allocation8 + $0xc4] ss:$16 sps:$4 sm:$0xff]   ;;  %v4823_v11 = vld [vmem:[#allocation8 + $0xcc] ss:$16 sps:$4 sm:$0xff]  }
  0x64   :  { %6991 = vst [vmem:[#allocation19_spill] sm:$0xff] %v4823_v11  ;;  %v4827_v12 = vld [vmem:[#allocation8 + $0xc0] ss:$16 sps:$4 sm:$0xff]   ;;  %v4829_v13 = vld [vmem:[#allocation8 + $0xc8] ss:$16 sps:$4 sm:$0xff]   ;;  %p4591_p6 = pnand %p4590_p5, %p4584_p2 }
  0x65   :  { %6992 = vst [vmem:[#allocation20_spill] sm:$0xff] %v4827_v12  ;;  %6993 = vst [vmem:[#allocation21_spill] sm:$0xff] %v4829_v13  ;;  %v4831_v14 = vld [vmem:[#allocation8 + $0xa4] ss:$16 sps:$4 sm:$0xff]   ;;  %v4835_v15 = vld [vmem:[#allocation8 + $0xac] ss:$16 sps:$4 sm:$0xff]  }
  0x66   :  { %470 = vmatpush1.bf16.msra.mxu0 %v3857_v27  ;;  %543 = vmatpush1.bf16.msra.mxu1 %v3858_v28  ;;  %6994 = vst [vmem:[#allocation22_spill] sm:$0xff] %v4831_v14  ;;  %6995 = vst [vmem:[#allocation23_spill] sm:$0xff] %v4835_v15  ;;  %v4839_v16 = vld [vmem:[#allocation8 + $0xa0] ss:$16 sps:$4 sm:$0xff]   ;;  %v4841_v17 = vld [vmem:[#allocation8 + $0xa8] ss:$16 sps:$4 sm:$0xff]  }
  0x67   :  { %471 = vmatprep.subr.bf16.mxu0 %v3859_v29  ;;  %544 = vmatprep.subr.bf16.mxu1 %v3861_v30  ;;  %6996 = vst [vmem:[#allocation24_spill] sm:$0xff] %v4839_v16  ;;  %6997 = vst [vmem:[#allocation25_spill] sm:$0xff] %v4841_v17  ;;  %v4845_v18 = vld [vmem:[#allocation8 + $0x84] ss:$16 sps:$4 sm:$0xff]   ;;  %v4847_v19 = vld [vmem:[#allocation8 + $0x8c] ss:$16 sps:$4 sm:$0xff]  }
  0x68   :  { %6998 = vst [vmem:[#allocation26_spill] sm:$0xff] %v4845_v18  ;;  %6999 = vst [vmem:[#allocation27_spill] sm:$0xff] %v4847_v19  ;;  %v4853_v20 = vld [vmem:[#allocation8 + $0x80] ss:$16 sps:$4 sm:$0xff]   ;;  %v4855_v21 = vld [vmem:[#allocation8 + $0x88] ss:$16 sps:$4 sm:$0xff]  }
  0x69   :  { %7000 = vst [vmem:[#allocation28_spill] sm:$0xff] %v4853_v20  ;;  %7001 = vst [vmem:[#allocation29_spill] sm:$0xff] %v4855_v21  ;;  %v4857_v22 = vld [vmem:[#allocation8 + $0x64] ss:$16 sps:$4 sm:$0xff]   ;;  %v4859_v23 = vld [vmem:[#allocation8 + $0x6c] ss:$16 sps:$4 sm:$0xff]  }
  0x6a   :  { %472 = vmatpush1.bf16.msra.mxu0 %v3863_v31  ;;  %545 = vmatpush1.bf16.msra.mxu1 %v3864_v32  ;;  %7002 = vst [vmem:[#allocation30_spill] sm:$0xff] %v4857_v22  ;;  %7003 = vst [vmem:[#allocation31_spill] sm:$0xff] %v4859_v23  ;;  %v4867_v24 = vld [vmem:[#allocation8 + $0x60] ss:$16 sps:$4 sm:$0xff]   ;;  %v4869_v25 = vld [vmem:[#allocation8 + $0x68] ss:$16 sps:$4 sm:$0xff]  }
  0x6b   :  { %785 = vmatprep.subr.bf16.mxu0 %v4707_v33  ;;  %826 = vmatprep.subr.bf16.mxu1 %v4709_v34  ;;  %7004 = vst [vmem:[#allocation32_spill] sm:$0xff] %v4867_v24  ;;  %7005 = vst [vmem:[#allocation33_spill] sm:$0xff] %v4869_v25  ;;  %v4873_v26 = vld [vmem:[#allocation8 + $0x44] ss:$16 sps:$4 sm:$0xff]   ;;  %v4875_v27 = vld [vmem:[#allocation8 + $0x4c] ss:$16 sps:$4 sm:$0xff]  }
  0x6c   :  { %7006 = vst [vmem:[#allocation34_spill] sm:$0xff] %v4873_v26  ;;  %7007 = vst [vmem:[#allocation35_spill] sm:$0xff] %v4875_v27  ;;  %v4879_v28 = vld [vmem:[#allocation8 + $0x40] ss:$16 sps:$4 sm:$0xff]   ;;  %v4881_v29 = vld [vmem:[#allocation8 + $0x48] ss:$16 sps:$4 sm:$0xff]  }
  0x6d   :  { %490 = vmatmul.mubr.bf16.vlgmr.msra.gmra.mxu0 %v3865_v35  ;;  %563 = vmatmul.mubr.bf16.vlgmr.msra.gmra.mxu1 %v3865_v35  ;;  %7008 = vst [vmem:[#allocation36_spill] sm:$0xff] %v4879_v28  ;;  %7009 = vst [vmem:[#allocation37_spill] sm:$0xff] %v4881_v29  ;;  %v4885_v30 = vld [vmem:[#allocation8 + $0x24] ss:$16 sps:$4 sm:$0xff]   ;;  %v4887_v31 = vld [vmem:[#allocation8 + $0x2c] ss:$16 sps:$4 sm:$0xff]  }
  0x6e   :  { %786 = vmatpush1.bf16.msra.mxu0 %v4711_v36  ;;  %827 = vmatpush1.bf16.msra.mxu1 %v4713_v37  ;;  %7010 = vst [vmem:[#allocation38_spill] sm:$0xff] %v4885_v30  ;;  %7011 = vst [vmem:[#allocation39_spill] sm:$0xff] %v4887_v31  ;;  %v4891_v32 = vld [vmem:[#allocation8 + $0x20] ss:$16 sps:$4 sm:$0xff]   ;;  %v4893_v35 = vld [vmem:[#allocation8 + $0x28] ss:$16 sps:$4 sm:$0xff]  }
  0x6f   :  { %787 = vmatprep.subr.bf16.mxu0 %v4717_v38  ;;  %828 = vmatprep.subr.bf16.mxu1 %v4719_v39  ;;  %7012 = vst [vmem:[#allocation40_spill] sm:$0xff] %v4891_v32  ;;  %7013 = vst [vmem:[#allocation41_spill] sm:$0xff] %v4893_v35 }
  0x70   :  { %499 = vmatprep.mubr.bf16.mxu0 %v6654_v0  ;;  %572 = vmatprep.mubr.bf16.mxu1 %v6654_v0 }
  0x72   :  { %788 = vmatpush1.bf16.msra.mxu0 %v4721_v40  ;;  %829 = vmatpush1.bf16.msra.mxu1 %v4725_v41 }
  0x73   :  { %789 = vmatprep.subr.bf16.mxu0 %v4729_v42  ;;  %830 = vmatprep.subr.bf16.mxu1 %v4731_v43 }
  0x75   :  { %500 = vmatmul.mubr.bf16.gmra.mxu0 %v3878_v44  ;;  %573 = vmatmul.mubr.bf16.gmra.mxu1 %v3878_v44  ;;  %v4897_v44 = vld [vmem:[#allocation8 + $0x4] ss:$16 sps:$4 sm:$0xff]  }
  0x76   :  { %790 = vmatpush1.bf16.msra.mxu0 %v4735_v45  ;;  %831 = vmatpush1.bf16.msra.mxu1 %v4737_v46  ;;  %7014 = vst [vmem:[#allocation42_spill] sm:$0xff] %v4897_v44 }
  0x77   :  { %791 = vmatprep.subr.bf16.mxu0 %v4741_v47  ;;  %832 = vmatprep.subr.bf16.mxu1 %v4745_v48 }
  0x78   :  { %509 = vmatprep.mubr.bf16.mxu0 %v6654_v0  ;;  %582 = vmatprep.mubr.bf16.mxu1 %v6654_v0 }
  0x7a   :  { %792 = vmatpush1.bf16.msra.mxu0 %v4747_v49  ;;  %833 = vmatpush1.bf16.msra.mxu1 %v4749_v50 }
  0x7b   :  { %793 = vmatprep.subr.bf16.mxu0 %v4753_v51  ;;  %834 = vmatprep.subr.bf16.mxu1 %v4757_v52 }
  0x7d   :  { %510 = vmatmul.mubr.bf16.gmra.mxu0 %v3891_v53  ;;  %583 = vmatmul.mubr.bf16.gmra.mxu1 %v3891_v53  ;;  %v4899_v53 = vld [vmem:[#allocation8 + $0xc] ss:$16 sps:$4 sm:$0xff]  }
  0x7e   :  { %794 = vmatpush1.bf16.msra.mxu0 %v4761_v54  ;;  %835 = vmatpush1.bf16.msra.mxu1 %v4765_v55  ;;  %7015 = vst [vmem:[#allocation43_spill] sm:$0xff] %v4899_v53 }
  0x7f   :  { %795 = vmatprep.subr.bf16.mxu0 %v4767_v56  ;;  %836 = vmatprep.subr.bf16.mxu1 %v4771_v57 }
  0x80   :  { %519 = vmatprep.mubr.bf16.mxu0 %v6654_v0  ;;  %592 = vmatprep.mubr.bf16.mxu1 %v6654_v0 }
  0x82   :  { %796 = vmatpush1.bf16.msra.mxu0 %v4773_v58  ;;  %837 = vmatpush1.bf16.msra.mxu1 %v4775_v59 }
  0x83   :  { %797 = vmatprep.subr.bf16.mxu0 %v4779_v60  ;;  %838 = vmatprep.subr.bf16.mxu1 %v4783_v61 }
  0x85   :  { %520 = vmatmul.mubr.bf16.gmra.mxu0 %v3904_v62  ;;  %593 = vmatmul.mubr.bf16.gmra.mxu1 %v3904_v62  ;;  %v4903_v62 = vld [vmem:[#allocation8] ss:$16 sps:$4 sm:$0xff]  }
  0x86   :  { %798 = vmatpush1.bf16.msra.mxu0 %v4787_v63  ;;  %839 = vmatpush1.bf16.msra.mxu1 %v4791_v1  ;;  %7016 = vst [vmem:[#allocation44_spill] sm:$0xff] %v4903_v62 }
  0x87   :  { %799 = vmatprep.subr.bf16.mxu0 %v4793_v2  ;;  %840 = vmatprep.subr.bf16.mxu1 %v4797_v3 }
  0x88   :  { %817 = vmatprep.mubr.bf16.mxu0 %v6654_v0  ;;  %858 = vmatprep.mubr.bf16.mxu1 %v6654_v0 }
  0x8a   :  { %800 = vmatpush1.bf16.msra.mxu0 %v4799_v4  ;;  %841 = vmatpush1.bf16.msra.mxu1 %v4801_v5 }
  0x8b   :  { %1027 = vmatprep.subr.bf16.mxu0 %v4805_v6  ;;  %1068 = vmatprep.subr.bf16.mxu1 %v4809_v7 }
  0x8d   :  { %818 = vmatmul.mubr.bf16.vlgmr.msra.gmra.mxu0 %v6654_v0  ;;  %859 = vmatmul.mubr.bf16.vlgmr.msra.gmra.mxu1 %v6654_v0 }
  0x8e   :  { %1028 = vmatpush1.bf16.msra.mxu0 %v4813_v8  ;;  %1069 = vmatpush1.bf16.msra.mxu1 %v4817_v9 }
  0x8f   :  { %1029 = vmatprep.subr.bf16.mxu0 %v4819_v10  ;;  %1070 = vmatprep.subr.bf16.mxu1 %v4823_v11 }
  0x90   :  { %1059 = vmatprep.mubr.bf16.mxu0 %v6654_v0  ;;  %1100 = vmatprep.mubr.bf16.mxu1 %v6654_v0  ;;  %v4905_v0 = vld [vmem:[#allocation8 + $0x8] ss:$16 sps:$4 sm:$0xff]  }
  0x91   :  { %7017 = vst [vmem:[#allocation45_spill] sm:$0xff] %v4905_v0 }
  0x92   :  { %1030 = vmatpush1.bf16.msra.mxu0 %v4827_v12  ;;  %1071 = vmatpush1.bf16.msra.mxu1 %v4829_v13 }
  0x93   :  { %1031 = vmatprep.subr.bf16.mxu0 %v4831_v14  ;;  %1072 = vmatprep.subr.bf16.mxu1 %v4835_v15 }
  0x96   :  { %1032 = vmatpush1.bf16.msra.mxu0 %v4839_v16  ;;  %1073 = vmatpush1.bf16.msra.mxu1 %v4841_v17 }
  0x97   :  { %1033 = vmatprep.subr.bf16.mxu0 %v4845_v18  ;;  %1074 = vmatprep.subr.bf16.mxu1 %v4847_v19 }
  0x9a   :  { %1034 = vmatpush1.bf16.msra.mxu0 %v4853_v20  ;;  %1075 = vmatpush1.bf16.msra.mxu1 %v4855_v21 }
  0x9b   :  { %1035 = vmatprep.subr.bf16.mxu0 %v4857_v22  ;;  %1076 = vmatprep.subr.bf16.mxu1 %v4859_v23 }
  0x9e   :  { %1036 = vmatpush1.bf16.msra.mxu0 %v4867_v24  ;;  %1077 = vmatpush1.bf16.msra.mxu1 %v4869_v25 }
  0x9f   :  { %1037 = vmatprep.subr.bf16.mxu0 %v4873_v26  ;;  %1078 = vmatprep.subr.bf16.mxu1 %v4875_v27  ;;  %v4973_v27 = vld [vmem:[#allocation10 + $0x4c] ss:$16 sps:$4 sm:$0xff]  }
  0xa0   :  { %7040 = vst [vmem:[#allocation67_spill] sm:$0xff] %v4973_v27 }
  0xa2   :  { %1038 = vmatpush1.bf16.msra.mxu0 %v4879_v28  ;;  %1079 = vmatpush1.bf16.msra.mxu1 %v4881_v29  ;;  %v4933_v29 = vld [vmem:[#allocation10 + $0xc8] ss:$16 sps:$4 sm:$0xff]   ;;  %v4971_v28 = vld [vmem:[#allocation10 + $0x44] ss:$16 sps:$4 sm:$0xff]  }
  0xa3   :  { %1039 = vmatprep.subr.bf16.mxu0 %v4885_v30  ;;  %1080 = vmatprep.subr.bf16.mxu1 %v4887_v31  ;;  %v7018_v31 = vmov 0   ;;  %v4919_v30 = vld [vmem:[#allocation10 + $0xe0] ss:$16 sps:$4 sm:$0xff]   ;;  %7026 = vst [vmem:[#allocation53_spill] sm:$0xff] %v4933_v29  ;;  %7039 = vst [vmem:[#allocation66_spill] sm:$0xff] %v4971_v28 }
  0xa4   :  { %7021 = vst [vmem:[#allocation48_spill] sm:$0xff] %v4919_v30 }
  0xa6   :  { %1040 = vmatpush1.bf16.msra.mxu0 %v4891_v32  ;;  %1081 = vmatpush1.bf16.msra.mxu1 %v4893_v35  ;;  %v4915_v35 = vld [vmem:[#allocation10 + $0xe4] ss:$16 sps:$4 sm:$0xff]   ;;  %v4917_v32 = vld [vmem:[#allocation10 + $0xec] ss:$16 sps:$4 sm:$0xff]  }
  0xa7   :  { %1041 = vmatprep.subr.bf16.mxu0 %v4897_v44  ;;  %1082 = vmatprep.subr.bf16.mxu1 %v4899_v53  ;;  %7019 = vst [vmem:[#allocation46_spill] sm:$0xff] %v4915_v35  ;;  %7020 = vst [vmem:[#allocation47_spill] sm:$0xff] %v4917_v32  ;;  %v4921_v44 = vld [vmem:[#allocation10 + $0xe8] ss:$16 sps:$4 sm:$0xff]   ;;  %v4931_v53 = vld [vmem:[#allocation10 + $0xc0] ss:$16 sps:$4 sm:$0xff]  }
  0xa8   :  { %7022 = vst [vmem:[#allocation49_spill] sm:$0xff] %v4921_v44  ;;  %7025 = vst [vmem:[#allocation52_spill] sm:$0xff] %v4931_v53 }
  0xaa   :  { %1042 = vmatpush1.bf16.msra.mxu0 %v4903_v62  ;;  %1083 = vmatpush1.bf16.msra.mxu1 %v4905_v0  ;;  %v4927_v0 = vld [vmem:[#allocation10 + $0xc4] ss:$16 sps:$4 sm:$0xff]   ;;  %v4929_v62 = vld [vmem:[#allocation10 + $0xcc] ss:$16 sps:$4 sm:$0xff]  }
  0xab   :  { %1298 = vmatprep.subr.bf16.mxu0 %v4915_v35  ;;  %1339 = vmatprep.subr.bf16.mxu1 %v4917_v32  ;;  %7023 = vst [vmem:[#allocation50_spill] sm:$0xff] %v4927_v0  ;;  %7024 = vst [vmem:[#allocation51_spill] sm:$0xff] %v4929_v62  ;;  %v4939_v32 = vld [vmem:[#allocation10 + $0xa4] ss:$16 sps:$4 sm:$0xff]   ;;  %v4945_v35 = vld [vmem:[#allocation10 + $0xa8] ss:$16 sps:$4 sm:$0xff]  }
  0xac   :  { %7027 = vst [vmem:[#allocation54_spill] sm:$0xff] %v4939_v32  ;;  %7030 = vst [vmem:[#allocation57_spill] sm:$0xff] %v4945_v35 }
  0xad   :  { %1060 = vmatmul.mubr.bf16.vlgmr.msra.gmra.mxu0 %v7018_v31  ;;  %1101 = vmatmul.mubr.bf16.vlgmr.msra.gmra.mxu1 %v7018_v31 }
  0xae   :  { %1330 = vmatprep.mubr.bf16.mxu0 %v7018_v31  ;;  %1371 = vmatprep.mubr.bf16.mxu1 %v7018_v31 }
  0xaf   :  { %1299 = vmatpush1.bf16.msra.mxu0 %v4919_v30  ;;  %1340 = vmatpush1.bf16.msra.mxu1 %v4921_v44  ;;  %v4941_v30 = vld [vmem:[#allocation10 + $0xac] ss:$16 sps:$4 sm:$0xff]   ;;  %v4943_v44 = vld [vmem:[#allocation10 + $0xa0] ss:$16 sps:$4 sm:$0xff]  }
  0xb0   :  { %1300 = vmatprep.subr.bf16.mxu0 %v4927_v0  ;;  %1341 = vmatprep.subr.bf16.mxu1 %v4929_v62  ;;  %7028 = vst [vmem:[#allocation55_spill] sm:$0xff] %v4941_v30  ;;  %7029 = vst [vmem:[#allocation56_spill] sm:$0xff] %v4943_v44  ;;  %v4951_v62 = vld [vmem:[#allocation10 + $0x84] ss:$16 sps:$4 sm:$0xff]   ;;  %v4957_v0 = vld [vmem:[#allocation10 + $0x88] ss:$16 sps:$4 sm:$0xff]  }
  0xb1   :  { %7031 = vst [vmem:[#allocation58_spill] sm:$0xff] %v4951_v62  ;;  %7034 = vst [vmem:[#allocation61_spill] sm:$0xff] %v4957_v0 }
  0xb3   :  { %1301 = vmatpush1.bf16.msra.mxu0 %v4931_v53  ;;  %1342 = vmatpush1.bf16.msra.mxu1 %v4933_v29  ;;  %v4953_v53 = vld [vmem:[#allocation10 + $0x8c] ss:$16 sps:$4 sm:$0xff]   ;;  %v4955_v29 = vld [vmem:[#allocation10 + $0x80] ss:$16 sps:$4 sm:$0xff]  }
  0xb4   :  { %1302 = vmatprep.subr.bf16.mxu0 %v4939_v32  ;;  %1343 = vmatprep.subr.bf16.mxu1 %v4941_v30  ;;  %7032 = vst [vmem:[#allocation59_spill] sm:$0xff] %v4953_v53  ;;  %7033 = vst [vmem:[#allocation60_spill] sm:$0xff] %v4955_v29  ;;  %v4963_v30 = vld [vmem:[#allocation10 + $0x64] ss:$16 sps:$4 sm:$0xff]   ;;  %v4969_v32 = vld [vmem:[#allocation10 + $0x68] ss:$16 sps:$4 sm:$0xff]  }
  0xb5   :  { %7035 = vst [vmem:[#allocation62_spill] sm:$0xff] %v4963_v30  ;;  %7038 = vst [vmem:[#allocation65_spill] sm:$0xff] %v4969_v32 }
  0xb7   :  { %1303 = vmatpush1.bf16.msra.mxu0 %v4943_v44  ;;  %1344 = vmatpush1.bf16.msra.mxu1 %v4945_v35  ;;  %v4965_v44 = vld [vmem:[#allocation10 + $0x6c] ss:$16 sps:$4 sm:$0xff]   ;;  %v4967_v35 = vld [vmem:[#allocation10 + $0x60] ss:$16 sps:$4 sm:$0xff]  }
  0xb8   :  { %1304 = vmatprep.subr.bf16.mxu0 %v4951_v62  ;;  %1345 = vmatprep.subr.bf16.mxu1 %v4953_v53  ;;  %7036 = vst [vmem:[#allocation63_spill] sm:$0xff] %v4965_v44  ;;  %7037 = vst [vmem:[#allocation64_spill] sm:$0xff] %v4967_v35  ;;  %v4985_v53 = vld [vmem:[#allocation10 + $0x24] ss:$16 sps:$4 sm:$0xff]   ;;  %v4987_v62 = vld [vmem:[#allocation10 + $0x2c] ss:$16 sps:$4 sm:$0xff]  }
  0xb9   :  { %7043 = vst [vmem:[#allocation70_spill] sm:$0xff] %v4985_v53  ;;  %7044 = vst [vmem:[#allocation71_spill] sm:$0xff] %v4987_v62 }
  0xbb   :  { %1305 = vmatpush1.bf16.msra.mxu0 %v4955_v29  ;;  %1346 = vmatpush1.bf16.msra.mxu1 %v4957_v0  ;;  %v4979_v0 = vld [vmem:[#allocation10 + $0x40] ss:$16 sps:$4 sm:$0xff]   ;;  %v4981_v29 = vld [vmem:[#allocation10 + $0x48] ss:$16 sps:$4 sm:$0xff]  }
  0xbc   :  { %1306 = vmatprep.subr.bf16.mxu0 %v4963_v30  ;;  %1347 = vmatprep.subr.bf16.mxu1 %v4965_v44  ;;  %7041 = vst [vmem:[#allocation68_spill] sm:$0xff] %v4979_v0  ;;  %7042 = vst [vmem:[#allocation69_spill] sm:$0xff] %v4981_v29  ;;  %v4991_v44 = vld [vmem:[#allocation10 + $0x20] ss:$16 sps:$4 sm:$0xff]  }
  0xbd   :  { %7045 = vst [vmem:[#allocation72_spill] sm:$0xff] %v4991_v44 }
  0xbf   :  { %1307 = vmatpush1.bf16.msra.mxu0 %v4967_v35  ;;  %1348 = vmatpush1.bf16.msra.mxu1 %v4969_v32  ;;  %v4993_v35 = vld [vmem:[#allocation10 + $0x28] ss:$16 sps:$4 sm:$0xff]   ;;  %v4997_v32 = vld [vmem:[#allocation10 + $0x4] ss:$16 sps:$4 sm:$0xff]  }
  0xc0   :  { %1308 = vmatprep.subr.bf16.mxu0 %v4971_v28  ;;  %1349 = vmatprep.subr.bf16.mxu1 %v4973_v27  ;;  %7046 = vst [vmem:[#allocation73_spill] sm:$0xff] %v4993_v35  ;;  %7047 = vst [vmem:[#allocation74_spill] sm:$0xff] %v4997_v32  ;;  %v4999_v28 = vld [vmem:[#allocation10 + $0xc] ss:$16 sps:$4 sm:$0xff]   ;;  %v5003_v27 = vld [vmem:[#allocation10] ss:$16 sps:$4 sm:$0xff]  }
  0xc1   :  { %7048 = vst [vmem:[#allocation75_spill] sm:$0xff] %v4999_v28  ;;  %7049 = vst [vmem:[#allocation76_spill] sm:$0xff] %v5003_v27 }
  0xc3   :  { %1309 = vmatpush1.bf16.msra.mxu0 %v4979_v0  ;;  %1350 = vmatpush1.bf16.msra.mxu1 %v4981_v29  ;;  %v5005_v0 = vld [vmem:[#allocation10 + $0x8] ss:$16 sps:$4 sm:$0xff]   ;;  %v253_v29 = vlaneseq }
  0xc4   :  { %1310 = vmatprep.subr.bf16.mxu0 %v4985_v53  ;;  %1351 = vmatprep.subr.bf16.mxu1 %v4987_v62  ;;  %7050 = vst [vmem:[#allocation77_spill] sm:$0xff] %v5005_v0 }
  0xc7   :  { %1311 = vmatpush1.bf16.msra.mxu0 %v4991_v44  ;;  %1352 = vmatpush1.bf16.msra.mxu1 %v4993_v35  ;;  %v5013_v44 = vshrl.u32 %v253_v29, 7 }
  0xc8   :  { %1312 = vmatprep.subr.bf16.mxu0 %v4997_v32  ;;  %1353 = vmatprep.subr.bf16.mxu1 %v4999_v28  ;;  %v251_v28 = vld [vmem:[%s6648_s4] sm:$0xf] }
  0xc9   :  { %v6723_v35 = vsub.s32 2, %v5013_v44  ;;  %v6727_v62 = vsub.s32 0, %v5013_v44  ;;  %v7051_v30 = vsub.s32 3, %v5013_v44 }
  0xcb   :  { %1313 = vmatpush1.bf16.msra.mxu0 %v5003_v27  ;;  %1354 = vmatpush1.bf16.msra.mxu1 %v5005_v0  ;;  %v5036_v53 = vrot.slane %v251_v28, %v6727_v62  ;;  %v5040_v26 = vrot.slane %v251_v28, %v7051_v30 }
  0xcc   :  { %1414 = vmatprep.subr.bf16.mxu0 %v4707_v33  ;;  %1455 = vmatprep.subr.bf16.mxu1 %v4709_v34  ;;  %v6731_v33 = vsub.s32 1, %v5013_v44  ;;  %v5028_v34 = vrot.slane %v251_v28, %v6723_v35 }
  0xce   :  { %v5044_v23 = vrot.slane %v251_v28, %v6731_v33 }
 0x12d   :  { %v5021_v32 = vpop.f32.mrf.mxu0  ;;  %v5023_v27 = vpop.f32.mrf.mxu1 }
 0x12f   :  { %v5030_v29 = vpop.f32.mrf.mxu0  ;;  %v5032_v0 = vpop.f32.mrf.mxu1 }
 0x131   :  { %v495_v25 = vpop.f32.mrf.mxu0  ;;  %v568_v24 = vpop.f32.mrf.mxu1 }
 0x132   :  { %v5047_v35 = vadd.f32 %v495_v25, %v5036_v53  ;;  %v5050_v22 = vadd.f32 %v568_v24, %v5028_v34 }
 0x133   :  { %v497_v21 = vpop.f32.mrf.mxu0  ;;  %v570_v20 = vpop.f32.mrf.mxu1 }
 0x134   :  { %7052 = vst [vmem:[#allocation78_spill] sm:$0xff] %v5047_v35  ;;  %7053 = vst [vmem:[#allocation79_spill] sm:$0xff] %v5050_v22  ;;  %v5053_v62 = vadd.f32 %v497_v21, %v5044_v23  ;;  %v5056_v30 = vadd.f32 %v570_v20, %v5040_v26  ;;  %v492_v35 = vadd.f32 %v5021_v32, %v5036_v53 }
 0x135   :  { %v501_v19 = vpop.f32.mrf.mxu0  ;;  %v574_v18 = vpop.f32.mrf.mxu1 }
 0x136   :  { %7054 = vst [vmem:[#allocation80_spill] sm:$0xff] %v5053_v62  ;;  %7055 = vst [vmem:[#allocation81_spill] sm:$0xff] %v5056_v30  ;;  %v5059_v17 = vadd.f32 %v501_v19, %v5036_v53  ;;  %v5062_v28 = vadd.f32 %v574_v18, %v5028_v34 }
 0x137   :  { %v503_v25 = vpop.f32.mrf.mxu0  ;;  %v576_v33 = vpop.f32.mrf.mxu1 }
 0x138   :  { %7056 = vst [vmem:[#allocation82_spill] sm:$0xff] %v5059_v17  ;;  %7057 = vst [vmem:[#allocation83_spill] sm:$0xff] %v5062_v28  ;;  %v5065_v24 = vadd.f32 %v503_v25, %v5044_v23  ;;  %v5068_v22 = vadd.f32 %v576_v33, %v5040_v26 }
 0x139   :  { %v505_v21 = vpop.f32.mrf.mxu0  ;;  %v578_v62 = vpop.f32.mrf.mxu1 }
 0x13a   :  { %7058 = vst [vmem:[#allocation84_spill] sm:$0xff] %v5065_v24  ;;  %7059 = vst [vmem:[#allocation85_spill] sm:$0xff] %v5068_v22  ;;  %v5071_v20 = vadd.f32 %v505_v21, %v5036_v53  ;;  %v5074_v30 = vadd.f32 %v578_v62, %v5028_v34 }
 0x13b   :  { %v507_v19 = vpop.f32.mrf.mxu0  ;;  %v580_v17 = vpop.f32.mrf.mxu1 }
 0x13c   :  { %7060 = vst [vmem:[#allocation86_spill] sm:$0xff] %v5071_v20  ;;  %7061 = vst [vmem:[#allocation87_spill] sm:$0xff] %v5074_v30  ;;  %v5077_v18 = vadd.f32 %v507_v19, %v5044_v23  ;;  %v5080_v28 = vadd.f32 %v580_v17, %v5040_v26 }
 0x13d   :  { %v511_v25 = vpop.f32.mrf.mxu0  ;;  %v584_v24 = vpop.f32.mrf.mxu1 }
 0x13e   :  { %7062 = vst [vmem:[#allocation88_spill] sm:$0xff] %v5077_v18  ;;  %7063 = vst [vmem:[#allocation89_spill] sm:$0xff] %v5080_v28  ;;  %v5083_v33 = vadd.f32 %v511_v25, %v5036_v53  ;;  %v5086_v22 = vadd.f32 %v584_v24, %v5028_v34 }
 0x13f   :  { %v513_v21 = vpop.f32.mrf.mxu0  ;;  %v586_v20 = vpop.f32.mrf.mxu1 }
 0x140   :  { %7064 = vst [vmem:[#allocation90_spill] sm:$0xff] %v5083_v33  ;;  %7065 = vst [vmem:[#allocation91_spill] sm:$0xff] %v5086_v22  ;;  %v5089_v62 = vadd.f32 %v513_v21, %v5044_v23  ;;  %v5092_v30 = vadd.f32 %v586_v20, %v5040_v26 }
 0x141   :  { %v515_v19 = vpop.f32.mrf.mxu0  ;;  %v588_v18 = vpop.f32.mrf.mxu1 }
 0x142   :  { %7066 = vst [vmem:[#allocation92_spill] sm:$0xff] %v5089_v62  ;;  %7067 = vst [vmem:[#allocation93_spill] sm:$0xff] %v5092_v30  ;;  %v5095_v17 = vadd.f32 %v515_v19, %v5036_v53  ;;  %v5098_v28 = vadd.f32 %v588_v18, %v5028_v34 }
 0x143   :  { %v517_v25 = vpop.f32.mrf.mxu0  ;;  %v590_v33 = vpop.f32.mrf.mxu1 }
 0x144   :  { %7068 = vst [vmem:[#allocation94_spill] sm:$0xff] %v5095_v17  ;;  %7069 = vst [vmem:[#allocation95_spill] sm:$0xff] %v5098_v28  ;;  %v5101_v24 = vadd.f32 %v517_v25, %v5044_v23  ;;  %v5104_v22 = vadd.f32 %v590_v33, %v5040_v26 }
 0x145   :  { %v521_v21 = vpop.f32.mrf.mxu0  ;;  %v594_v62 = vpop.f32.mrf.mxu1 }
 0x146   :  { %7070 = vst [vmem:[#allocation96_spill] sm:$0xff] %v5101_v24  ;;  %7071 = vst [vmem:[#allocation97_spill] sm:$0xff] %v5104_v22  ;;  %v5107_v20 = vadd.f32 %v521_v21, %v5036_v53  ;;  %v5110_v30 = vadd.f32 %v594_v62, %v5028_v34 }
 0x147   :  { %v523_v19 = vpop.f32.mrf.mxu0  ;;  %v596_v17 = vpop.f32.mrf.mxu1 }
 0x148   :  { %7072 = vst [vmem:[#allocation98_spill] sm:$0xff] %v5107_v20  ;;  %7073 = vst [vmem:[#allocation99_spill] sm:$0xff] %v5110_v30  ;;  %v5113_v18 = vadd.f32 %v523_v19, %v5044_v23  ;;  %v5116_v28 = vadd.f32 %v596_v17, %v5040_v26 }
 0x149   :  { %v525_v25 = vpop.f32.mrf.mxu0  ;;  %v598_v24 = vpop.f32.mrf.mxu1 }
 0x14a   :  { %7074 = vst [vmem:[#allocation100_spill] sm:$0xff] %v5113_v18  ;;  %7075 = vst [vmem:[#allocation101_spill] sm:$0xff] %v5116_v28  ;;  %v5119_v33 = vadd.f32 %v525_v25, %v5036_v53  ;;  %v5122_v22 = vadd.f32 %v598_v24, %v5028_v34  ;;  %v565_v53 = vadd.f32 %v5023_v27, %v5028_v34 }
 0x14b   :  { %v527_v21 = vpop.f32.mrf.mxu0  ;;  %v600_v20 = vpop.f32.mrf.mxu1 }
 0x14c   :  { %7076 = vst [vmem:[#allocation102_spill] sm:$0xff] %v5119_v33  ;;  %7077 = vst [vmem:[#allocation103_spill] sm:$0xff] %v5122_v22  ;;  %v5125_v62 = vadd.f32 %v527_v21, %v5044_v23  ;;  %v5128_v30 = vadd.f32 %v600_v20, %v5040_v26  ;;  %v494_v20 = vadd.f32 %v5030_v29, %v5044_v23 }
 0x14d   :  { %v5130_v19 = vpop.f32.mrf.mxu0  ;;  %v5132_v17 = vpop.f32.mrf.mxu1 }
 0x14e   :  { %7078 = vst [vmem:[#allocation104_spill] sm:$0xff] %v5125_v62  ;;  %7079 = vst [vmem:[#allocation105_spill] sm:$0xff] %v5128_v30 }
 0x14f   :  { %v5134_v28 = vpop.f32.mrf.mxu0  ;;  %v5136_v18 = vpop.f32.mrf.mxu1 }
 0x151   :  { %v823_v25 = vpop.f32.mrf.mxu0  ;;  %v864_v33 = vpop.f32.mrf.mxu1 }
 0x153   :  { %v824_v24 = vpop.f32.mrf.mxu0  ;;  %v865_v22 = vpop.f32.mrf.mxu1 }
 0x154   :  { %v567_v22 = vadd.f32 %v5032_v0, %v5040_v26 }
 0x16d   :  { %v1061_v21 = vpop.f32.mrf.mxu0  ;;  %v1102_v62 = vpop.f32.mrf.mxu1 }
 0x16e   :  { %v1109_v30 = vadd.f32 %v1061_v21, %v492_v35  ;;  %v1111_v23 = vadd.f32 %v1102_v62, %v565_v53 }
 0x16f   :  { %v1063_v16 = vpop.f32.mrf.mxu0  ;;  %v1104_v15 = vpop.f32.mrf.mxu1 }
 0x170   :  { %v3711_v14 = vmul.f32 -1.442695, %v1109_v30  ;;  %v1110_v13 = vadd.f32 %v1063_v16, %v494_v20  ;;  %v1112_v32 = vadd.f32 %v1104_v15, %v567_v22 }
 0x171   :  { %v1065_v12 = vpop.f32.mrf.mxu0  ;;  %v1106_v11 = vpop.f32.mrf.mxu1 }
 0x172   :  { %4013 = vpow2.f32 %v3711_v14  ;;  %v3712_v25 = vmul.f32 -1.442695, %v1110_v13  ;;  %v3713_v35 = vmul.f32 -1.442695, %v1112_v32 }
 0x173   :  { %v1066_v33 = vpop.f32.mrf.mxu0  ;;  %v1107_v24 = vpop.f32.mrf.mxu1 }
 0x174   :  { %4015 = vpow2.f32 %v3712_v25 }
 0x175   :  { %4017 = vtanh.f32 %v1111_v23 }
 0x176   :  { %4019 = vpow2.f32 %v3713_v35 }
 0x17f   :  { %v4014_v29 = vpop.eup %4013 }
 0x180   :  { %v1116_v21 = vadd.f32 1.0, %v4014_v29  ;;  %v7138_v29 = vld [vmem:[#allocation71_spill] sm:$0xff] }
 0x181   :  { %v4016_v16 = vpop.eup %4015 }
 0x182   :  { %4021 = vrcp.f32 %v1116_v21  ;;  %v1122_v11 = vadd.f32 1.0, %v4016_v16  ;;  %v4018_v12 = vpop.eup %4017  ;;  %v7086_v16 = vld [vmem:[#allocation19_spill] sm:$0xff] }
 0x183   :  { %v4020_v13 = vpop.eup %4019 }
 0x184   :  { %4023 = vrcp.f32 %v1122_v11  ;;  %v1129_v0 = vadd.f32 1.0, %v4020_v13  ;;  %v7087_v11 = vld [vmem:[#allocation20_spill] sm:$0xff]  ;;  %v7089_v13 = vld [vmem:[#allocation22_spill] sm:$0xff] }
 0x186   :  { %4025 = vrcp.f32 %v1129_v0  ;;  %v7096_v0 = vld [vmem:[#allocation29_spill] sm:$0xff] }
 0x18f   :  { %v4022_v14 = vpop.eup %4021 }
 0x190   :  { %v1133_v30 = vmul.f32 %v4022_v14, %v4018_v12  ;;  %v7088_v12 = vld [vmem:[#allocation21_spill] sm:$0xff]  ;;  %v7090_v14 = vld [vmem:[#allocation23_spill] sm:$0xff] }
 0x191   :  { %v4024_v20 = vpop.eup %4023 }
 0x192   :  { %v1132_v15 = vmul.f32 0.0, %v4024_v20  ;;  %v7095_v20 = vld [vmem:[#allocation28_spill] sm:$0xff] }
 0x193   :  { %v4026_v27 = vpop.eup %4025 }
 0x194   :  { %v5146_v26 = vadd.f32 %v1133_v30, %v1132_v15  ;;  %v7091_v30 = vld [vmem:[#allocation24_spill] sm:$0xff]  ;;  %v7097_v15 = vld [vmem:[#allocation30_spill] sm:$0xff] }
 0x196   :  { %4027 = vtanh.f32 %v5146_v26 }
 0x1a3   :  { %v4028_v34 = vpop.eup %4027 }
 0x1a4   :  { %v5149_v62 = vmul.f32 %v4028_v34, %v4026_v27  ;;  %v7098_v27 = vld [vmem:[#allocation31_spill] sm:$0xff]  ;;  %v7099_v34 = vld [vmem:[#allocation32_spill] sm:$0xff] }
 0x1a6   :  { %v5153_v25 = vpack.c.bf16 %v5149_v62, %v5149_v62 }
 0x1a8   :  { %1331 = vmatmul.mubr.bf16.vlgmr.msra.gmra.mxu0 %v5153_v25  ;;  %1372 = vmatmul.mubr.bf16.vlgmr.msra.gmra.mxu1 %v5153_v25 }
 0x1a9   :  { %1415 = vmatpush1.bf16.msra.mxu0 %v4711_v36  ;;  %1456 = vmatpush1.bf16.msra.mxu1 %v4713_v37  ;;  %v603_v36 = vld [vmem:[%s6651_s7] sm:$0xf]  ;;  %v7080_v37 = vsub.s32 0, %v5013_v44 }
 0x1aa   :  { %1416 = vmatprep.subr.bf16.mxu0 %v4717_v38  ;;  %1457 = vmatprep.subr.bf16.mxu1 %v4719_v39 }
 0x1ab   :  { %1446 = vmatprep.mubr.bf16.mxu0 %v7018_v31  ;;  %1487 = vmatprep.mubr.bf16.mxu1 %v7018_v31  ;;  %v5196_v38 = vrot.slane %v603_v36, %v7080_v37  ;;  %v7101_v37 = vld [vmem:[#allocation34_spill] sm:$0xff] }
 0x1ad   :  { %1417 = vmatpush1.bf16.msra.mxu0 %v4721_v40  ;;  %1458 = vmatpush1.bf16.msra.mxu1 %v4725_v41 }
 0x1ae   :  { %1418 = vmatprep.subr.bf16.mxu0 %v4729_v42  ;;  %1459 = vmatprep.subr.bf16.mxu1 %v4731_v43  ;;  %v7081_v42 = vsub.s32 1, %v5013_v44 }
 0x1b0   :  { %v5201_v43 = vrot.slane %v603_v36, %v7081_v42  ;;  %v7105_v42 = vld [vmem:[#allocation38_spill] sm:$0xff] }
 0x1b1   :  { %1419 = vmatpush1.bf16.msra.mxu0 %v4735_v45  ;;  %1460 = vmatpush1.bf16.msra.mxu1 %v4737_v46 }
 0x1b2   :  { %1420 = vmatprep.subr.bf16.mxu0 %v4741_v47  ;;  %1461 = vmatprep.subr.bf16.mxu1 %v4745_v48 }
 0x1b5   :  { %1421 = vmatpush1.bf16.msra.mxu0 %v4747_v49  ;;  %1462 = vmatpush1.bf16.msra.mxu1 %v4749_v50 }
 0x1b6   :  { %1422 = vmatprep.subr.bf16.mxu0 %v4753_v51  ;;  %1463 = vmatprep.subr.bf16.mxu1 %v4757_v52 }
 0x1b9   :  { %1423 = vmatpush1.bf16.msra.mxu0 %v4761_v54  ;;  %1464 = vmatpush1.bf16.msra.mxu1 %v4765_v55 }
 0x1ba   :  { %1424 = vmatprep.subr.bf16.mxu0 %v4767_v56  ;;  %1465 = vmatprep.subr.bf16.mxu1 %v4771_v57  ;;  %v7082_v57 = vsub.s32 3, %v5013_v44 }
 0x1bd   :  { %1425 = vmatpush1.bf16.msra.mxu0 %v4773_v58  ;;  %1466 = vmatpush1.bf16.msra.mxu1 %v4775_v59  ;;  %v5208_v58 = vrot.slane %v603_v36, %v7082_v57  ;;  %v7117_v57 = vld [vmem:[#allocation50_spill] sm:$0xff] }
 0x1be   :  { %1426 = vmatprep.subr.bf16.mxu0 %v4779_v60  ;;  %1467 = vmatprep.subr.bf16.mxu1 %v4783_v61  ;;  %v7083_v61 = vsub.s32 2, %v5013_v44 }
 0x1c1   :  { %1427 = vmatpush1.bf16.msra.mxu0 %v4787_v63  ;;  %1468 = vmatpush1.bf16.msra.mxu1 %v4791_v1  ;;  %v5214_v63 = vrot.slane %v603_v36, %v7083_v61  ;;  %v7100_v36 = vld [vmem:[#allocation33_spill] sm:$0xff] }
 0x1c2   :  { %1428 = vmatprep.subr.bf16.mxu0 %v4793_v2  ;;  %1469 = vmatprep.subr.bf16.mxu1 %v4797_v3  ;;  %v7120_v61 = vld [vmem:[#allocation53_spill] sm:$0xff] }
 0x1c5   :  { %1429 = vmatpush1.bf16.msra.mxu0 %v4799_v4  ;;  %1470 = vmatpush1.bf16.msra.mxu1 %v4801_v5 }
 0x1c6   :  { %1497 = vmatprep.subr.bf16.mxu0 %v4805_v6  ;;  %1538 = vmatprep.subr.bf16.mxu1 %v4809_v7 }
 0x268   :  { %v1332_v39 = vpop.f32.mrf.mxu0  ;;  %v1373_v40 = vpop.f32.mrf.mxu1 }
 0x269   :  { %v1333_v41 = vadd.f32 %v1332_v39, %v5130_v19  ;;  %v1374_v1 = vadd.f32 %v1373_v40, %v5132_v17  ;;  %v5221_v17 = vld [vmem:[#allocation5] sm:$0xff]  ;;  %v7102_v39 = vld [vmem:[#allocation35_spill] sm:$0xff]  ;;  %v7103_v40 = vld [vmem:[#allocation36_spill] sm:$0xff] }
 0x26a   :  { %v1334_v45 = vpop.f32.mrf.mxu0  ;;  %v1375_v46 = vpop.f32.mrf.mxu1  ;;  %vm1408_vm0 = vcmp.gt.s32.totalorder %v5221_v17, 0  ;;  %vm1718_vm2 = vcmp.gt.s32.totalorder %v5221_v17, 1  ;;  %vm2028_vm3 = vcmp.gt.s32.totalorder %v5221_v17, 2 }
 0x26b   :  { %v1380_v47 = vadd.f32 %v1333_v41, %v5196_v38  ;;  %v1335_v48 = vadd.f32 %v1334_v45, %v5134_v28  ;;  %v1376_v59 = vadd.f32 %v1375_v46, %v5136_v18  ;;  %v1382_v4 = vadd.f32 %v1374_v1, %v5214_v63  ;;  %vm5229_vm1 = vmpackc.low %vm1408_vm0, %vm1408_vm0  ;;  %v7104_v41 = vld [vmem:[#allocation37_spill] sm:$0xff]  ;;  %v7106_v45 = vld [vmem:[#allocation39_spill] sm:$0xff] }
 0x26c   :  { %v1336_v49 = vpop.f32.mrf.mxu0  ;;  %v1377_v50 = vpop.f32.mrf.mxu1  ;;  %v7107_v46 = vld [vmem:[#allocation40_spill] sm:$0xff]  ;;  %v7121_v1 = vld [vmem:[#allocation54_spill] sm:$0xff] }
 0x26d   :  { %v3746_v51 = vmul.f32 -1.442695, %v1380_v47  ;;  %v1381_v52 = vadd.f32 %v1335_v48, %v5201_v43  ;;  %v1383_v60 = vadd.f32 %v1376_v59, %v5208_v58  ;;  %v7108_v47 = vld [vmem:[#allocation41_spill] sm:$0xff]  ;;  %v7109_v48 = vld [vmem:[#allocation42_spill] sm:$0xff]  ;;  %v7110_v49 = vld [vmem:[#allocation43_spill] sm:$0xff] }
 0x26e   :  { %v1337_v54 = vpop.f32.mrf.mxu0  ;;  %v1378_v55 = vpop.f32.mrf.mxu1  ;;  %v7111_v50 = vld [vmem:[#allocation44_spill] sm:$0xff]  ;;  %v7118_v59 = vld [vmem:[#allocation51_spill] sm:$0xff] }
 0x26f   :  { %4029 = vpow2.f32 %v3746_v51  ;;  %v3747_v56 = vmul.f32 -1.442695, %v1381_v52  ;;  %v3748_v2 = vmul.f32 -1.442695, %v1383_v60  ;;  %v7112_v51 = vld [vmem:[#allocation45_spill] sm:$0xff]  ;;  %v7113_v52 = vld [vmem:[#allocation46_spill] sm:$0xff] }
 0x270   :  { %v7114_v54 = vld [vmem:[#allocation47_spill] sm:$0xff]  ;;  %v7115_v55 = vld [vmem:[#allocation48_spill] sm:$0xff] }
 0x271   :  { %4031 = vpow2.f32 %v3747_v56  ;;  %v7116_v56 = vld [vmem:[#allocation49_spill] sm:$0xff]  ;;  %v7119_v60 = vld [vmem:[#allocation52_spill] sm:$0xff] }
 0x272   :  { %4033 = vpow2.f32 %v3748_v2  ;;  %v7122_v2 = vld [vmem:[#allocation55_spill] sm:$0xff] }
 0x27c   :  { %v4030_v3 = vpop.eup %4029 }
 0x27d   :  { %v1387_v5 = vadd.f32 1.0, %v4030_v3  ;;  %v7124_v3 = vld [vmem:[#allocation57_spill] sm:$0xff] }
 0x27e   :  { %v4032_v6 = vpop.eup %4031 }
 0x27f   :  { %4035 = vrcp.f32 %v1387_v5  ;;  %v1393_v7 = vadd.f32 1.0, %v4032_v6  ;;  %v4034_v28 = vpop.eup %4033  ;;  %v7126_v5 = vld [vmem:[#allocation59_spill] sm:$0xff]  ;;  %v7127_v6 = vld [vmem:[#allocation60_spill] sm:$0xff] }
 0x280   :  { %4037 = vtanh.f32 %v1382_v4  ;;  %v1400_v44 = vadd.f32 1.0, %v4034_v28  ;;  %v7125_v4 = vld [vmem:[#allocation58_spill] sm:$0xff] }
 0x281   :  { %4039 = vrcp.f32 %v1393_v7  ;;  %v7128_v7 = vld [vmem:[#allocation61_spill] sm:$0xff]  ;;  %v7129_v28 = vld [vmem:[#allocation62_spill] sm:$0xff] }
 0x282   :  { %4041 = vrcp.f32 %v1400_v44  ;;  %v7133_v44 = vld [vmem:[#allocation66_spill] sm:$0xff] }
 0x28c   :  { %v4036_v18 = vpop.eup %4035 }
 0x28d   :  { %v4038_v19 = vpop.eup %4037 }
 0x28e   :  { %v4040_v33 = vpop.eup %4039  ;;  %v1404_v22 = vmul.f32 %v4038_v19, %v4036_v18  ;;  %v7130_v18 = vld [vmem:[#allocation63_spill] sm:$0xff]  ;;  %v7131_v19 = vld [vmem:[#allocation64_spill] sm:$0xff] }
 0x28f   :  { %v1403_v24 = vmul.f32 0.0, %v4040_v33  ;;  %v4042_v53 = vpop.eup %4041  ;;  %v7132_v33 = vld [vmem:[#allocation65_spill] sm:$0xff] }
 0x291   :  { %v5218_v32 = vadd.f32 %v1404_v22, %v1403_v24  ;;  %v7134_v24 = vld [vmem:[#allocation67_spill] sm:$0xff]  ;;  %v7135_v22 = vld [vmem:[#allocation68_spill] sm:$0xff] }
 0x293   :  { %4043 = vtanh.f32 %v5218_v32 }
 0x2a0   :  { %v4044_v23 = vpop.eup %4043 }
 0x2a1   :  { %v5223_v35 = vmul.f32 %v4044_v23, %v4042_v53  ;;  %v7136_v53 = vld [vmem:[#allocation69_spill] sm:$0xff]  ;;  %v7137_v23 = vld [vmem:[#allocation70_spill] sm:$0xff] }
 0x2a3   :  { %v3750_v21 = vpack.c.bf16 %v5223_v35, %v5223_v35 }
 0x2a5   :  { %3751 = vmatmul.mubr.msk.bf16.vlgmr.msra.gmra.mxu0 %vm5229_vm1, %v3750_v21  ;;  %3754 = vmatmul.mubr.msk.bf16.vlgmr.msra.gmra.mxu1 %vm5229_vm1, %v3750_v21  ;;  %v7139_v21 = vld [vmem:[#allocation72_spill] sm:$0xff] }
 0x2a6   :  { %1498 = vmatpush1.bf16.msra.mxu0 %v4813_v8  ;;  %1539 = vmatpush1.bf16.msra.mxu1 %v4817_v9  ;;  %v7092_v8 = vld [vmem:[#allocation25_spill] sm:$0xff]  ;;  %v7093_v9 = vld [vmem:[#allocation26_spill] sm:$0xff] }
 0x2a7   :  { %1499 = vmatprep.subr.bf16.mxu0 %v4819_v10  ;;  %1540 = vmatprep.subr.bf16.mxu1 %v7086_v16  ;;  %v7094_v10 = vld [vmem:[#allocation27_spill] sm:$0xff]  ;;  %v7140_v16 = vld [vmem:[#allocation73_spill] sm:$0xff] }
 0x2a8   :  { %1529 = vmatprep.mubr.bf16.mxu0 %v7018_v31  ;;  %1570 = vmatprep.mubr.bf16.mxu1 %v7018_v31 }
 0x2aa   :  { %1500 = vmatpush1.bf16.msra.mxu0 %v7087_v11  ;;  %1541 = vmatpush1.bf16.msra.mxu1 %v7088_v12  ;;  %v7141_v11 = vld [vmem:[#allocation74_spill] sm:$0xff]  ;;  %v7142_v12 = vld [vmem:[#allocation75_spill] sm:$0xff] }
 0x2ab   :  { %1501 = vmatprep.subr.bf16.mxu0 %v7089_v13  ;;  %1542 = vmatprep.subr.bf16.mxu1 %v7090_v14  ;;  %v7143_v13 = vld [vmem:[#allocation76_spill] sm:$0xff]  ;;  %v7144_v14 = vld [vmem:[#allocation77_spill] sm:$0xff] }
 0x2ae   :  { %1502 = vmatpush1.bf16.msra.mxu0 %v7091_v30  ;;  %1543 = vmatpush1.bf16.msra.mxu1 %v7092_v8  ;;  %v5311_v30 = vld [vmem:[#allocation11 + $0xe4] ss:$16 sps:$4 sm:$0xff]   ;;  %v5314_v8 = vld [vmem:[#allocation11 + $0xec] ss:$16 sps:$4 sm:$0xff]  }
 0x2af   :  { %1503 = vmatprep.subr.bf16.mxu0 %v7093_v9  ;;  %1544 = vmatprep.subr.bf16.mxu1 %v7094_v10  ;;  %7145 = vst [vmem:[#allocation19_spill] sm:$0xff] %v5311_v30  ;;  %7146 = vst [vmem:[#allocation20_spill] sm:$0xff] %v5314_v8 }
 0x2b2   :  { %1504 = vmatpush1.bf16.msra.mxu0 %v7095_v20  ;;  %1545 = vmatpush1.bf16.msra.mxu1 %v7096_v0 }
 0x2b3   :  { %1505 = vmatprep.subr.bf16.mxu0 %v7097_v15  ;;  %1546 = vmatprep.subr.bf16.mxu1 %v7098_v27 }
 0x2b6   :  { %1506 = vmatpush1.bf16.msra.mxu0 %v7099_v34  ;;  %1547 = vmatpush1.bf16.msra.mxu1 %v7100_v36 }
 0x2b7   :  { %1507 = vmatprep.subr.bf16.mxu0 %v7101_v37  ;;  %1548 = vmatprep.subr.bf16.mxu1 %v7102_v39 }
 0x2ba   :  { %1508 = vmatpush1.bf16.msra.mxu0 %v7103_v40  ;;  %1549 = vmatpush1.bf16.msra.mxu1 %v7104_v41  ;;  %v7147_v40 = vld [vmem:[#allocation78_spill] sm:$0xff] }
 0x2bb   :  { %1509 = vmatprep.subr.bf16.mxu0 %v7105_v42  ;;  %1550 = vmatprep.subr.bf16.mxu1 %v7106_v45 }
 0x2be   :  { %1510 = vmatpush1.bf16.msra.mxu0 %v7107_v46  ;;  %1551 = vmatpush1.bf16.msra.mxu1 %v7108_v47  ;;  %v7148_v47 = vld [vmem:[#allocation80_spill] sm:$0xff] }
 0x2bf   :  { %1511 = vmatprep.subr.bf16.mxu0 %v7109_v48  ;;  %1552 = vmatprep.subr.bf16.mxu1 %v7110_v49 }
 0x2c2   :  { %1512 = vmatpush1.bf16.msra.mxu0 %v7111_v50  ;;  %1553 = vmatpush1.bf16.msra.mxu1 %v7112_v51 }
 0x2c3   :  { %1608 = vmatprep.subr.bf16.mxu0 %v7113_v52  ;;  %1649 = vmatprep.subr.bf16.mxu1 %v7114_v54 }
 0x2c5   :  { %3757 = vmatmul.mubr.msk.bf16.vlgmr.msra.gmra.mxu0 %vm5229_vm1, %v5153_v25  ;;  %3760 = vmatmul.mubr.msk.bf16.vlgmr.msra.gmra.mxu1 %vm5229_vm1, %v5153_v25  ;;  %v7123_v25 = vld [vmem:[#allocation56_spill] sm:$0xff] }
 0x2c6   :  { %1609 = vmatpush1.bf16.msra.mxu0 %v7115_v55  ;;  %1650 = vmatpush1.bf16.msra.mxu1 %v7116_v56  ;;  %v7149_v55 = vld [vmem:[#allocation81_spill] sm:$0xff] }
 0x2c7   :  { %1610 = vmatprep.subr.bf16.mxu0 %v7117_v57  ;;  %1651 = vmatprep.subr.bf16.mxu1 %v7118_v59  ;;  %v7150_v57 = vld [vmem:[#allocation79_spill] sm:$0xff] }
 0x2c8   :  { %1640 = vmatprep.mubr.bf16.mxu0 %v7018_v31  ;;  %1681 = vmatprep.mubr.bf16.mxu1 %v7018_v31 }
 0x2ca   :  { %1611 = vmatpush1.bf16.msra.mxu0 %v7119_v60  ;;  %1652 = vmatpush1.bf16.msra.mxu1 %v7120_v61 }
 0x2cb   :  { %1612 = vmatprep.subr.bf16.mxu0 %v7121_v1  ;;  %1653 = vmatprep.subr.bf16.mxu1 %v7122_v2 }
 0x2ce   :  { %1613 = vmatpush1.bf16.msra.mxu0 %v7123_v25  ;;  %1654 = vmatpush1.bf16.msra.mxu1 %v7124_v3 }
 0x2cf   :  { %1614 = vmatprep.subr.bf16.mxu0 %v7125_v4  ;;  %1655 = vmatprep.subr.bf16.mxu1 %v7126_v5 }
 0x2d2   :  { %1615 = vmatpush1.bf16.msra.mxu0 %v7127_v6  ;;  %1656 = vmatpush1.bf16.msra.mxu1 %v7128_v7 }
 0x2d3   :  { %1616 = vmatprep.subr.bf16.mxu0 %v7129_v28  ;;  %1657 = vmatprep.subr.bf16.mxu1 %v7130_v18 }
 0x2d6   :  { %1617 = vmatpush1.bf16.msra.mxu0 %v7131_v19  ;;  %1658 = vmatpush1.bf16.msra.mxu1 %v7132_v33 }
 0x2d7   :  { %1618 = vmatprep.subr.bf16.mxu0 %v7133_v44  ;;  %1659 = vmatprep.subr.bf16.mxu1 %v7134_v24 }
 0x2da   :  { %1619 = vmatpush1.bf16.msra.mxu0 %v7135_v22  ;;  %1660 = vmatpush1.bf16.msra.mxu1 %v7136_v53 }
 0x2db   :  { %1620 = vmatprep.subr.bf16.mxu0 %v7137_v23  ;;  %1661 = vmatprep.subr.bf16.mxu1 %v7138_v29 }
 0x2de   :  { %1621 = vmatpush1.bf16.msra.mxu0 %v7139_v21  ;;  %1662 = vmatpush1.bf16.msra.mxu1 %v7140_v16 }
 0x2df   :  { %1622 = vmatprep.subr.bf16.mxu0 %v7141_v11  ;;  %1663 = vmatprep.subr.bf16.mxu1 %v7142_v12 }
 0x2e2   :  { %1623 = vmatpush1.bf16.msra.mxu0 %v7143_v13  ;;  %1664 = vmatpush1.bf16.msra.mxu1 %v7144_v14 }
 0x2e3   :  { %1724 = vmatprep.subr.bf16.mxu0 %v5311_v30  ;;  %1765 = vmatprep.subr.bf16.mxu1 %v5314_v8 }
 0x365   :  { %v5317_v9 = vpop.f32.mrf.mxu0  ;;  %v5319_v10 = vpop.f32.mrf.mxu1 }
 0x367   :  { %v5321_v20 = vpop.f32.mrf.mxu0  ;;  %v5323_v0 = vpop.f32.mrf.mxu1 }
 0x369   :  { %v1452_v15 = vpop.f32.mrf.mxu0  ;;  %v1493_v27 = vpop.f32.mrf.mxu1 }
 0x36b   :  { %v1453_v34 = vpop.f32.mrf.mxu0  ;;  %v1494_v36 = vpop.f32.mrf.mxu1 }
 0x385   :  { %v1531_v37 = vpop.f32.mrf.mxu0  ;;  %v1572_v39 = vpop.f32.mrf.mxu1 }
 0x386   :  { %v1579_v41 = vadd.f32 %v1531_v37, %v7147_v40  ;;  %v1581_v59 = vadd.f32 %v1572_v39, %v7150_v57  ;;  %v1410_v37 = vsel %vm1408_vm0, %v5146_v26, 0.0  ;;  %v5367_v57 = vld [vmem:[#allocation11 + $0xac] ss:$16 sps:$4 sm:$0xff]  }
 0x387   :  { %v1533_v42 = vpop.f32.mrf.mxu0  ;;  %v1574_v45 = vpop.f32.mrf.mxu1 }
 0x388   :  { %v3761_v46 = vmul.f32 -1.442695, %v1579_v41  ;;  %v1580_v48 = vadd.f32 %v1533_v42, %v7148_v47  ;;  %v1582_v56 = vadd.f32 %v1574_v45, %v7149_v55  ;;  %v5361_v55 = vld [vmem:[#allocation11 + $0xc8] ss:$16 sps:$4 sm:$0xff]  }
 0x389   :  { %v1535_v49 = vpop.f32.mrf.mxu0  ;;  %v1576_v50 = vpop.f32.mrf.mxu1 }
 0x38a   :  { %4045 = vpow2.f32 %v3761_v46  ;;  %v3762_v51 = vmul.f32 -1.442695, %v1580_v48  ;;  %v3763_v60 = vmul.f32 -1.442695, %v1582_v56  ;;  %v1409_v48 = vsel %vm1408_vm0, %v5149_v62, 0.0 }
 0x38b   :  { %v1536_v52 = vpop.f32.mrf.mxu0  ;;  %v1577_v54 = vpop.f32.mrf.mxu1  ;;  %v5344_v50 = vld [vmem:[#allocation11 + $0xe0] ss:$16 sps:$4 sm:$0xff]   ;;  %v5353_v62 = vld [vmem:[#allocation11 + $0xcc] ss:$16 sps:$4 sm:$0xff]   ;;  %v5364_v56 = vld [vmem:[#allocation11 + $0xa4] ss:$16 sps:$4 sm:$0xff]  }
 0x38c   :  { %4047 = vpow2.f32 %v3762_v51  ;;  %v5347_v51 = vld [vmem:[#allocation11 + $0xe8] ss:$16 sps:$4 sm:$0xff]   ;;  %v5350_v52 = vld [vmem:[#allocation11 + $0xc4] ss:$16 sps:$4 sm:$0xff]   ;;  %v5358_v54 = vld [vmem:[#allocation11 + $0xc0] ss:$16 sps:$4 sm:$0xff]  }
 0x38d   :  { %4049 = vtanh.f32 %v1581_v59  ;;  %v5370_v59 = vld [vmem:[#allocation11 + $0xa0] ss:$16 sps:$4 sm:$0xff]  }
 0x38e   :  { %4051 = vpow2.f32 %v3763_v60  ;;  %v5373_v60 = vld [vmem:[#allocation11 + $0xa8] ss:$16 sps:$4 sm:$0xff]  }
 0x397   :  { %v4046_v61 = vpop.eup %4045 }
 0x398   :  { %v1586_v1 = vadd.f32 1.0, %v4046_v61  ;;  %v5376_v61 = vld [vmem:[#allocation11 + $0x84] ss:$16 sps:$4 sm:$0xff]  }
 0x399   :  { %v4048_v2 = vpop.eup %4047 }
 0x39a   :  { %4053 = vrcp.f32 %v1586_v1  ;;  %v1592_v25 = vadd.f32 1.0, %v4048_v2  ;;  %v4050_v3 = vpop.eup %4049  ;;  %v5379_v1 = vld [vmem:[#allocation11 + $0x8c] ss:$16 sps:$4 sm:$0xff]   ;;  %v5382_v2 = vld [vmem:[#allocation11 + $0x80] ss:$16 sps:$4 sm:$0xff]  }
 0x39b   :  { %v4052_v15 = vpop.eup %4051  ;;  %7152 = vst [vmem:[#allocation22_spill] sm:$0xff] %v5382_v2 }
 0x39c   :  { %4055 = vrcp.f32 %v1592_v25  ;;  %v1599_v40 = vadd.f32 1.0, %v4052_v15  ;;  %v5385_v25 = vld [vmem:[#allocation11 + $0x88] ss:$16 sps:$4 sm:$0xff]   ;;  %v5391_v15 = vld [vmem:[#allocation11 + $0x6c] ss:$16 sps:$4 sm:$0xff]  }
 0x39d   :  { %7153 = vst [vmem:[#allocation23_spill] sm:$0xff] %v5385_v25  ;;  %7155 = vst [vmem:[#allocation25_spill] sm:$0xff] %v5391_v15 }
 0x39e   :  { %4057 = vrcp.f32 %v1599_v40  ;;  %v5406_v40 = vld [vmem:[#allocation11 + $0x40] ss:$16 sps:$4 sm:$0xff]  }
 0x39f   :  { %7160 = vst [vmem:[#allocation30_spill] sm:$0xff] %v5406_v40 }
 0x3a7   :  { %v4054_v27 = vpop.eup %4053 }
 0x3a8   :  { %v1603_v34 = vmul.f32 %v4054_v27, %v4050_v3  ;;  %v5388_v3 = vld [vmem:[#allocation11 + $0x64] ss:$16 sps:$4 sm:$0xff]   ;;  %v5394_v27 = vld [vmem:[#allocation11 + $0x60] ss:$16 sps:$4 sm:$0xff]  }
 0x3a9   :  { %v4056_v36 = vpop.eup %4055  ;;  %7154 = vst [vmem:[#allocation24_spill] sm:$0xff] %v5388_v3  ;;  %7156 = vst [vmem:[#allocation26_spill] sm:$0xff] %v5394_v27 }
 0x3aa   :  { %v1602_v39 = vmul.f32 %v4056_v36, %v1410_v37  ;;  %v5400_v36 = vld [vmem:[#allocation11 + $0x44] ss:$16 sps:$4 sm:$0xff]  }
 0x3ab   :  { %v4058_v45 = vpop.eup %4057  ;;  %7158 = vst [vmem:[#allocation28_spill] sm:$0xff] %v5400_v36 }
 0x3ac   :  { %v1604_v41 = vadd.f32 %v1603_v34, %v1602_v39  ;;  %v5397_v34 = vld [vmem:[#allocation11 + $0x68] ss:$16 sps:$4 sm:$0xff]  }
 0x3ad   :  { %7157 = vst [vmem:[#allocation27_spill] sm:$0xff] %v5397_v34  ;;  %v5409_v39 = vld [vmem:[#allocation11 + $0x48] ss:$16 sps:$4 sm:$0xff]  }
 0x3ae   :  { %4059 = vtanh.f32 %v1604_v41  ;;  %v5335_v42 = vsel %vm1718_vm2, %v1604_v41, %v1410_v37  ;;  %v5403_v37 = vld [vmem:[#allocation11 + $0x4c] ss:$16 sps:$4 sm:$0xff]   ;;  %7161 = vst [vmem:[#allocation31_spill] sm:$0xff] %v5409_v39  ;;  %v5412_v41 = vld [vmem:[#allocation11 + $0x24] ss:$16 sps:$4 sm:$0xff]  }
 0x3af   :  { %7159 = vst [vmem:[#allocation29_spill] sm:$0xff] %v5403_v37  ;;  %7162 = vst [vmem:[#allocation32_spill] sm:$0xff] %v5412_v41 }
 0x3bb   :  { %v4060_v46 = vpop.eup %4059 }
 0x3bc   :  { %v1606_v47 = vmul.f32 %v4060_v46, %v4058_v45  ;;  %v5415_v45 = vld [vmem:[#allocation11 + $0x2c] ss:$16 sps:$4 sm:$0xff]   ;;  %v5418_v46 = vld [vmem:[#allocation11 + $0x20] ss:$16 sps:$4 sm:$0xff]  }
 0x3bd   :  { %7163 = vst [vmem:[#allocation33_spill] sm:$0xff] %v5415_v45  ;;  %7164 = vst [vmem:[#allocation34_spill] sm:$0xff] %v5418_v46 }
 0x3be   :  { %v1607_v49 = vpack.c.bf16 %v1606_v47, %v1606_v47  ;;  %v5342_v26 = vsel %vm1718_vm2, %v1606_v47, %v1409_v48  ;;  %v5421_v47 = vld [vmem:[#allocation11 + $0x28] ss:$16 sps:$4 sm:$0xff]   ;;  %v5424_v48 = vld [vmem:[#allocation11 + $0x4] ss:$16 sps:$4 sm:$0xff]  }
 0x3bf   :  { %7151 = vst [vmem:[#allocation21_spill] sm:$0xff] %v5342_v26  ;;  %7165 = vst [vmem:[#allocation35_spill] sm:$0xff] %v5421_v47 }
 0x3c0   :  { %1641 = vmatmul.mubr.bf16.vlgmr.msra.gmra.mxu0 %v1607_v49  ;;  %1682 = vmatmul.mubr.bf16.vlgmr.msra.gmra.mxu1 %v1607_v49  ;;  %7166 = vst [vmem:[#allocation36_spill] sm:$0xff] %v5424_v48  ;;  %v5427_v49 = vld [vmem:[#allocation11 + $0xc] ss:$16 sps:$4 sm:$0xff]  }
 0x3c1   :  { %1725 = vmatpush1.bf16.msra.mxu0 %v5344_v50  ;;  %1766 = vmatpush1.bf16.msra.mxu1 %v5347_v51  ;;  %7167 = vst [vmem:[#allocation37_spill] sm:$0xff] %v5427_v49 }
 0x3c2   :  { %1726 = vmatprep.subr.bf16.mxu0 %v5350_v52  ;;  %1767 = vmatprep.subr.bf16.mxu1 %v5353_v62 }
 0x3c3   :  { %1756 = vmatprep.mubr.bf16.mxu0 %v7018_v31  ;;  %1797 = vmatprep.mubr.bf16.mxu1 %v7018_v31 }
 0x3c5   :  { %1727 = vmatpush1.bf16.msra.mxu0 %v5358_v54  ;;  %1768 = vmatpush1.bf16.msra.mxu1 %v5361_v55 }
 0x3c6   :  { %1728 = vmatprep.subr.bf16.mxu0 %v5364_v56  ;;  %1769 = vmatprep.subr.bf16.mxu1 %v5367_v57 }
 0x3c9   :  { %1729 = vmatpush1.bf16.msra.mxu0 %v5370_v59  ;;  %1770 = vmatpush1.bf16.msra.mxu1 %v5373_v60 }
 0x3ca   :  { %1730 = vmatprep.subr.bf16.mxu0 %v5376_v61  ;;  %1771 = vmatprep.subr.bf16.mxu1 %v5379_v1 }
 0x3cd   :  { %1731 = vmatpush1.bf16.msra.mxu0 %v5382_v2  ;;  %1772 = vmatpush1.bf16.msra.mxu1 %v5385_v25 }
 0x3ce   :  { %1732 = vmatprep.subr.bf16.mxu0 %v5388_v3  ;;  %1773 = vmatprep.subr.bf16.mxu1 %v5391_v15 }
 0x3d1   :  { %1733 = vmatpush1.bf16.msra.mxu0 %v5394_v27  ;;  %1774 = vmatpush1.bf16.msra.mxu1 %v5397_v34 }
 0x3d2   :  { %1734 = vmatprep.subr.bf16.mxu0 %v5400_v36  ;;  %1775 = vmatprep.subr.bf16.mxu1 %v5403_v37 }
 0x3d5   :  { %1735 = vmatpush1.bf16.msra.mxu0 %v5406_v40  ;;  %1776 = vmatpush1.bf16.msra.mxu1 %v5409_v39 }
 0x3d6   :  { %1736 = vmatprep.subr.bf16.mxu0 %v5412_v41  ;;  %1777 = vmatprep.subr.bf16.mxu1 %v5415_v45  ;;  %v5430_v41 = vld [vmem:[#allocation11] ss:$16 sps:$4 sm:$0xff]   ;;  %v5433_v45 = vld [vmem:[#allocation11 + $0x8] ss:$16 sps:$4 sm:$0xff]  }
 0x3d7   :  { %7168 = vst [vmem:[#allocation38_spill] sm:$0xff] %v5430_v41  ;;  %7169 = vst [vmem:[#allocation39_spill] sm:$0xff] %v5433_v45 }
 0x3d9   :  { %1737 = vmatpush1.bf16.msra.mxu0 %v5418_v46  ;;  %1778 = vmatpush1.bf16.msra.mxu1 %v5421_v47  ;;  %v5436_v46 = vld [vmem:[#allocation8 + $0xe4] ss:$16 sps:$4 sm:$0xff]   ;;  %v5439_v47 = vld [vmem:[#allocation8 + $0xec] ss:$16 sps:$4 sm:$0xff]  }
 0x3da   :  { %1738 = vmatprep.subr.bf16.mxu0 %v5424_v48  ;;  %1779 = vmatprep.subr.bf16.mxu1 %v5427_v49  ;;  %7170 = vst [vmem:[#allocation40_spill] sm:$0xff] %v5436_v46  ;;  %7171 = vst [vmem:[#allocation41_spill] sm:$0xff] %v5439_v47 }
 0x3dd   :  { %1739 = vmatpush1.bf16.msra.mxu0 %v5430_v41  ;;  %1780 = vmatpush1.bf16.msra.mxu1 %v5433_v45 }
 0x3de   :  { %1807 = vmatprep.subr.bf16.mxu0 %v5436_v46  ;;  %1848 = vmatprep.subr.bf16.mxu1 %v5439_v47 }
 0x480   :  { %v1642_v48 = vpop.f32.mrf.mxu0  ;;  %v1683_v39 = vpop.f32.mrf.mxu1 }
 0x481   :  { %v1643_v49 = vadd.f32 %v1642_v48, %v5317_v9  ;;  %v1684_v48 = vadd.f32 %v1683_v39, %v5319_v10 }
 0x482   :  { %v1644_v40 = vpop.f32.mrf.mxu0  ;;  %v1685_v37 = vpop.f32.mrf.mxu1 }
 0x483   :  { %v1690_v41 = vadd.f32 %v1643_v49, %v5196_v38  ;;  %v1645_v36 = vadd.f32 %v1644_v40, %v5321_v20  ;;  %v1686_v47 = vadd.f32 %v1685_v37, %v5323_v0  ;;  %v1692_v20 = vadd.f32 %v1684_v48, %v5214_v63 }
 0x484   :  { %v1646_v34 = vpop.f32.mrf.mxu0  ;;  %v1687_v45 = vpop.f32.mrf.mxu1  ;;  %v1412_v0 = vsel %vm1408_vm0, %v5218_v32, 0.0 }
 0x485   :  { %v3764_v27 = vmul.f32 -1.442695, %v1690_v41  ;;  %v1691_v15 = vadd.f32 %v1645_v36, %v5201_v43  ;;  %v1693_v9 = vadd.f32 %v1686_v47, %v5208_v58 }
 0x486   :  { %v1647_v46 = vpop.f32.mrf.mxu0  ;;  %v1688_v3 = vpop.f32.mrf.mxu1 }
 0x487   :  { %4061 = vpow2.f32 %v3764_v27  ;;  %v3765_v25 = vmul.f32 -1.442695, %v1691_v15  ;;  %v3766_v2 = vmul.f32 -1.442695, %v1693_v9  ;;  %v1411_v9 = vsel %vm1408_vm0, %v5223_v35, 0.0 }
 0x488   :  { %v5475_v35 = vld [vmem:[#allocation8 + $0xcc] ss:$16 sps:$4 sm:$0xff]  }
 0x489   :  { %4063 = vpow2.f32 %v3765_v25 }
 0x48a   :  { %4065 = vpow2.f32 %v3766_v2 }
 0x494   :  { %v4062_v49 = vpop.eup %4061 }
 0x495   :  { %v1697_v34 = vadd.f32 1.0, %v4062_v49  ;;  %v5466_v49 = vld [vmem:[#allocation8 + $0xe0] ss:$16 sps:$4 sm:$0xff]  }
 0x496   :  { %v4064_v40 = vpop.eup %4063 }
 0x497   :  { %4067 = vrcp.f32 %v1697_v34  ;;  %v1703_v36 = vadd.f32 1.0, %v4064_v40  ;;  %v4066_v3 = vpop.eup %4065  ;;  %v5472_v34 = vld [vmem:[#allocation8 + $0xc4] ss:$16 sps:$4 sm:$0xff]   ;;  %v5480_v40 = vld [vmem:[#allocation8 + $0xc0] ss:$16 sps:$4 sm:$0xff]  }
 0x498   :  { %4069 = vtanh.f32 %v1692_v20  ;;  %v1710_v10 = vadd.f32 1.0, %v4066_v3  ;;  %v5469_v20 = vld [vmem:[#allocation8 + $0xe8] ss:$16 sps:$4 sm:$0xff]   ;;  %v5486_v3 = vld [vmem:[#allocation8 + $0xa4] ss:$16 sps:$4 sm:$0xff]  }
 0x499   :  { %4071 = vrcp.f32 %v1703_v36  ;;  %v5483_v36 = vld [vmem:[#allocation8 + $0xc8] ss:$16 sps:$4 sm:$0xff]  }
 0x49a   :  { %4073 = vrcp.f32 %v1710_v10  ;;  %v5501_v10 = vld [vmem:[#allocation8 + $0x8c] ss:$16 sps:$4 sm:$0xff]  }
 0x4a4   :  { %v4068_v15 = vpop.eup %4067 }
 0x4a5   :  { %v4070_v25 = vpop.eup %4069 }
 0x4a6   :  { %v4072_v27 = vpop.eup %4071  ;;  %v1714_v37 = vmul.f32 %v4070_v25, %v4068_v15  ;;  %v5489_v15 = vld [vmem:[#allocation8 + $0xac] ss:$16 sps:$4 sm:$0xff]   ;;  %v5492_v25 = vld [vmem:[#allocation8 + $0xa0] ss:$16 sps:$4 sm:$0xff]  }
 0x4a7   :  { %v1713_v39 = vmul.f32 %v4072_v27, %v1412_v0  ;;  %v4074_v45 = vpop.eup %4073  ;;  %v5495_v27 = vld [vmem:[#allocation8 + $0xa8] ss:$16 sps:$4 sm:$0xff]  }
 0x4a9   :  { %v1715_v41 = vadd.f32 %v1714_v37, %v1713_v39  ;;  %v5504_v37 = vld [vmem:[#allocation8 + $0x80] ss:$16 sps:$4 sm:$0xff]   ;;  %v5507_v39 = vld [vmem:[#allocation8 + $0x88] ss:$16 sps:$4 sm:$0xff]  }
 0x4ab   :  { %4075 = vtanh.f32 %v1715_v41  ;;  %v5455_v2 = vsel %vm1718_vm2, %v1715_v41, %v1412_v0  ;;  %v5498_v0 = vld [vmem:[#allocation8 + $0x84] ss:$16 sps:$4 sm:$0xff]  }
 0x4ac   :  { %v5510_v41 = vld [vmem:[#allocation8 + $0x64] ss:$16 sps:$4 sm:$0xff]  }
 0x4ad   :  { %7172 = vst [vmem:[#allocation42_spill] sm:$0xff] %v5510_v41 }
 0x4b8   :  { %v4076_v46 = vpop.eup %4075 }
 0x4b9   :  { %v1717_v47 = vmul.f32 %v4076_v46, %v4074_v45  ;;  %v5513_v45 = vld [vmem:[#allocation8 + $0x6c] ss:$16 sps:$4 sm:$0xff]   ;;  %v5516_v46 = vld [vmem:[#allocation8 + $0x60] ss:$16 sps:$4 sm:$0xff]  }
 0x4ba   :  { %7173 = vst [vmem:[#allocation43_spill] sm:$0xff] %v5513_v45  ;;  %7174 = vst [vmem:[#allocation44_spill] sm:$0xff] %v5516_v46 }
 0x4bb   :  { %v5462_v32 = vsel %vm1718_vm2, %v1717_v47, %v1411_v9  ;;  %v5519_v47 = vld [vmem:[#allocation8 + $0x68] ss:$16 sps:$4 sm:$0xff]   ;;  %v5522_v9 = vld [vmem:[#allocation8 + $0x44] ss:$16 sps:$4 sm:$0xff]  }
 0x4bc   :  { %v1723_v48 = vpack.c.bf16 %v5462_v32, %v5462_v32  ;;  %7175 = vst [vmem:[#allocation45_spill] sm:$0xff] %v5519_v47  ;;  %7176 = vst [vmem:[#allocation46_spill] sm:$0xff] %v5522_v9 }
 0x4be   :  { %1757 = vmatmul.mubr.bf16.vlgmr.msra.gmra.mxu0 %v1723_v48  ;;  %1798 = vmatmul.mubr.bf16.vlgmr.msra.gmra.mxu1 %v1723_v48  ;;  %v5525_v48 = vld [vmem:[#allocation8 + $0x4c] ss:$16 sps:$4 sm:$0xff]  }
 0x4bf   :  { %1808 = vmatpush1.bf16.msra.mxu0 %v5466_v49  ;;  %1849 = vmatpush1.bf16.msra.mxu1 %v5469_v20  ;;  %7177 = vst [vmem:[#allocation47_spill] sm:$0xff] %v5525_v48 }
 0x4c0   :  { %1809 = vmatprep.subr.bf16.mxu0 %v5472_v34  ;;  %1850 = vmatprep.subr.bf16.mxu1 %v5475_v35 }
 0x4c1   :  { %1839 = vmatprep.mubr.bf16.mxu0 %v7018_v31  ;;  %1880 = vmatprep.mubr.bf16.mxu1 %v7018_v31 }
 0x4c3   :  { %1810 = vmatpush1.bf16.msra.mxu0 %v5480_v40  ;;  %1851 = vmatpush1.bf16.msra.mxu1 %v5483_v36 }
 0x4c4   :  { %1811 = vmatprep.subr.bf16.mxu0 %v5486_v3  ;;  %1852 = vmatprep.subr.bf16.mxu1 %v5489_v15 }
 0x4c7   :  { %1812 = vmatpush1.bf16.msra.mxu0 %v5492_v25  ;;  %1853 = vmatpush1.bf16.msra.mxu1 %v5495_v27 }
 0x4c8   :  { %1813 = vmatprep.subr.bf16.mxu0 %v5498_v0  ;;  %1854 = vmatprep.subr.bf16.mxu1 %v5501_v10 }
 0x4cb   :  { %1814 = vmatpush1.bf16.msra.mxu0 %v5504_v37  ;;  %1855 = vmatpush1.bf16.msra.mxu1 %v5507_v39 }
 0x4cc   :  { %1815 = vmatprep.subr.bf16.mxu0 %v5510_v41  ;;  %1856 = vmatprep.subr.bf16.mxu1 %v5513_v45  ;;  %v5528_v41 = vld [vmem:[#allocation8 + $0x40] ss:$16 sps:$4 sm:$0xff]   ;;  %v5531_v45 = vld [vmem:[#allocation8 + $0x48] ss:$16 sps:$4 sm:$0xff]  }
 0x4cd   :  { %7178 = vst [vmem:[#allocation48_spill] sm:$0xff] %v5528_v41  ;;  %7179 = vst [vmem:[#allocation49_spill] sm:$0xff] %v5531_v45 }
 0x4cf   :  { %1816 = vmatpush1.bf16.msra.mxu0 %v5516_v46  ;;  %1857 = vmatpush1.bf16.msra.mxu1 %v5519_v47  ;;  %v5534_v46 = vld [vmem:[#allocation8 + $0x24] ss:$16 sps:$4 sm:$0xff]   ;;  %v5537_v47 = vld [vmem:[#allocation8 + $0x2c] ss:$16 sps:$4 sm:$0xff]  }
 0x4d0   :  { %1817 = vmatprep.subr.bf16.mxu0 %v5522_v9  ;;  %1858 = vmatprep.subr.bf16.mxu1 %v5525_v48  ;;  %7180 = vst [vmem:[#allocation50_spill] sm:$0xff] %v5534_v46  ;;  %7181 = vst [vmem:[#allocation51_spill] sm:$0xff] %v5537_v47  ;;  %v5540_v9 = vld [vmem:[#allocation8 + $0x20] ss:$16 sps:$4 sm:$0xff]   ;;  %v5543_v48 = vld [vmem:[#allocation8 + $0x28] ss:$16 sps:$4 sm:$0xff]  }
 0x4d1   :  { %7182 = vst [vmem:[#allocation52_spill] sm:$0xff] %v5540_v9  ;;  %7183 = vst [vmem:[#allocation53_spill] sm:$0xff] %v5543_v48 }
 0x4d3   :  { %1818 = vmatpush1.bf16.msra.mxu0 %v5528_v41  ;;  %1859 = vmatpush1.bf16.msra.mxu1 %v5531_v45  ;;  %v5546_v41 = vld [vmem:[#allocation8 + $0x4] ss:$16 sps:$4 sm:$0xff]   ;;  %v5549_v45 = vld [vmem:[#allocation8 + $0xc] ss:$16 sps:$4 sm:$0xff]  }
 0x4d4   :  { %1819 = vmatprep.subr.bf16.mxu0 %v5534_v46  ;;  %1860 = vmatprep.subr.bf16.mxu1 %v5537_v47  ;;  %7184 = vst [vmem:[#allocation54_spill] sm:$0xff] %v5546_v41  ;;  %7185 = vst [vmem:[#allocation55_spill] sm:$0xff] %v5549_v45  ;;  %v5552_v46 = vld [vmem:[#allocation8] ss:$16 sps:$4 sm:$0xff]   ;;  %v5555_v47 = vld [vmem:[#allocation8 + $0x8] ss:$16 sps:$4 sm:$0xff]  }
 0x4d5   :  { %7186 = vst [vmem:[#allocation56_spill] sm:$0xff] %v5552_v46  ;;  %7187 = vst [vmem:[#allocation57_spill] sm:$0xff] %v5555_v47 }
 0x4d7   :  { %1820 = vmatpush1.bf16.msra.mxu0 %v5540_v9  ;;  %1861 = vmatpush1.bf16.msra.mxu1 %v5543_v48  ;;  %v1806_v9 = vpack.c.bf16 %v5342_v26, %v5342_v26  ;;  %v5560_v48 = vld [vmem:[#allocation10 + $0xe4] ss:$16 sps:$4 sm:$0xff]   ;;  %v5575_v26 = vld [vmem:[#allocation10 + $0xcc] ss:$16 sps:$4 sm:$0xff]  }
 0x4d8   :  { %1821 = vmatprep.subr.bf16.mxu0 %v5546_v41  ;;  %1862 = vmatprep.subr.bf16.mxu1 %v5549_v45  ;;  %7188 = vst [vmem:[#allocation58_spill] sm:$0xff] %v5560_v48  ;;  %v5563_v41 = vld [vmem:[#allocation10 + $0xec] ss:$16 sps:$4 sm:$0xff]   ;;  %v5566_v45 = vld [vmem:[#allocation10 + $0xe0] ss:$16 sps:$4 sm:$0xff]   ;;  %7193 = vst [vmem:[#allocation63_spill] sm:$0xff] %v5575_v26 }
 0x4d9   :  { %7189 = vst [vmem:[#allocation59_spill] sm:$0xff] %v5563_v41  ;;  %7190 = vst [vmem:[#allocation60_spill] sm:$0xff] %v5566_v45 }
 0x4db   :  { %1822 = vmatpush1.bf16.msra.mxu0 %v5552_v46  ;;  %1863 = vmatpush1.bf16.msra.mxu1 %v5555_v47  ;;  %v5569_v46 = vld [vmem:[#allocation10 + $0xe8] ss:$16 sps:$4 sm:$0xff]   ;;  %v5572_v47 = vld [vmem:[#allocation10 + $0xc4] ss:$16 sps:$4 sm:$0xff]  }
 0x4dc   :  { %1918 = vmatprep.subr.bf16.mxu0 %v5560_v48  ;;  %1959 = vmatprep.subr.bf16.mxu1 %v5563_v41  ;;  %7191 = vst [vmem:[#allocation61_spill] sm:$0xff] %v5569_v46  ;;  %7192 = vst [vmem:[#allocation62_spill] sm:$0xff] %v5572_v47  ;;  %v5595_v41 = vld [vmem:[#allocation10 + $0xa8] ss:$16 sps:$4 sm:$0xff]  }
 0x4dd   :  { %7199 = vst [vmem:[#allocation69_spill] sm:$0xff] %v5595_v41 }
 0x4de   :  { %1840 = vmatmul.mubr.bf16.vlgmr.msra.gmra.mxu0 %v1806_v9  ;;  %1881 = vmatmul.mubr.bf16.vlgmr.msra.gmra.mxu1 %v1806_v9  ;;  %v5580_v9 = vld [vmem:[#allocation10 + $0xc0] ss:$16 sps:$4 sm:$0xff]  }
 0x4df   :  { %1919 = vmatpush1.bf16.msra.mxu0 %v5566_v45  ;;  %1960 = vmatpush1.bf16.msra.mxu1 %v5569_v46  ;;  %7194 = vst [vmem:[#allocation64_spill] sm:$0xff] %v5580_v9  ;;  %v5583_v45 = vld [vmem:[#allocation10 + $0xc8] ss:$16 sps:$4 sm:$0xff]   ;;  %v5586_v46 = vld [vmem:[#allocation10 + $0xa4] ss:$16 sps:$4 sm:$0xff]  }
 0x4e0   :  { %1920 = vmatprep.subr.bf16.mxu0 %v5572_v47  ;;  %1961 = vmatprep.subr.bf16.mxu1 %v5575_v26  ;;  %7195 = vst [vmem:[#allocation65_spill] sm:$0xff] %v5583_v45  ;;  %7196 = vst [vmem:[#allocation66_spill] sm:$0xff] %v5586_v46  ;;  %v5589_v47 = vld [vmem:[#allocation10 + $0xac] ss:$16 sps:$4 sm:$0xff]   ;;  %v5592_v26 = vld [vmem:[#allocation10 + $0xa0] ss:$16 sps:$4 sm:$0xff]  }
 0x4e1   :  { %1950 = vmatprep.mubr.bf16.mxu0 %v7018_v31  ;;  %1991 = vmatprep.mubr.bf16.mxu1 %v7018_v31  ;;  %7197 = vst [vmem:[#allocation67_spill] sm:$0xff] %v5589_v47  ;;  %7198 = vst [vmem:[#allocation68_spill] sm:$0xff] %v5592_v26 }
 0x4e3   :  { %1921 = vmatpush1.bf16.msra.mxu0 %v5580_v9  ;;  %1962 = vmatpush1.bf16.msra.mxu1 %v5583_v45  ;;  %v7245_v17 = vld [vmem:[#allocation62_spill] sm:$0xff] }
 0x4e4   :  { %1922 = vmatprep.subr.bf16.mxu0 %v5586_v46  ;;  %1963 = vmatprep.subr.bf16.mxu1 %v5589_v47 }
 0x4e7   :  { %1923 = vmatpush1.bf16.msra.mxu0 %v5592_v26  ;;  %1964 = vmatpush1.bf16.msra.mxu1 %v5595_v41 }
 0x4e8   :  { %1924 = vmatprep.subr.bf16.mxu0 %v7125_v4  ;;  %1965 = vmatprep.subr.bf16.mxu1 %v7126_v5 }
 0x4eb   :  { %1925 = vmatpush1.bf16.msra.mxu0 %v7127_v6  ;;  %1966 = vmatpush1.bf16.msra.mxu1 %v7128_v7 }
 0x4ec   :  { %1926 = vmatprep.subr.bf16.mxu0 %v7129_v28  ;;  %1967 = vmatprep.subr.bf16.mxu1 %v7130_v18 }
 0x4ef   :  { %1927 = vmatpush1.bf16.msra.mxu0 %v7131_v19  ;;  %1968 = vmatpush1.bf16.msra.mxu1 %v7132_v33 }
 0x4f0   :  { %1928 = vmatprep.subr.bf16.mxu0 %v7133_v44  ;;  %1969 = vmatprep.subr.bf16.mxu1 %v7134_v24 }
 0x4f3   :  { %1929 = vmatpush1.bf16.msra.mxu0 %v7135_v22  ;;  %1970 = vmatpush1.bf16.msra.mxu1 %v7136_v53  ;;  %v7200_v22 = vld [vmem:[#allocation82_spill] sm:$0xff] }
 0x4f4   :  { %1930 = vmatprep.subr.bf16.mxu0 %v7137_v23  ;;  %1971 = vmatprep.subr.bf16.mxu1 %v7138_v29 }
 0x4f7   :  { %1931 = vmatpush1.bf16.msra.mxu0 %v7139_v21  ;;  %1972 = vmatpush1.bf16.msra.mxu1 %v7140_v16  ;;  %v7201_v16 = vld [vmem:[#allocation84_spill] sm:$0xff] }
 0x4f8   :  { %1932 = vmatprep.subr.bf16.mxu0 %v7141_v11  ;;  %1973 = vmatprep.subr.bf16.mxu1 %v7142_v12 }
 0x4fb   :  { %1933 = vmatpush1.bf16.msra.mxu0 %v7143_v13  ;;  %1974 = vmatpush1.bf16.msra.mxu1 %v7144_v14 }
 0x4fc   :  { %2034 = vmatprep.subr.bf16.mxu0 %v5311_v30  ;;  %2075 = vmatprep.subr.bf16.mxu1 %v5314_v8 }
 0x57e   :  { %v5620_v4 = vpop.f32.mrf.mxu0  ;;  %v5622_v5 = vpop.f32.mrf.mxu1 }
 0x580   :  { %v5624_v6 = vpop.f32.mrf.mxu0  ;;  %v5626_v7 = vpop.f32.mrf.mxu1 }
 0x582   :  { %v1762_v28 = vpop.f32.mrf.mxu0  ;;  %v1803_v18 = vpop.f32.mrf.mxu1 }
 0x583   :  { %v7202_v28 = vld [vmem:[#allocation85_spill] sm:$0xff] }
 0x584   :  { %v1763_v19 = vpop.f32.mrf.mxu0  ;;  %v1804_v33 = vpop.f32.mrf.mxu1 }
 0x585   :  { %v7203_v19 = vld [vmem:[#allocation83_spill] sm:$0xff] }
 0x59e   :  { %v1841_v44 = vpop.f32.mrf.mxu0  ;;  %v1882_v24 = vpop.f32.mrf.mxu1 }
 0x59f   :  { %v1889_v53 = vadd.f32 %v1841_v44, %v7200_v22  ;;  %v1891_v33 = vadd.f32 %v1882_v24, %v7203_v19  ;;  %v7209_v19 = vld [vmem:[#allocation27_spill] sm:$0xff] }
 0x5a0   :  { %v1843_v23 = vpop.f32.mrf.mxu0  ;;  %v1884_v29 = vpop.f32.mrf.mxu1 }
 0x5a1   :  { %v3767_v21 = vmul.f32 -1.442695, %v1889_v53  ;;  %v1890_v11 = vadd.f32 %v1843_v23, %v7201_v16  ;;  %v1892_v18 = vadd.f32 %v1884_v29, %v7202_v28  ;;  %v7207_v28 = vld [vmem:[#allocation25_spill] sm:$0xff] }
 0x5a2   :  { %v1845_v12 = vpop.f32.mrf.mxu0  ;;  %v1886_v13 = vpop.f32.mrf.mxu1 }
 0x5a3   :  { %4077 = vpow2.f32 %v3767_v21  ;;  %v3768_v14 = vmul.f32 -1.442695, %v1890_v11  ;;  %v3769_v41 = vmul.f32 -1.442695, %v1892_v18  ;;  %v7205_v13 = vld [vmem:[#allocation23_spill] sm:$0xff]  ;;  %v7208_v18 = vld [vmem:[#allocation26_spill] sm:$0xff] }
 0x5a4   :  { %v1846_v8 = vpop.f32.mrf.mxu0  ;;  %v1887_v30 = vpop.f32.mrf.mxu1 }
 0x5a5   :  { %4079 = vpow2.f32 %v3768_v14  ;;  %v7206_v14 = vld [vmem:[#allocation24_spill] sm:$0xff] }
 0x5a6   :  { %4081 = vtanh.f32 %v1891_v33  ;;  %v7210_v33 = vld [vmem:[#allocation28_spill] sm:$0xff] }
 0x5a7   :  { %4083 = vpow2.f32 %v3769_v41 }
 0x5b0   :  { %v4078_v26 = vpop.eup %4077 }
 0x5b1   :  { %v1896_v47 = vadd.f32 1.0, %v4078_v26 }
 0x5b2   :  { %v4080_v44 = vpop.eup %4079 }
 0x5b3   :  { %4085 = vrcp.f32 %v1896_v47  ;;  %v1902_v22 = vadd.f32 1.0, %v4080_v44  ;;  %v4082_v53 = vpop.eup %4081  ;;  %v7211_v44 = vld [vmem:[#allocation29_spill] sm:$0xff] }
 0x5b4   :  { %v4084_v23 = vpop.eup %4083 }
 0x5b5   :  { %4087 = vrcp.f32 %v1902_v22  ;;  %v1909_v30 = vadd.f32 1.0, %v4084_v23  ;;  %v7212_v22 = vld [vmem:[#allocation30_spill] sm:$0xff]  ;;  %v7214_v23 = vld [vmem:[#allocation32_spill] sm:$0xff] }
 0x5b7   :  { %4089 = vrcp.f32 %v1909_v30  ;;  %v7218_v30 = vld [vmem:[#allocation36_spill] sm:$0xff] }
 0x5c0   :  { %v4086_v21 = vpop.eup %4085 }
 0x5c1   :  { %v1913_v16 = vmul.f32 %v4086_v21, %v4082_v53  ;;  %v7213_v53 = vld [vmem:[#allocation31_spill] sm:$0xff]  ;;  %v7215_v21 = vld [vmem:[#allocation33_spill] sm:$0xff] }
 0x5c2   :  { %v4088_v8 = vpop.eup %4087 }
 0x5c3   :  { %v1912_v11 = vmul.f32 %v4088_v8, %v5335_v42  ;;  %v7217_v8 = vld [vmem:[#allocation35_spill] sm:$0xff] }
 0x5c4   :  { %v4090_v41 = vpop.eup %4089 }
 0x5c5   :  { %v1914_v24 = vadd.f32 %v1913_v16, %v1912_v11  ;;  %v7216_v16 = vld [vmem:[#allocation34_spill] sm:$0xff]  ;;  %v7219_v11 = vld [vmem:[#allocation37_spill] sm:$0xff] }
 0x5c7   :  { %4091 = vtanh.f32 %v1914_v24  ;;  %v5637_v26 = vsel %vm2028_vm3, %v1914_v24, %v5335_v42  ;;  %v7204_v42 = vld [vmem:[#allocation22_spill] sm:$0xff] }
 0x5c8   :  { %v7220_v24 = vld [vmem:[#allocation38_spill] sm:$0xff] }
 0x5d4   :  { %v4092_v47 = vpop.eup %4091 }
 0x5d5   :  { %v5639_v29 = vmul.f32 %v4092_v47, %v4090_v41  ;;  %v7221_v41 = vld [vmem:[#allocation39_spill] sm:$0xff]  ;;  %v7222_v47 = vld [vmem:[#allocation40_spill] sm:$0xff] }
 0x5d7   :  { %v1917_v12 = vpack.c.bf16 %v5639_v29, %v5639_v29 }
 0x5d9   :  { %1951 = vmatmul.mubr.bf16.vlgmr.msra.gmra.mxu0 %v1917_v12  ;;  %1992 = vmatmul.mubr.bf16.vlgmr.msra.gmra.mxu1 %v1917_v12  ;;  %v7223_v12 = vld [vmem:[#allocation41_spill] sm:$0xff] }
 0x5da   :  { %2035 = vmatpush1.bf16.msra.mxu0 %v5344_v50  ;;  %2076 = vmatpush1.bf16.msra.mxu1 %v5347_v51 }
 0x5db   :  { %2036 = vmatprep.subr.bf16.mxu0 %v5350_v52  ;;  %2077 = vmatprep.subr.bf16.mxu1 %v5353_v62 }
 0x5dc   :  { %2066 = vmatprep.mubr.bf16.mxu0 %v7018_v31  ;;  %2107 = vmatprep.mubr.bf16.mxu1 %v7018_v31 }
 0x5de   :  { %2037 = vmatpush1.bf16.msra.mxu0 %v5358_v54  ;;  %2078 = vmatpush1.bf16.msra.mxu1 %v5361_v55 }
 0x5df   :  { %2038 = vmatprep.subr.bf16.mxu0 %v5364_v56  ;;  %2079 = vmatprep.subr.bf16.mxu1 %v5367_v57 }
 0x5e2   :  { %2039 = vmatpush1.bf16.msra.mxu0 %v5370_v59  ;;  %2080 = vmatpush1.bf16.msra.mxu1 %v5373_v60 }
 0x5e3   :  { %2040 = vmatprep.subr.bf16.mxu0 %v5376_v61  ;;  %2081 = vmatprep.subr.bf16.mxu1 %v5379_v1 }
 0x5e6   :  { %2041 = vmatpush1.bf16.msra.mxu0 %v7204_v42  ;;  %2082 = vmatpush1.bf16.msra.mxu1 %v7205_v13 }
 0x5e7   :  { %2042 = vmatprep.subr.bf16.mxu0 %v7206_v14  ;;  %2083 = vmatprep.subr.bf16.mxu1 %v7207_v28 }
 0x5ea   :  { %2043 = vmatpush1.bf16.msra.mxu0 %v7208_v18  ;;  %2084 = vmatpush1.bf16.msra.mxu1 %v7209_v19 }
 0x5eb   :  { %2044 = vmatprep.subr.bf16.mxu0 %v7210_v33  ;;  %2085 = vmatprep.subr.bf16.mxu1 %v7211_v44 }
 0x5ee   :  { %2045 = vmatpush1.bf16.msra.mxu0 %v7212_v22  ;;  %2086 = vmatpush1.bf16.msra.mxu1 %v7213_v53 }
 0x5ef   :  { %2046 = vmatprep.subr.bf16.mxu0 %v7214_v23  ;;  %2087 = vmatprep.subr.bf16.mxu1 %v7215_v21 }
 0x5f2   :  { %2047 = vmatpush1.bf16.msra.mxu0 %v7216_v16  ;;  %2088 = vmatpush1.bf16.msra.mxu1 %v7217_v8 }
 0x5f3   :  { %2048 = vmatprep.subr.bf16.mxu0 %v7218_v30  ;;  %2089 = vmatprep.subr.bf16.mxu1 %v7219_v11 }
 0x5f6   :  { %2049 = vmatpush1.bf16.msra.mxu0 %v7220_v24  ;;  %2090 = vmatpush1.bf16.msra.mxu1 %v7221_v41 }
 0x5f7   :  { %2117 = vmatprep.subr.bf16.mxu0 %v7222_v47  ;;  %2158 = vmatprep.subr.bf16.mxu1 %v7223_v12 }
 0x699   :  { %v1952_v53 = vpop.f32.mrf.mxu0  ;;  %v1993_v23 = vpop.f32.mrf.mxu1 }
 0x69a   :  { %v1953_v21 = vadd.f32 %v1952_v53, %v5620_v4  ;;  %v1994_v53 = vadd.f32 %v1993_v23, %v5622_v5 }
 0x69b   :  { %v1954_v22 = vpop.f32.mrf.mxu0  ;;  %v1995_v16 = vpop.f32.mrf.mxu1 }
 0x69c   :  { %v2000_v8 = vadd.f32 %v1953_v21, %v5196_v38  ;;  %v1955_v30 = vadd.f32 %v1954_v22, %v5624_v6  ;;  %v1996_v12 = vadd.f32 %v1995_v16, %v5626_v7  ;;  %v2002_v6 = vadd.f32 %v1994_v53, %v5214_v63  ;;  %v7226_v53 = vld [vmem:[#allocation44_spill] sm:$0xff] }
 0x69d   :  { %v1956_v44 = vpop.f32.mrf.mxu0  ;;  %v1997_v11 = vpop.f32.mrf.mxu1 }
 0x69e   :  { %v3770_v33 = vmul.f32 -1.442695, %v2000_v8  ;;  %v2001_v24 = vadd.f32 %v1955_v30, %v5201_v43  ;;  %v2003_v4 = vadd.f32 %v1996_v12, %v5208_v58 }
 0x69f   :  { %v1957_v41 = vpop.f32.mrf.mxu0  ;;  %v1998_v19 = vpop.f32.mrf.mxu1 }
 0x6a0   :  { %4093 = vpow2.f32 %v3770_v33  ;;  %v3771_v47 = vmul.f32 -1.442695, %v2001_v24  ;;  %v3772_v18 = vmul.f32 -1.442695, %v2003_v4 }
 0x6a2   :  { %4095 = vpow2.f32 %v3771_v47 }
 0x6a3   :  { %4097 = vpow2.f32 %v3772_v18 }
 0x6ad   :  { %v4094_v21 = vpop.eup %4093 }
 0x6ae   :  { %v2007_v44 = vadd.f32 1.0, %v4094_v21  ;;  %v7227_v21 = vld [vmem:[#allocation45_spill] sm:$0xff] }
 0x6af   :  { %v4096_v22 = vpop.eup %4095 }
 0x6b0   :  { %4099 = vrcp.f32 %v2007_v44  ;;  %v2013_v8 = vadd.f32 1.0, %v4096_v22  ;;  %v4098_v19 = vpop.eup %4097  ;;  %v7229_v44 = vld [vmem:[#allocation47_spill] sm:$0xff]  ;;  %v7230_v22 = vld [vmem:[#allocation48_spill] sm:$0xff] }
 0x6b1   :  { %4101 = vtanh.f32 %v2002_v6  ;;  %v2020_v7 = vadd.f32 1.0, %v4098_v19  ;;  %v7228_v6 = vld [vmem:[#allocation46_spill] sm:$0xff] }
 0x6b2   :  { %4103 = vrcp.f32 %v2013_v8  ;;  %v7231_v8 = vld [vmem:[#allocation49_spill] sm:$0xff]  ;;  %v7232_v19 = vld [vmem:[#allocation50_spill] sm:$0xff] }
 0x6b3   :  { %4105 = vrcp.f32 %v2020_v7  ;;  %v7236_v7 = vld [vmem:[#allocation54_spill] sm:$0xff] }
 0x6bd   :  { %v4100_v33 = vpop.eup %4099 }
 0x6be   :  { %v4102_v30 = vpop.eup %4101 }
 0x6bf   :  { %v4104_v11 = vpop.eup %4103  ;;  %v2024_v16 = vmul.f32 %v4102_v30, %v4100_v33  ;;  %v7233_v33 = vld [vmem:[#allocation51_spill] sm:$0xff]  ;;  %v7234_v30 = vld [vmem:[#allocation52_spill] sm:$0xff] }
 0x6c0   :  { %v2023_v24 = vmul.f32 %v4104_v11, %v5455_v2  ;;  %v4106_v18 = vpop.eup %4105  ;;  %v7235_v11 = vld [vmem:[#allocation53_spill] sm:$0xff] }
 0x6c2   :  { %v2025_v5 = vadd.f32 %v2024_v16, %v2023_v24  ;;  %v7237_v16 = vld [vmem:[#allocation55_spill] sm:$0xff]  ;;  %v7238_v24 = vld [vmem:[#allocation21_spill] sm:$0xff] }
 0x6c4   :  { %4107 = vtanh.f32 %v2025_v5  ;;  %v5689_v23 = vsel %vm2028_vm3, %v2025_v5, %v5455_v2  ;;  %v7224_v2 = vld [vmem:[#allocation42_spill] sm:$0xff]  ;;  %v5732_v5 = vsel %vm2028_vm3, %v5639_v29, %v7238_v24  ;;  %v7246_v29 = vld [vmem:[#allocation63_spill] sm:$0xff] }
 0x6c5   :  { %7239 = vst [vmem:[#allocation70_spill] sm:$0xff] %v5732_v5  ;;  %v7247_v24 = vld [vmem:[#allocation67_spill] sm:$0xff] }
 0x6d1   :  { %v4108_v41 = vpop.eup %4107 }
 0x6d2   :  { %v2027_v47 = vmul.f32 %v4108_v41, %v4106_v18  ;;  %v7240_v18 = vld [vmem:[#allocation56_spill] sm:$0xff]  ;;  %v7241_v41 = vld [vmem:[#allocation57_spill] sm:$0xff] }
 0x6d4   :  { %v5694_v12 = vsel %vm2028_vm3, %v2027_v47, %v5462_v32  ;;  %v7225_v32 = vld [vmem:[#allocation43_spill] sm:$0xff]  ;;  %v2116_v47 = vpack.c.bf16 %v5732_v5, %v5732_v5  ;;  %v7272_v5 = vld [vmem:[#allocation86_spill] sm:$0xff] }
 0x6d5   :  { %v2033_v4 = vpack.c.bf16 %v5694_v12, %v5694_v12 }
 0x6d7   :  { %2067 = vmatmul.mubr.bf16.vlgmr.msra.gmra.mxu0 %v2033_v4  ;;  %2108 = vmatmul.mubr.bf16.vlgmr.msra.gmra.mxu1 %v2033_v4  ;;  %v7242_v4 = vld [vmem:[#allocation59_spill] sm:$0xff] }
 0x6d8   :  { %2118 = vmatpush1.bf16.msra.mxu0 %v5466_v49  ;;  %2159 = vmatpush1.bf16.msra.mxu1 %v5469_v20 }
 0x6d9   :  { %2119 = vmatprep.subr.bf16.mxu0 %v5472_v34  ;;  %2160 = vmatprep.subr.bf16.mxu1 %v5475_v35 }
 0x6da   :  { %2149 = vmatprep.mubr.bf16.mxu0 %v7018_v31  ;;  %2190 = vmatprep.mubr.bf16.mxu1 %v7018_v31 }
 0x6dc   :  { %2120 = vmatpush1.bf16.msra.mxu0 %v5480_v40  ;;  %2161 = vmatpush1.bf16.msra.mxu1 %v5483_v36 }
 0x6dd   :  { %2121 = vmatprep.subr.bf16.mxu0 %v5486_v3  ;;  %2162 = vmatprep.subr.bf16.mxu1 %v5489_v15 }
 0x6e0   :  { %2122 = vmatpush1.bf16.msra.mxu0 %v5492_v25  ;;  %2163 = vmatpush1.bf16.msra.mxu1 %v5495_v27 }
 0x6e1   :  { %2123 = vmatprep.subr.bf16.mxu0 %v5498_v0  ;;  %2164 = vmatprep.subr.bf16.mxu1 %v5501_v10 }
 0x6e4   :  { %2124 = vmatpush1.bf16.msra.mxu0 %v5504_v37  ;;  %2165 = vmatpush1.bf16.msra.mxu1 %v5507_v39 }
 0x6e5   :  { %2125 = vmatprep.subr.bf16.mxu0 %v7224_v2  ;;  %2166 = vmatprep.subr.bf16.mxu1 %v7225_v32 }
 0x6e8   :  { %2126 = vmatpush1.bf16.msra.mxu0 %v7226_v53  ;;  %2167 = vmatpush1.bf16.msra.mxu1 %v7227_v21 }
 0x6e9   :  { %2127 = vmatprep.subr.bf16.mxu0 %v7228_v6  ;;  %2168 = vmatprep.subr.bf16.mxu1 %v7229_v44 }
 0x6ec   :  { %2128 = vmatpush1.bf16.msra.mxu0 %v7230_v22  ;;  %2169 = vmatpush1.bf16.msra.mxu1 %v7231_v8 }
 0x6ed   :  { %2129 = vmatprep.subr.bf16.mxu0 %v7232_v19  ;;  %2170 = vmatprep.subr.bf16.mxu1 %v7233_v33 }
 0x6f0   :  { %2130 = vmatpush1.bf16.msra.mxu0 %v7234_v30  ;;  %2171 = vmatpush1.bf16.msra.mxu1 %v7235_v11 }
 0x6f1   :  { %2131 = vmatprep.subr.bf16.mxu0 %v7236_v7  ;;  %2172 = vmatprep.subr.bf16.mxu1 %v7237_v16  ;;  %v7243_v16 = vld [vmem:[#allocation60_spill] sm:$0xff]  ;;  %v7244_v7 = vld [vmem:[#allocation61_spill] sm:$0xff] }
 0x6f4   :  { %2132 = vmatpush1.bf16.msra.mxu0 %v7240_v18  ;;  %2173 = vmatpush1.bf16.msra.mxu1 %v7241_v41 }
 0x6f5   :  { %2228 = vmatprep.subr.bf16.mxu0 %v5560_v48  ;;  %2269 = vmatprep.subr.bf16.mxu1 %v7242_v4 }
 0x6f7   :  { %2150 = vmatmul.mubr.bf16.vlgmr.msra.gmra.mxu0 %v2116_v47  ;;  %2191 = vmatmul.mubr.bf16.vlgmr.msra.gmra.mxu1 %v2116_v47  ;;  %v7248_v47 = vld [vmem:[#allocation68_spill] sm:$0xff] }
 0x6f8   :  { %2229 = vmatpush1.bf16.msra.mxu0 %v7243_v16  ;;  %2270 = vmatpush1.bf16.msra.mxu1 %v7244_v7  ;;  %v7249_v16 = vld [vmem:[#allocation69_spill] sm:$0xff]  ;;  %v5752_v7 = vld [vmem:[#allocation10 + $0x84] ss:$16 sps:$4 sm:$0xff]  }
 0x6f9   :  { %2230 = vmatprep.subr.bf16.mxu0 %v7245_v17  ;;  %2271 = vmatprep.subr.bf16.mxu1 %v7246_v29  ;;  %7250 = vst [vmem:[#allocation71_spill] sm:$0xff] %v5752_v7  ;;  %v5755_v29 = vld [vmem:[#allocation10 + $0x8c] ss:$16 sps:$4 sm:$0xff]   ;;  %v5758_v17 = vld [vmem:[#allocation10 + $0x80] ss:$16 sps:$4 sm:$0xff]  }
 0x6fa   :  { %2260 = vmatprep.mubr.bf16.mxu0 %v7018_v31  ;;  %2301 = vmatprep.mubr.bf16.mxu1 %v7018_v31  ;;  %7251 = vst [vmem:[#allocation72_spill] sm:$0xff] %v5755_v29  ;;  %7252 = vst [vmem:[#allocation73_spill] sm:$0xff] %v5758_v17 }
 0x6fc   :  { %2231 = vmatpush1.bf16.msra.mxu0 %v5580_v9  ;;  %2272 = vmatpush1.bf16.msra.mxu1 %v5583_v45  ;;  %v5761_v45 = vld [vmem:[#allocation10 + $0x88] ss:$16 sps:$4 sm:$0xff]  }
 0x6fd   :  { %2232 = vmatprep.subr.bf16.mxu0 %v5586_v46  ;;  %2273 = vmatprep.subr.bf16.mxu1 %v7247_v24  ;;  %7253 = vst [vmem:[#allocation74_spill] sm:$0xff] %v5761_v45  ;;  %v5764_v24 = vld [vmem:[#allocation10 + $0x64] ss:$16 sps:$4 sm:$0xff]  }
 0x6fe   :  { %7254 = vst [vmem:[#allocation75_spill] sm:$0xff] %v5764_v24 }
 0x700   :  { %2233 = vmatpush1.bf16.msra.mxu0 %v7248_v47  ;;  %2274 = vmatpush1.bf16.msra.mxu1 %v7249_v16  ;;  %v5767_v16 = vld [vmem:[#allocation10 + $0x6c] ss:$16 sps:$4 sm:$0xff]   ;;  %v7271_v47 = vld [vmem:[#allocation20_spill] sm:$0xff] }
 0x701   :  { %2234 = vmatprep.subr.bf16.mxu0 %v5752_v7  ;;  %2275 = vmatprep.subr.bf16.mxu1 %v5755_v29  ;;  %7255 = vst [vmem:[#allocation76_spill] sm:$0xff] %v5767_v16  ;;  %v5770_v7 = vld [vmem:[#allocation10 + $0x60] ss:$16 sps:$4 sm:$0xff]   ;;  %v5773_v29 = vld [vmem:[#allocation10 + $0x68] ss:$16 sps:$4 sm:$0xff]  }
 0x702   :  { %7256 = vst [vmem:[#allocation77_spill] sm:$0xff] %v5770_v7  ;;  %7257 = vst [vmem:[#allocation78_spill] sm:$0xff] %v5773_v29 }
 0x704   :  { %2235 = vmatpush1.bf16.msra.mxu0 %v5758_v17  ;;  %2276 = vmatpush1.bf16.msra.mxu1 %v5761_v45  ;;  %v5776_v17 = vld [vmem:[#allocation10 + $0x44] ss:$16 sps:$4 sm:$0xff]   ;;  %v5779_v45 = vld [vmem:[#allocation10 + $0x4c] ss:$16 sps:$4 sm:$0xff]  }
 0x705   :  { %2236 = vmatprep.subr.bf16.mxu0 %v5764_v24  ;;  %2277 = vmatprep.subr.bf16.mxu1 %v5767_v16  ;;  %7258 = vst [vmem:[#allocation80_spill] sm:$0xff] %v5776_v17  ;;  %7259 = vst [vmem:[#allocation81_spill] sm:$0xff] %v5779_v45  ;;  %v5782_v24 = vld [vmem:[#allocation10 + $0x40] ss:$16 sps:$4 sm:$0xff]   ;;  %v5785_v16 = vld [vmem:[#allocation10 + $0x48] ss:$16 sps:$4 sm:$0xff]  }
 0x706   :  { %7260 = vst [vmem:[#allocation79_spill] sm:$0xff] %v5782_v24  ;;  %7261 = vst [vmem:[#allocation82_spill] sm:$0xff] %v5785_v16 }
 0x708   :  { %2237 = vmatpush1.bf16.msra.mxu0 %v5770_v7  ;;  %2278 = vmatpush1.bf16.msra.mxu1 %v5773_v29  ;;  %v5788_v7 = vld [vmem:[#allocation10 + $0x24] ss:$16 sps:$4 sm:$0xff]   ;;  %v5791_v29 = vld [vmem:[#allocation10 + $0x2c] ss:$16 sps:$4 sm:$0xff]  }
 0x709   :  { %2238 = vmatprep.subr.bf16.mxu0 %v5776_v17  ;;  %2279 = vmatprep.subr.bf16.mxu1 %v5779_v45  ;;  %7262 = vst [vmem:[#allocation84_spill] sm:$0xff] %v5788_v7  ;;  %7263 = vst [vmem:[#allocation85_spill] sm:$0xff] %v5791_v29  ;;  %v5794_v17 = vld [vmem:[#allocation10 + $0x20] ss:$16 sps:$4 sm:$0xff]   ;;  %v5797_v45 = vld [vmem:[#allocation10 + $0x28] ss:$16 sps:$4 sm:$0xff]  }
 0x70a   :  { %7264 = vst [vmem:[#allocation83_spill] sm:$0xff] %v5794_v17  ;;  %7265 = vst [vmem:[#allocation22_spill] sm:$0xff] %v5797_v45 }
 0x70c   :  { %2239 = vmatpush1.bf16.msra.mxu0 %v5782_v24  ;;  %2280 = vmatpush1.bf16.msra.mxu1 %v5785_v16  ;;  %v5800_v24 = vld [vmem:[#allocation10 + $0x4] ss:$16 sps:$4 sm:$0xff]   ;;  %v5803_v16 = vld [vmem:[#allocation10 + $0xc] ss:$16 sps:$4 sm:$0xff]  }
 0x70d   :  { %2240 = vmatprep.subr.bf16.mxu0 %v5788_v7  ;;  %2281 = vmatprep.subr.bf16.mxu1 %v5791_v29  ;;  %7266 = vst [vmem:[#allocation23_spill] sm:$0xff] %v5800_v24  ;;  %7267 = vst [vmem:[#allocation24_spill] sm:$0xff] %v5803_v16  ;;  %v5806_v7 = vld [vmem:[#allocation10] ss:$16 sps:$4 sm:$0xff]   ;;  %v5809_v29 = vld [vmem:[#allocation10 + $0x8] ss:$16 sps:$4 sm:$0xff]  }
 0x70e   :  { %7268 = vst [vmem:[#allocation25_spill] sm:$0xff] %v5806_v7  ;;  %7269 = vst [vmem:[#allocation42_spill] sm:$0xff] %v5809_v29 }
 0x710   :  { %2241 = vmatpush1.bf16.msra.mxu0 %v5794_v17  ;;  %2282 = vmatpush1.bf16.msra.mxu1 %v5797_v45  ;;  %v7270_v17 = vld [vmem:[#allocation19_spill] sm:$0xff] }
 0x711   :  { %2242 = vmatprep.subr.bf16.mxu0 %v5800_v24  ;;  %2283 = vmatprep.subr.bf16.mxu1 %v5803_v16 }
 0x714   :  { %2243 = vmatpush1.bf16.msra.mxu0 %v5806_v7  ;;  %2284 = vmatpush1.bf16.msra.mxu1 %v5809_v29 }
 0x715   :  { %2344 = vmatprep.subr.bf16.mxu0 %v7270_v17  ;;  %2385 = vmatprep.subr.bf16.mxu1 %v7271_v47  ;;  %v7273_v47 = vld [vmem:[#allocation88_spill] sm:$0xff] }
 0x797   :  { %v5814_v45 = vpop.f32.mrf.mxu0  ;;  %v5816_v46 = vpop.f32.mrf.mxu1 }
 0x799   :  { %v5818_v24 = vpop.f32.mrf.mxu0  ;;  %v5820_v9 = vpop.f32.mrf.mxu1 }
 0x79b   :  { %v2072_v16 = vpop.f32.mrf.mxu0  ;;  %v2113_v4 = vpop.f32.mrf.mxu1 }
 0x79c   :  { %v7274_v16 = vld [vmem:[#allocation89_spill] sm:$0xff] }
 0x79d   :  { %v2073_v48 = vpop.f32.mrf.mxu0  ;;  %v2114_v7 = vpop.f32.mrf.mxu1 }
 0x79e   :  { %v7275_v48 = vld [vmem:[#allocation87_spill] sm:$0xff] }
 0x7b7   :  { %v2151_v41 = vpop.f32.mrf.mxu0  ;;  %v2192_v18 = vpop.f32.mrf.mxu1 }
 0x7b8   :  { %v2199_v29 = vadd.f32 %v2151_v41, %v7272_v5  ;;  %v2201_v7 = vadd.f32 %v2192_v18, %v7275_v48 }
 0x7b9   :  { %v2153_v11 = vpop.f32.mrf.mxu0  ;;  %v2194_v17 = vpop.f32.mrf.mxu1 }
 0x7ba   :  { %v3773_v30 = vmul.f32 -1.442695, %v2199_v29  ;;  %v2200_v33 = vadd.f32 %v2153_v11, %v7273_v47  ;;  %v2202_v4 = vadd.f32 %v2194_v17, %v7274_v16  ;;  %v5827_v11 = vld [vmem:[#allocation5] sm:$0xff] }
 0x7bb   :  { %v2155_v19 = vpop.f32.mrf.mxu0  ;;  %v2196_v8 = vpop.f32.mrf.mxu1  ;;  %vm2338_vm4 = vcmp.gt.s32.totalorder %v5827_v11, 3  ;;  %vm2648_vm5 = vcmp.gt.s32.totalorder %v5827_v11, 4  ;;  %vm2958_vm6 = vcmp.gt.s32.totalorder %v5827_v11, 5 }
 0x7bc   :  { %4109 = vpow2.f32 %v3773_v30  ;;  %v3774_v22 = vmul.f32 -1.442695, %v2200_v33  ;;  %v3775_v21 = vmul.f32 -1.442695, %v2202_v4 }
 0x7bd   :  { %v2156_v44 = vpop.f32.mrf.mxu0  ;;  %v2197_v6 = vpop.f32.mrf.mxu1 }
 0x7be   :  { %4111 = vpow2.f32 %v3774_v22 }
 0x7bf   :  { %4113 = vtanh.f32 %v2201_v7 }
 0x7c0   :  { %4115 = vpow2.f32 %v3775_v21 }
 0x7c9   :  { %v4110_v53 = vpop.eup %4109 }
 0x7ca   :  { %v2206_v32 = vadd.f32 1.0, %v4110_v53 }
 0x7cb   :  { %v4112_v5 = vpop.eup %4111 }
 0x7cc   :  { %4117 = vrcp.f32 %v2206_v32  ;;  %v2212_v41 = vadd.f32 1.0, %v4112_v5  ;;  %v4114_v19 = vpop.eup %4113 }
 0x7cd   :  { %v4116_v8 = vpop.eup %4115 }
 0x7ce   :  { %4119 = vrcp.f32 %v2212_v41  ;;  %v2219_v6 = vadd.f32 1.0, %v4116_v8 }
 0x7d0   :  { %4121 = vrcp.f32 %v2219_v6 }
 0x7d9   :  { %v4118_v30 = vpop.eup %4117 }
 0x7da   :  { %v2223_v33 = vmul.f32 %v4118_v30, %v4114_v19 }
 0x7db   :  { %v4120_v44 = vpop.eup %4119 }
 0x7dc   :  { %v2222_v22 = vmul.f32 %v4120_v44, %v5637_v26 }
 0x7dd   :  { %v4122_v53 = vpop.eup %4121 }
 0x7de   :  { %v2224_v18 = vadd.f32 %v2223_v33, %v2222_v22 }
 0x7e0   :  { %4123 = vtanh.f32 %v2224_v18  ;;  %v5833_v32 = vsel %vm2338_vm4, %v2224_v18, %v5637_v26  ;;  %v7288_v26 = vld [vmem:[#allocation38_spill] sm:$0xff] }
 0x7ed   :  { %v4124_v21 = vpop.eup %4123 }
 0x7ee   :  { %v5835_v29 = vmul.f32 %v4124_v21, %v4122_v53 }
 0x7f0   :  { %v2227_v17 = vpack.c.bf16 %v5835_v29, %v5835_v29 }
 0x7f2   :  { %2261 = vmatmul.mubr.bf16.vlgmr.msra.gmra.mxu0 %v2227_v17  ;;  %2302 = vmatmul.mubr.bf16.vlgmr.msra.gmra.mxu1 %v2227_v17 }
 0x7f3   :  { %2345 = vmatpush1.bf16.msra.mxu0 %v5344_v50  ;;  %2386 = vmatpush1.bf16.msra.mxu1 %v5347_v51  ;;  %v7276_v50 = vld [vmem:[#allocation26_spill] sm:$0xff]  ;;  %v7277_v51 = vld [vmem:[#allocation27_spill] sm:$0xff] }
 0x7f4   :  { %2346 = vmatprep.subr.bf16.mxu0 %v5350_v52  ;;  %2387 = vmatprep.subr.bf16.mxu1 %v5353_v62  ;;  %v7278_v52 = vld [vmem:[#allocation28_spill] sm:$0xff]  ;;  %v7279_v62 = vld [vmem:[#allocation29_spill] sm:$0xff] }
 0x7f5   :  { %2376 = vmatprep.mubr.bf16.mxu0 %v7018_v31  ;;  %2417 = vmatprep.mubr.bf16.mxu1 %v7018_v31 }
 0x7f7   :  { %2347 = vmatpush1.bf16.msra.mxu0 %v5358_v54  ;;  %2388 = vmatpush1.bf16.msra.mxu1 %v5361_v55  ;;  %v7280_v54 = vld [vmem:[#allocation30_spill] sm:$0xff]  ;;  %v7281_v55 = vld [vmem:[#allocation31_spill] sm:$0xff] }
 0x7f8   :  { %2348 = vmatprep.subr.bf16.mxu0 %v5364_v56  ;;  %2389 = vmatprep.subr.bf16.mxu1 %v5367_v57  ;;  %v7282_v56 = vld [vmem:[#allocation32_spill] sm:$0xff]  ;;  %v7283_v57 = vld [vmem:[#allocation33_spill] sm:$0xff] }
 0x7fb   :  { %2349 = vmatpush1.bf16.msra.mxu0 %v5370_v59  ;;  %2390 = vmatpush1.bf16.msra.mxu1 %v5373_v60  ;;  %v7284_v59 = vld [vmem:[#allocation34_spill] sm:$0xff]  ;;  %v7285_v60 = vld [vmem:[#allocation35_spill] sm:$0xff] }
 0x7fc   :  { %2350 = vmatprep.subr.bf16.mxu0 %v5376_v61  ;;  %2391 = vmatprep.subr.bf16.mxu1 %v5379_v1  ;;  %v7286_v61 = vld [vmem:[#allocation36_spill] sm:$0xff]  ;;  %v7287_v1 = vld [vmem:[#allocation37_spill] sm:$0xff] }
 0x7ff   :  { %2351 = vmatpush1.bf16.msra.mxu0 %v7204_v42  ;;  %2392 = vmatpush1.bf16.msra.mxu1 %v7205_v13  ;;  %v7289_v42 = vld [vmem:[#allocation39_spill] sm:$0xff]  ;;  %v7290_v13 = vld [vmem:[#allocation40_spill] sm:$0xff] }
 0x800   :  { %2352 = vmatprep.subr.bf16.mxu0 %v7206_v14  ;;  %2393 = vmatprep.subr.bf16.mxu1 %v7207_v28  ;;  %v7291_v14 = vld [vmem:[#allocation41_spill] sm:$0xff] }
 0x803   :  { %2353 = vmatpush1.bf16.msra.mxu0 %v7276_v50  ;;  %2394 = vmatpush1.bf16.msra.mxu1 %v7277_v51 }
 0x804   :  { %2354 = vmatprep.subr.bf16.mxu0 %v7278_v52  ;;  %2395 = vmatprep.subr.bf16.mxu1 %v7279_v62 }
 0x807   :  { %2355 = vmatpush1.bf16.msra.mxu0 %v7280_v54  ;;  %2396 = vmatpush1.bf16.msra.mxu1 %v7281_v55 }
 0x808   :  { %2356 = vmatprep.subr.bf16.mxu0 %v7282_v56  ;;  %2397 = vmatprep.subr.bf16.mxu1 %v7283_v57 }
 0x80b   :  { %2357 = vmatpush1.bf16.msra.mxu0 %v7284_v59  ;;  %2398 = vmatpush1.bf16.msra.mxu1 %v7285_v60 }
 0x80c   :  { %2358 = vmatprep.subr.bf16.mxu0 %v7286_v61  ;;  %2399 = vmatprep.subr.bf16.mxu1 %v7287_v1 }
 0x80f   :  { %2359 = vmatpush1.bf16.msra.mxu0 %v7288_v26  ;;  %2400 = vmatpush1.bf16.msra.mxu1 %v7289_v42 }
 0x810   :  { %2427 = vmatprep.subr.bf16.mxu0 %v7290_v13  ;;  %2468 = vmatprep.subr.bf16.mxu1 %v7291_v14  ;;  %v7308_v14 = vld [vmem:[#allocation58_spill] sm:$0xff] }
 0x8b2   :  { %v2262_v28 = vpop.f32.mrf.mxu0  ;;  %v2303_v47 = vpop.f32.mrf.mxu1 }
 0x8b3   :  { %v2263_v16 = vadd.f32 %v2262_v28, %v5814_v45  ;;  %v2304_v18 = vadd.f32 %v2303_v47, %v5816_v46  ;;  %v7309_v28 = vld [vmem:[#allocation59_spill] sm:$0xff]  ;;  %v7310_v47 = vld [vmem:[#allocation60_spill] sm:$0xff] }
 0x8b4   :  { %v2264_v4 = vpop.f32.mrf.mxu0  ;;  %v2305_v48 = vpop.f32.mrf.mxu1 }
 0x8b5   :  { %v2310_v7 = vadd.f32 %v2263_v16, %v5196_v38  ;;  %v2265_v5 = vadd.f32 %v2264_v4, %v5818_v24  ;;  %v2306_v22 = vadd.f32 %v2305_v48, %v5820_v9  ;;  %v2312_v24 = vadd.f32 %v2304_v18, %v5214_v63  ;;  %v7311_v16 = vld [vmem:[#allocation61_spill] sm:$0xff]  ;;  %v7312_v4 = vld [vmem:[#allocation62_spill] sm:$0xff]  ;;  %v7314_v48 = vld [vmem:[#allocation64_spill] sm:$0xff] }
 0x8b6   :  { %v2266_v41 = vpop.f32.mrf.mxu0  ;;  %v2307_v19 = vpop.f32.mrf.mxu1  ;;  %v7326_v18 = vld [vmem:[#allocation77_spill] sm:$0xff] }
 0x8b7   :  { %v3776_v8 = vmul.f32 -1.442695, %v2310_v7  ;;  %v2311_v30 = vadd.f32 %v2265_v5, %v5201_v43  ;;  %v2313_v45 = vadd.f32 %v2306_v22, %v5208_v58  ;;  %v7315_v7 = vld [vmem:[#allocation65_spill] sm:$0xff]  ;;  %v7316_v5 = vld [vmem:[#allocation66_spill] sm:$0xff]  ;;  %v7317_v41 = vld [vmem:[#allocation67_spill] sm:$0xff] }
 0x8b8   :  { %v2267_v33 = vpop.f32.mrf.mxu0  ;;  %v2308_v44 = vpop.f32.mrf.mxu1  ;;  %v7318_v19 = vld [vmem:[#allocation68_spill] sm:$0xff]  ;;  %v7324_v22 = vld [vmem:[#allocation75_spill] sm:$0xff] }
 0x8b9   :  { %4125 = vpow2.f32 %v3776_v8  ;;  %v3777_v6 = vmul.f32 -1.442695, %v2311_v30  ;;  %v3778_v53 = vmul.f32 -1.442695, %v2313_v45  ;;  %v7319_v8 = vld [vmem:[#allocation69_spill] sm:$0xff]  ;;  %v7320_v30 = vld [vmem:[#allocation71_spill] sm:$0xff] }
 0x8ba   :  { %v7321_v33 = vld [vmem:[#allocation72_spill] sm:$0xff]  ;;  %v7322_v44 = vld [vmem:[#allocation73_spill] sm:$0xff] }
 0x8bb   :  { %4127 = vpow2.f32 %v3777_v6  ;;  %v7323_v6 = vld [vmem:[#allocation74_spill] sm:$0xff]  ;;  %v7325_v45 = vld [vmem:[#allocation76_spill] sm:$0xff] }
 0x8bc   :  { %4129 = vpow2.f32 %v3778_v53  ;;  %v7327_v53 = vld [vmem:[#allocation78_spill] sm:$0xff] }
 0x8c6   :  { %v4126_v21 = vpop.eup %4125 }
 0x8c7   :  { %v2317_v17 = vadd.f32 1.0, %v4126_v21  ;;  %v7328_v21 = vld [vmem:[#allocation80_spill] sm:$0xff] }
 0x8c8   :  { %v4128_v50 = vpop.eup %4127 }
 0x8c9   :  { %4131 = vrcp.f32 %v2317_v17  ;;  %v2323_v51 = vadd.f32 1.0, %v4128_v50  ;;  %v4130_v52 = vpop.eup %4129  ;;  %v7330_v17 = vld [vmem:[#allocation79_spill] sm:$0xff]  ;;  %v7331_v50 = vld [vmem:[#allocation82_spill] sm:$0xff] }
 0x8ca   :  { %4133 = vtanh.f32 %v2312_v24  ;;  %v2330_v9 = vadd.f32 1.0, %v4130_v52  ;;  %v7329_v24 = vld [vmem:[#allocation81_spill] sm:$0xff] }
 0x8cb   :  { %4135 = vrcp.f32 %v2323_v51  ;;  %v7332_v51 = vld [vmem:[#allocation84_spill] sm:$0xff]  ;;  %v7333_v52 = vld [vmem:[#allocation85_spill] sm:$0xff] }
 0x8cc   :  { %4137 = vrcp.f32 %v2330_v9  ;;  %v7337_v9 = vld [vmem:[#allocation24_spill] sm:$0xff] }
 0x8d6   :  { %v4132_v62 = vpop.eup %4131 }
 0x8d7   :  { %v4134_v54 = vpop.eup %4133 }
 0x8d8   :  { %v4136_v55 = vpop.eup %4135  ;;  %v2334_v56 = vmul.f32 %v4134_v54, %v4132_v62  ;;  %v7334_v62 = vld [vmem:[#allocation83_spill] sm:$0xff]  ;;  %v7335_v54 = vld [vmem:[#allocation22_spill] sm:$0xff] }
 0x8d9   :  { %v2333_v57 = vmul.f32 %v4136_v55, %v5689_v23  ;;  %v4138_v60 = vpop.eup %4137  ;;  %v7336_v55 = vld [vmem:[#allocation23_spill] sm:$0xff] }
 0x8db   :  { %v2335_v46 = vadd.f32 %v2334_v56, %v2333_v57  ;;  %v7338_v56 = vld [vmem:[#allocation25_spill] sm:$0xff]  ;;  %v7339_v57 = vld [vmem:[#allocation42_spill] sm:$0xff] }
 0x8dd   :  { %4139 = vtanh.f32 %v2335_v46  ;;  %v5885_v59 = vsel %vm2338_vm4, %v2335_v46, %v5689_v23  ;;  %v5968_v46 = vld [vmem:[#allocation11 + $0xe4] ss:$16 sps:$4 sm:$0xff]  }
 0x8de   :  { %7340 = vst [vmem:[#allocation21_spill] sm:$0xff] %v5968_v46 }
 0x8ea   :  { %v4140_v61 = vpop.eup %4139 }
 0x8eb   :  { %v2337_v1 = vmul.f32 %v4140_v61, %v4138_v60  ;;  %v5971_v60 = vld [vmem:[#allocation11 + $0xec] ss:$16 sps:$4 sm:$0xff]  }
 0x8ec   :  { %7341 = vst [vmem:[#allocation19_spill] sm:$0xff] %v5971_v60 }
 0x8ed   :  { %v5890_v26 = vsel %vm2338_vm4, %v2337_v1, %v5694_v12  ;;  %v7306_v12 = vld [vmem:[#allocation56_spill] sm:$0xff] }
 0x8ee   :  { %v2343_v42 = vpack.c.bf16 %v5890_v26, %v5890_v26 }
 0x8f0   :  { %2377 = vmatmul.mubr.bf16.vlgmr.msra.gmra.mxu0 %v2343_v42  ;;  %2418 = vmatmul.mubr.bf16.vlgmr.msra.gmra.mxu1 %v2343_v42 }
 0x8f1   :  { %2428 = vmatpush1.bf16.msra.mxu0 %v5466_v49  ;;  %2469 = vmatpush1.bf16.msra.mxu1 %v5469_v20  ;;  %v7292_v49 = vld [vmem:[#allocation43_spill] sm:$0xff]  ;;  %v7293_v20 = vld [vmem:[#allocation44_spill] sm:$0xff] }
 0x8f2   :  { %2429 = vmatprep.subr.bf16.mxu0 %v5472_v34  ;;  %2470 = vmatprep.subr.bf16.mxu1 %v5475_v35  ;;  %v7294_v34 = vld [vmem:[#allocation45_spill] sm:$0xff]  ;;  %v7295_v35 = vld [vmem:[#allocation46_spill] sm:$0xff] }
 0x8f3   :  { %2459 = vmatprep.mubr.bf16.mxu0 %v7018_v31  ;;  %2500 = vmatprep.mubr.bf16.mxu1 %v7018_v31 }
 0x8f5   :  { %2430 = vmatpush1.bf16.msra.mxu0 %v5480_v40  ;;  %2471 = vmatpush1.bf16.msra.mxu1 %v5483_v36  ;;  %v7296_v40 = vld [vmem:[#allocation47_spill] sm:$0xff]  ;;  %v7297_v36 = vld [vmem:[#allocation48_spill] sm:$0xff] }
 0x8f6   :  { %2431 = vmatprep.subr.bf16.mxu0 %v5486_v3  ;;  %2472 = vmatprep.subr.bf16.mxu1 %v5489_v15  ;;  %v7298_v3 = vld [vmem:[#allocation49_spill] sm:$0xff]  ;;  %v7299_v15 = vld [vmem:[#allocation50_spill] sm:$0xff] }
 0x8f9   :  { %2432 = vmatpush1.bf16.msra.mxu0 %v5492_v25  ;;  %2473 = vmatpush1.bf16.msra.mxu1 %v5495_v27  ;;  %v7300_v25 = vld [vmem:[#allocation51_spill] sm:$0xff]  ;;  %v7301_v27 = vld [vmem:[#allocation52_spill] sm:$0xff] }
 0x8fa   :  { %2433 = vmatprep.subr.bf16.mxu0 %v5498_v0  ;;  %2474 = vmatprep.subr.bf16.mxu1 %v5501_v10  ;;  %v7302_v0 = vld [vmem:[#allocation53_spill] sm:$0xff]  ;;  %v7303_v10 = vld [vmem:[#allocation54_spill] sm:$0xff] }
 0x8fd   :  { %2434 = vmatpush1.bf16.msra.mxu0 %v5504_v37  ;;  %2475 = vmatpush1.bf16.msra.mxu1 %v5507_v39  ;;  %v7304_v37 = vld [vmem:[#allocation55_spill] sm:$0xff]  ;;  %v7305_v39 = vld [vmem:[#allocation70_spill] sm:$0xff] }
 0x8fe   :  { %2435 = vmatprep.subr.bf16.mxu0 %v7224_v2  ;;  %2476 = vmatprep.subr.bf16.mxu1 %v7292_v49  ;;  %v5928_v23 = vsel %vm2338_vm4, %v5835_v29, %v7305_v39  ;;  %v7307_v2 = vld [vmem:[#allocation57_spill] sm:$0xff]  ;;  %v7313_v29 = vld [vmem:[#allocation63_spill] sm:$0xff] }
 0x8ff   :  { %v2426_v13 = vpack.c.bf16 %v5928_v23, %v5928_v23 }
 0x901   :  { %2436 = vmatpush1.bf16.msra.mxu0 %v7293_v20  ;;  %2477 = vmatpush1.bf16.msra.mxu1 %v7294_v34 }
 0x902   :  { %2437 = vmatprep.subr.bf16.mxu0 %v7295_v35  ;;  %2478 = vmatprep.subr.bf16.mxu1 %v7296_v40 }
 0x905   :  { %2438 = vmatpush1.bf16.msra.mxu0 %v7297_v36  ;;  %2479 = vmatpush1.bf16.msra.mxu1 %v7298_v3 }
 0x906   :  { %2439 = vmatprep.subr.bf16.mxu0 %v7299_v15  ;;  %2480 = vmatprep.subr.bf16.mxu1 %v7300_v25  ;;  %v7342_v15 = vld [vmem:[#allocation90_spill] sm:$0xff] }
 0x909   :  { %2440 = vmatpush1.bf16.msra.mxu0 %v7301_v27  ;;  %2481 = vmatpush1.bf16.msra.mxu1 %v7302_v0 }
 0x90a   :  { %2441 = vmatprep.subr.bf16.mxu0 %v7303_v10  ;;  %2482 = vmatprep.subr.bf16.mxu1 %v7304_v37  ;;  %v7343_v37 = vld [vmem:[#allocation92_spill] sm:$0xff] }
 0x90d   :  { %2442 = vmatpush1.bf16.msra.mxu0 %v7306_v12  ;;  %2483 = vmatpush1.bf16.msra.mxu1 %v7307_v2 }
 0x90e   :  { %2538 = vmatprep.subr.bf16.mxu0 %v7308_v14  ;;  %2579 = vmatprep.subr.bf16.mxu1 %v7309_v28 }
 0x910   :  { %2460 = vmatmul.mubr.bf16.vlgmr.msra.gmra.mxu0 %v2426_v13  ;;  %2501 = vmatmul.mubr.bf16.vlgmr.msra.gmra.mxu1 %v2426_v13 }
 0x911   :  { %2539 = vmatpush1.bf16.msra.mxu0 %v7310_v47  ;;  %2580 = vmatpush1.bf16.msra.mxu1 %v7311_v16  ;;  %v7344_v47 = vld [vmem:[#allocation93_spill] sm:$0xff] }
 0x912   :  { %2540 = vmatprep.subr.bf16.mxu0 %v7312_v4  ;;  %2581 = vmatprep.subr.bf16.mxu1 %v7313_v29  ;;  %v7345_v4 = vld [vmem:[#allocation91_spill] sm:$0xff] }
 0x913   :  { %2570 = vmatprep.mubr.bf16.mxu0 %v7018_v31  ;;  %2611 = vmatprep.mubr.bf16.mxu1 %v7018_v31 }
 0x915   :  { %2541 = vmatpush1.bf16.msra.mxu0 %v7314_v48  ;;  %2582 = vmatpush1.bf16.msra.mxu1 %v7315_v7 }
 0x916   :  { %2542 = vmatprep.subr.bf16.mxu0 %v7316_v5  ;;  %2583 = vmatprep.subr.bf16.mxu1 %v7317_v41 }
 0x919   :  { %2543 = vmatpush1.bf16.msra.mxu0 %v7318_v19  ;;  %2584 = vmatpush1.bf16.msra.mxu1 %v7319_v8 }
 0x91a   :  { %2544 = vmatprep.subr.bf16.mxu0 %v7320_v30  ;;  %2585 = vmatprep.subr.bf16.mxu1 %v7321_v33 }
 0x91d   :  { %2545 = vmatpush1.bf16.msra.mxu0 %v7322_v44  ;;  %2586 = vmatpush1.bf16.msra.mxu1 %v7323_v6 }
 0x91e   :  { %2546 = vmatprep.subr.bf16.mxu0 %v7324_v22  ;;  %2587 = vmatprep.subr.bf16.mxu1 %v7325_v45 }
 0x921   :  { %2547 = vmatpush1.bf16.msra.mxu0 %v7326_v18  ;;  %2588 = vmatpush1.bf16.msra.mxu1 %v7327_v53 }
 0x922   :  { %2548 = vmatprep.subr.bf16.mxu0 %v7328_v21  ;;  %2589 = vmatprep.subr.bf16.mxu1 %v7329_v24 }
 0x925   :  { %2549 = vmatpush1.bf16.msra.mxu0 %v7330_v17  ;;  %2590 = vmatpush1.bf16.msra.mxu1 %v7331_v50 }
 0x926   :  { %2550 = vmatprep.subr.bf16.mxu0 %v7332_v51  ;;  %2591 = vmatprep.subr.bf16.mxu1 %v7333_v52 }
 0x929   :  { %2551 = vmatpush1.bf16.msra.mxu0 %v7334_v62  ;;  %2592 = vmatpush1.bf16.msra.mxu1 %v7335_v54 }
 0x92a   :  { %2552 = vmatprep.subr.bf16.mxu0 %v7336_v55  ;;  %2593 = vmatprep.subr.bf16.mxu1 %v7337_v9 }
 0x92d   :  { %2553 = vmatpush1.bf16.msra.mxu0 %v7338_v56  ;;  %2594 = vmatpush1.bf16.msra.mxu1 %v7339_v57 }
 0x92e   :  { %2654 = vmatprep.subr.bf16.mxu0 %v5968_v46  ;;  %2695 = vmatprep.subr.bf16.mxu1 %v5971_v60 }
 0x9b0   :  { %v5974_v61 = vpop.f32.mrf.mxu0  ;;  %v5976_v1 = vpop.f32.mrf.mxu1 }
 0x9b2   :  { %v5978_v42 = vpop.f32.mrf.mxu0  ;;  %v5980_v49 = vpop.f32.mrf.mxu1 }
 0x9b4   :  { %v2382_v20 = vpop.f32.mrf.mxu0  ;;  %v2423_v34 = vpop.f32.mrf.mxu1 }
 0x9b6   :  { %v2383_v35 = vpop.f32.mrf.mxu0  ;;  %v2424_v40 = vpop.f32.mrf.mxu1 }
 0x9d0   :  { %v2461_v36 = vpop.f32.mrf.mxu0  ;;  %v2502_v3 = vpop.f32.mrf.mxu1 }
 0x9d1   :  { %v2509_v25 = vadd.f32 %v2461_v36, %v7342_v15  ;;  %v2511_v29 = vadd.f32 %v2502_v3, %v7345_v4  ;;  %v6026_v4 = vld [vmem:[#allocation11 + $0xa8] ss:$16 sps:$4 sm:$0xff]  }
 0x9d2   :  { %v2463_v27 = vpop.f32.mrf.mxu0  ;;  %v2504_v0 = vpop.f32.mrf.mxu1 }
 0x9d3   :  { %v3779_v10 = vmul.f32 -1.442695, %v2509_v25  ;;  %v2510_v39 = vadd.f32 %v2463_v27, %v7343_v37  ;;  %v2512_v16 = vadd.f32 %v2504_v0, %v7344_v47  ;;  %v6020_v47 = vld [vmem:[#allocation11 + $0xac] ss:$16 sps:$4 sm:$0xff]  }
 0x9d4   :  { %v2465_v12 = vpop.f32.mrf.mxu0  ;;  %v2506_v2 = vpop.f32.mrf.mxu1 }
 0x9d5   :  { %4141 = vpow2.f32 %v3779_v10  ;;  %v3780_v13 = vmul.f32 -1.442695, %v2510_v39  ;;  %v3781_v48 = vmul.f32 -1.442695, %v2512_v16  ;;  %v5997_v39 = vld [vmem:[#allocation11 + $0xe0] ss:$16 sps:$4 sm:$0xff]  }
 0x9d6   :  { %v2466_v14 = vpop.f32.mrf.mxu0  ;;  %v2507_v28 = vpop.f32.mrf.mxu1  ;;  %v6000_v12 = vld [vmem:[#allocation11 + $0xe8] ss:$16 sps:$4 sm:$0xff]   ;;  %v6003_v2 = vld [vmem:[#allocation11 + $0xc4] ss:$16 sps:$4 sm:$0xff]   ;;  %v6023_v16 = vld [vmem:[#allocation11 + $0xa0] ss:$16 sps:$4 sm:$0xff]  }
 0x9d7   :  { %4143 = vpow2.f32 %v3780_v13  ;;  %v6011_v13 = vld [vmem:[#allocation11 + $0xc0] ss:$16 sps:$4 sm:$0xff]   ;;  %v6014_v14 = vld [vmem:[#allocation11 + $0xc8] ss:$16 sps:$4 sm:$0xff]   ;;  %v6017_v28 = vld [vmem:[#allocation11 + $0xa4] ss:$16 sps:$4 sm:$0xff]  }
 0x9d8   :  { %4145 = vtanh.f32 %v2511_v29  ;;  %v6029_v29 = vld [vmem:[#allocation11 + $0x84] ss:$16 sps:$4 sm:$0xff]  }
 0x9d9   :  { %4147 = vpow2.f32 %v3781_v48  ;;  %v6032_v48 = vld [vmem:[#allocation11 + $0x8c] ss:$16 sps:$4 sm:$0xff]  }
 0x9da   :  { %7346 = vst [vmem:[#allocation20_spill] sm:$0xff] %v6032_v48 }
 0x9e2   :  { %v4142_v7 = vpop.eup %4141 }
 0x9e3   :  { %v2516_v5 = vadd.f32 1.0, %v4142_v7  ;;  %v6035_v7 = vld [vmem:[#allocation11 + $0x80] ss:$16 sps:$4 sm:$0xff]  }
 0x9e4   :  { %v4144_v41 = vpop.eup %4143  ;;  %7347 = vst [vmem:[#allocation86_spill] sm:$0xff] %v6035_v7 }
 0x9e5   :  { %4149 = vrcp.f32 %v2516_v5  ;;  %v2522_v19 = vadd.f32 1.0, %v4144_v41  ;;  %v4146_v8 = vpop.eup %4145  ;;  %v6038_v5 = vld [vmem:[#allocation11 + $0x88] ss:$16 sps:$4 sm:$0xff]   ;;  %v6041_v41 = vld [vmem:[#allocation11 + $0x64] ss:$16 sps:$4 sm:$0xff]  }
 0x9e6   :  { %v4148_v20 = vpop.eup %4147  ;;  %7348 = vst [vmem:[#allocation88_spill] sm:$0xff] %v6038_v5  ;;  %7349 = vst [vmem:[#allocation89_spill] sm:$0xff] %v6041_v41 }
 0x9e7   :  { %4151 = vrcp.f32 %v2522_v19  ;;  %v2529_v36 = vadd.f32 1.0, %v4148_v20  ;;  %v6044_v19 = vld [vmem:[#allocation11 + $0x6c] ss:$16 sps:$4 sm:$0xff]   ;;  %v6050_v20 = vld [vmem:[#allocation11 + $0x68] ss:$16 sps:$4 sm:$0xff]  }
 0x9e8   :  { %7350 = vst [vmem:[#allocation87_spill] sm:$0xff] %v6044_v19  ;;  %7352 = vst [vmem:[#allocation27_spill] sm:$0xff] %v6050_v20 }
 0x9e9   :  { %4153 = vrcp.f32 %v2529_v36  ;;  %v6062_v36 = vld [vmem:[#allocation11 + $0x48] ss:$16 sps:$4 sm:$0xff]  }
 0x9ea   :  { %7356 = vst [vmem:[#allocation31_spill] sm:$0xff] %v6062_v36 }
 0x9f2   :  { %v4150_v34 = vpop.eup %4149 }
 0x9f3   :  { %v2533_v35 = vmul.f32 %v4150_v34, %v4146_v8  ;;  %v6047_v8 = vld [vmem:[#allocation11 + $0x60] ss:$16 sps:$4 sm:$0xff]   ;;  %v6053_v34 = vld [vmem:[#allocation11 + $0x44] ss:$16 sps:$4 sm:$0xff]  }
 0x9f4   :  { %v4152_v40 = vpop.eup %4151  ;;  %7351 = vst [vmem:[#allocation26_spill] sm:$0xff] %v6047_v8  ;;  %7353 = vst [vmem:[#allocation28_spill] sm:$0xff] %v6053_v34 }
 0x9f5   :  { %v2532_v15 = vmul.f32 %v4152_v40, %v5833_v32  ;;  %v6059_v40 = vld [vmem:[#allocation11 + $0x40] ss:$16 sps:$4 sm:$0xff]  }
 0x9f6   :  { %v4154_v27 = vpop.eup %4153  ;;  %7355 = vst [vmem:[#allocation30_spill] sm:$0xff] %v6059_v40 }
 0x9f7   :  { %v2534_v3 = vadd.f32 %v2533_v35, %v2532_v15  ;;  %v6056_v35 = vld [vmem:[#allocation11 + $0x4c] ss:$16 sps:$4 sm:$0xff]   ;;  %v6065_v15 = vld [vmem:[#allocation11 + $0x24] ss:$16 sps:$4 sm:$0xff]  }
 0x9f8   :  { %7354 = vst [vmem:[#allocation29_spill] sm:$0xff] %v6056_v35  ;;  %7357 = vst [vmem:[#allocation32_spill] sm:$0xff] %v6065_v15 }
 0x9f9   :  { %4155 = vtanh.f32 %v2534_v3  ;;  %v5991_v25 = vsel %vm2648_vm5, %v2534_v3, %v5833_v32  ;;  %v6006_v32 = vld [vmem:[#allocation11 + $0xcc] ss:$16 sps:$4 sm:$0xff]  }
 0x9fa   :  { %v6068_v3 = vld [vmem:[#allocation11 + $0x2c] ss:$16 sps:$4 sm:$0xff]  }
 0x9fb   :  { %7358 = vst [vmem:[#allocation33_spill] sm:$0xff] %v6068_v3 }
 0xa06   :  { %v4156_v0 = vpop.eup %4155 }
 0xa07   :  { %v5993_v10 = vmul.f32 %v4156_v0, %v4154_v27  ;;  %v6071_v27 = vld [vmem:[#allocation11 + $0x20] ss:$16 sps:$4 sm:$0xff]   ;;  %v6074_v0 = vld [vmem:[#allocation11 + $0x28] ss:$16 sps:$4 sm:$0xff]  }
 0xa08   :  { %7359 = vst [vmem:[#allocation34_spill] sm:$0xff] %v6071_v27  ;;  %7360 = vst [vmem:[#allocation35_spill] sm:$0xff] %v6074_v0 }
 0xa09   :  { %v2537_v37 = vpack.c.bf16 %v5993_v10, %v5993_v10 }
 0xa0b   :  { %2571 = vmatmul.mubr.bf16.vlgmr.msra.gmra.mxu0 %v2537_v37  ;;  %2612 = vmatmul.mubr.bf16.vlgmr.msra.gmra.mxu1 %v2537_v37  ;;  %v6077_v37 = vld [vmem:[#allocation11 + $0x4] ss:$16 sps:$4 sm:$0xff]  }
 0xa0c   :  { %2655 = vmatpush1.bf16.msra.mxu0 %v5997_v39  ;;  %2696 = vmatpush1.bf16.msra.mxu1 %v6000_v12  ;;  %7361 = vst [vmem:[#allocation36_spill] sm:$0xff] %v6077_v37 }
 0xa0d   :  { %2656 = vmatprep.subr.bf16.mxu0 %v6003_v2  ;;  %2697 = vmatprep.subr.bf16.mxu1 %v6006_v32 }
 0xa0e   :  { %2686 = vmatprep.mubr.bf16.mxu0 %v7018_v31  ;;  %2727 = vmatprep.mubr.bf16.mxu1 %v7018_v31 }
 0xa10   :  { %2657 = vmatpush1.bf16.msra.mxu0 %v6011_v13  ;;  %2698 = vmatpush1.bf16.msra.mxu1 %v6014_v14 }
 0xa11   :  { %2658 = vmatprep.subr.bf16.mxu0 %v6017_v28  ;;  %2699 = vmatprep.subr.bf16.mxu1 %v6020_v47 }
 0xa14   :  { %2659 = vmatpush1.bf16.msra.mxu0 %v6023_v16  ;;  %2700 = vmatpush1.bf16.msra.mxu1 %v6026_v4 }
 0xa15   :  { %2660 = vmatprep.subr.bf16.mxu0 %v6029_v29  ;;  %2701 = vmatprep.subr.bf16.mxu1 %v6032_v48 }
 0xa18   :  { %2661 = vmatpush1.bf16.msra.mxu0 %v6035_v7  ;;  %2702 = vmatpush1.bf16.msra.mxu1 %v6038_v5 }
 0xa19   :  { %2662 = vmatprep.subr.bf16.mxu0 %v6041_v41  ;;  %2703 = vmatprep.subr.bf16.mxu1 %v6044_v19 }
 0xa1c   :  { %2663 = vmatpush1.bf16.msra.mxu0 %v6047_v8  ;;  %2704 = vmatpush1.bf16.msra.mxu1 %v6050_v20 }
 0xa1d   :  { %2664 = vmatprep.subr.bf16.mxu0 %v6053_v34  ;;  %2705 = vmatprep.subr.bf16.mxu1 %v6056_v35 }
 0xa20   :  { %2665 = vmatpush1.bf16.msra.mxu0 %v6059_v40  ;;  %2706 = vmatpush1.bf16.msra.mxu1 %v6062_v36  ;;  %v6080_v36 = vld [vmem:[#allocation11 + $0xc] ss:$16 sps:$4 sm:$0xff]  }
 0xa21   :  { %2666 = vmatprep.subr.bf16.mxu0 %v6065_v15  ;;  %2707 = vmatprep.subr.bf16.mxu1 %v6068_v3  ;;  %7362 = vst [vmem:[#allocation37_spill] sm:$0xff] %v6080_v36  ;;  %v6083_v15 = vld [vmem:[#allocation11] ss:$16 sps:$4 sm:$0xff]   ;;  %v6086_v3 = vld [vmem:[#allocation11 + $0x8] ss:$16 sps:$4 sm:$0xff]  }
 0xa22   :  { %7363 = vst [vmem:[#allocation38_spill] sm:$0xff] %v6083_v15  ;;  %7364 = vst [vmem:[#allocation39_spill] sm:$0xff] %v6086_v3 }
 0xa24   :  { %2667 = vmatpush1.bf16.msra.mxu0 %v6071_v27  ;;  %2708 = vmatpush1.bf16.msra.mxu1 %v6074_v0  ;;  %v6089_v27 = vld [vmem:[#allocation8 + $0xe4] ss:$16 sps:$4 sm:$0xff]   ;;  %v6092_v0 = vld [vmem:[#allocation8 + $0xec] ss:$16 sps:$4 sm:$0xff]  }
 0xa25   :  { %2668 = vmatprep.subr.bf16.mxu0 %v6077_v37  ;;  %2709 = vmatprep.subr.bf16.mxu1 %v6080_v36  ;;  %7365 = vst [vmem:[#allocation40_spill] sm:$0xff] %v6089_v27  ;;  %7366 = vst [vmem:[#allocation41_spill] sm:$0xff] %v6092_v0 }
 0xa28   :  { %2669 = vmatpush1.bf16.msra.mxu0 %v6083_v15  ;;  %2710 = vmatpush1.bf16.msra.mxu1 %v6086_v3 }
 0xa29   :  { %2737 = vmatprep.subr.bf16.mxu0 %v6089_v27  ;;  %2778 = vmatprep.subr.bf16.mxu1 %v6092_v0 }
 0xacb   :  { %v2572_v37 = vpop.f32.mrf.mxu0  ;;  %v2613_v40 = vpop.f32.mrf.mxu1 }
 0xacc   :  { %v2573_v36 = vadd.f32 %v2572_v37, %v5974_v61  ;;  %v2614_v37 = vadd.f32 %v2613_v40, %v5976_v1 }
 0xacd   :  { %v2574_v35 = vpop.f32.mrf.mxu0  ;;  %v2615_v34 = vpop.f32.mrf.mxu1 }
 0xace   :  { %v2620_v15 = vadd.f32 %v2573_v36, %v5196_v38  ;;  %v2575_v20 = vadd.f32 %v2574_v35, %v5978_v42  ;;  %v2616_v0 = vadd.f32 %v2615_v34, %v5980_v49  ;;  %v2622_v42 = vadd.f32 %v2614_v37, %v5214_v63  ;;  %v6116_v37 = vld [vmem:[#allocation8 + $0xe0] ss:$16 sps:$4 sm:$0xff]  }
 0xacf   :  { %v2576_v8 = vpop.f32.mrf.mxu0  ;;  %v2617_v3 = vpop.f32.mrf.mxu1 }
 0xad0   :  { %v3782_v19 = vmul.f32 -1.442695, %v2620_v15  ;;  %v2621_v41 = vadd.f32 %v2575_v20, %v5201_v43  ;;  %v2623_v61 = vadd.f32 %v2616_v0, %v5208_v58 }
 0xad1   :  { %v2577_v27 = vpop.f32.mrf.mxu0  ;;  %v2618_v5 = vpop.f32.mrf.mxu1 }
 0xad2   :  { %4157 = vpow2.f32 %v3782_v19  ;;  %v3783_v7 = vmul.f32 -1.442695, %v2621_v41  ;;  %v3784_v48 = vmul.f32 -1.442695, %v2623_v61 }
 0xad4   :  { %4159 = vpow2.f32 %v3783_v7 }
 0xad5   :  { %4161 = vpow2.f32 %v3784_v48 }
 0xadf   :  { %v4158_v36 = vpop.eup %4157 }
 0xae0   :  { %v2627_v8 = vadd.f32 1.0, %v4158_v36  ;;  %v6119_v36 = vld [vmem:[#allocation8 + $0xe8] ss:$16 sps:$4 sm:$0xff]  }
 0xae1   :  { %v4160_v35 = vpop.eup %4159 }
 0xae2   :  { %4163 = vrcp.f32 %v2627_v8  ;;  %v2633_v20 = vadd.f32 1.0, %v4160_v35  ;;  %v4162_v5 = vpop.eup %4161  ;;  %v6133_v8 = vld [vmem:[#allocation8 + $0xc8] ss:$16 sps:$4 sm:$0xff]   ;;  %v6136_v35 = vld [vmem:[#allocation8 + $0xa4] ss:$16 sps:$4 sm:$0xff]  }
 0xae3   :  { %4165 = vtanh.f32 %v2622_v42  ;;  %v2640_v49 = vadd.f32 1.0, %v4162_v5  ;;  %v6125_v42 = vld [vmem:[#allocation8 + $0xcc] ss:$16 sps:$4 sm:$0xff]   ;;  %v6142_v5 = vld [vmem:[#allocation8 + $0xa0] ss:$16 sps:$4 sm:$0xff]  }
 0xae4   :  { %4167 = vrcp.f32 %v2633_v20  ;;  %v6139_v20 = vld [vmem:[#allocation8 + $0xac] ss:$16 sps:$4 sm:$0xff]  }
 0xae5   :  { %4169 = vrcp.f32 %v2640_v49  ;;  %v6154_v49 = vld [vmem:[#allocation8 + $0x80] ss:$16 sps:$4 sm:$0xff]  }
 0xaef   :  { %v4164_v41 = vpop.eup %4163 }
 0xaf0   :  { %v4166_v7 = vpop.eup %4165 }
 0xaf1   :  { %v4168_v19 = vpop.eup %4167  ;;  %v2644_v34 = vmul.f32 %v4166_v7, %v4164_v41  ;;  %v6145_v41 = vld [vmem:[#allocation8 + $0xa8] ss:$16 sps:$4 sm:$0xff]   ;;  %v6148_v7 = vld [vmem:[#allocation8 + $0x84] ss:$16 sps:$4 sm:$0xff]  }
 0xaf2   :  { %v2643_v15 = vmul.f32 %v4168_v19, %v5885_v59  ;;  %v4170_v48 = vpop.eup %4169  ;;  %v6151_v19 = vld [vmem:[#allocation8 + $0x8c] ss:$16 sps:$4 sm:$0xff]  }
 0xaf4   :  { %v2645_v1 = vadd.f32 %v2644_v34, %v2643_v15  ;;  %v6157_v34 = vld [vmem:[#allocation8 + $0x88] ss:$16 sps:$4 sm:$0xff]   ;;  %v6160_v15 = vld [vmem:[#allocation8 + $0x64] ss:$16 sps:$4 sm:$0xff]  }
 0xaf5   :  { %7367 = vst [vmem:[#allocation43_spill] sm:$0xff] %v6160_v15 }
 0xaf6   :  { %4171 = vtanh.f32 %v2645_v1  ;;  %v6107_v40 = vsel %vm2648_vm5, %v2645_v1, %v5885_v59  ;;  %v6122_v59 = vld [vmem:[#allocation8 + $0xc4] ss:$16 sps:$4 sm:$0xff]   ;;  %v6163_v1 = vld [vmem:[#allocation8 + $0x6c] ss:$16 sps:$4 sm:$0xff]  }
 0xaf7   :  { %7368 = vst [vmem:[#allocation44_spill] sm:$0xff] %v6163_v1 }
 0xb03   :  { %v4172_v3 = vpop.eup %4171 }
 0xb04   :  { %v2647_v27 = vmul.f32 %v4172_v3, %v4170_v48  ;;  %v6166_v48 = vld [vmem:[#allocation8 + $0x60] ss:$16 sps:$4 sm:$0xff]   ;;  %v6169_v3 = vld [vmem:[#allocation8 + $0x68] ss:$16 sps:$4 sm:$0xff]  }
 0xb05   :  { %7369 = vst [vmem:[#allocation45_spill] sm:$0xff] %v6166_v48  ;;  %7370 = vst [vmem:[#allocation46_spill] sm:$0xff] %v6169_v3 }
 0xb06   :  { %v6112_v0 = vsel %vm2648_vm5, %v2647_v27, %v5890_v26  ;;  %v6130_v26 = vld [vmem:[#allocation8 + $0xc0] ss:$16 sps:$4 sm:$0xff]   ;;  %v6172_v27 = vld [vmem:[#allocation8 + $0x44] ss:$16 sps:$4 sm:$0xff]  }
 0xb07   :  { %v2653_v61 = vpack.c.bf16 %v6112_v0, %v6112_v0  ;;  %7371 = vst [vmem:[#allocation47_spill] sm:$0xff] %v6172_v27 }
 0xb09   :  { %2687 = vmatmul.mubr.bf16.vlgmr.msra.gmra.mxu0 %v2653_v61  ;;  %2728 = vmatmul.mubr.bf16.vlgmr.msra.gmra.mxu1 %v2653_v61  ;;  %v6175_v61 = vld [vmem:[#allocation8 + $0x4c] ss:$16 sps:$4 sm:$0xff]  }
 0xb0a   :  { %2738 = vmatpush1.bf16.msra.mxu0 %v6116_v37  ;;  %2779 = vmatpush1.bf16.msra.mxu1 %v6119_v36  ;;  %7372 = vst [vmem:[#allocation48_spill] sm:$0xff] %v6175_v61 }
 0xb0b   :  { %2739 = vmatprep.subr.bf16.mxu0 %v6122_v59  ;;  %2780 = vmatprep.subr.bf16.mxu1 %v6125_v42 }
 0xb0c   :  { %2769 = vmatprep.mubr.bf16.mxu0 %v7018_v31  ;;  %2810 = vmatprep.mubr.bf16.mxu1 %v7018_v31 }
 0xb0e   :  { %2740 = vmatpush1.bf16.msra.mxu0 %v6130_v26  ;;  %2781 = vmatpush1.bf16.msra.mxu1 %v6133_v8 }
 0xb0f   :  { %2741 = vmatprep.subr.bf16.mxu0 %v6136_v35  ;;  %2782 = vmatprep.subr.bf16.mxu1 %v6139_v20 }
 0xb12   :  { %2742 = vmatpush1.bf16.msra.mxu0 %v6142_v5  ;;  %2783 = vmatpush1.bf16.msra.mxu1 %v6145_v41 }
 0xb13   :  { %2743 = vmatprep.subr.bf16.mxu0 %v6148_v7  ;;  %2784 = vmatprep.subr.bf16.mxu1 %v6151_v19 }
 0xb16   :  { %2744 = vmatpush1.bf16.msra.mxu0 %v6154_v49  ;;  %2785 = vmatpush1.bf16.msra.mxu1 %v6157_v34 }
 0xb17   :  { %2745 = vmatprep.subr.bf16.mxu0 %v6160_v15  ;;  %2786 = vmatprep.subr.bf16.mxu1 %v6163_v1  ;;  %v6178_v15 = vld [vmem:[#allocation8 + $0x40] ss:$16 sps:$4 sm:$0xff]   ;;  %v6181_v1 = vld [vmem:[#allocation8 + $0x48] ss:$16 sps:$4 sm:$0xff]  }
 0xb18   :  { %7373 = vst [vmem:[#allocation49_spill] sm:$0xff] %v6178_v15  ;;  %7374 = vst [vmem:[#allocation50_spill] sm:$0xff] %v6181_v1 }
 0xb1a   :  { %2746 = vmatpush1.bf16.msra.mxu0 %v6166_v48  ;;  %2787 = vmatpush1.bf16.msra.mxu1 %v6169_v3  ;;  %v6184_v48 = vld [vmem:[#allocation8 + $0x24] ss:$16 sps:$4 sm:$0xff]   ;;  %v6187_v3 = vld [vmem:[#allocation8 + $0x2c] ss:$16 sps:$4 sm:$0xff]  }
 0xb1b   :  { %2747 = vmatprep.subr.bf16.mxu0 %v6172_v27  ;;  %2788 = vmatprep.subr.bf16.mxu1 %v6175_v61  ;;  %7375 = vst [vmem:[#allocation51_spill] sm:$0xff] %v6184_v48  ;;  %7376 = vst [vmem:[#allocation52_spill] sm:$0xff] %v6187_v3  ;;  %v6190_v27 = vld [vmem:[#allocation8 + $0x20] ss:$16 sps:$4 sm:$0xff]   ;;  %v6193_v61 = vld [vmem:[#allocation8 + $0x28] ss:$16 sps:$4 sm:$0xff]  }
 0xb1c   :  { %7377 = vst [vmem:[#allocation53_spill] sm:$0xff] %v6190_v27  ;;  %7378 = vst [vmem:[#allocation54_spill] sm:$0xff] %v6193_v61 }
 0xb1e   :  { %2748 = vmatpush1.bf16.msra.mxu0 %v6178_v15  ;;  %2789 = vmatpush1.bf16.msra.mxu1 %v6181_v1  ;;  %v6196_v15 = vld [vmem:[#allocation8 + $0x4] ss:$16 sps:$4 sm:$0xff]   ;;  %v6199_v1 = vld [vmem:[#allocation8 + $0xc] ss:$16 sps:$4 sm:$0xff]  }
 0xb1f   :  { %2749 = vmatprep.subr.bf16.mxu0 %v6184_v48  ;;  %2790 = vmatprep.subr.bf16.mxu1 %v6187_v3  ;;  %7379 = vst [vmem:[#allocation55_spill] sm:$0xff] %v6196_v15  ;;  %7380 = vst [vmem:[#allocation70_spill] sm:$0xff] %v6199_v1  ;;  %v6206_v3 = vsel %vm2648_vm5, %v5993_v10, %v5928_v23  ;;  %v6208_v48 = vld [vmem:[#allocation8] ss:$16 sps:$4 sm:$0xff]   ;;  %v6225_v10 = vld [vmem:[#allocation10 + $0xe8] ss:$16 sps:$4 sm:$0xff]  }
 0xb20   :  { %7381 = vst [vmem:[#allocation56_spill] sm:$0xff] %v6208_v48  ;;  %v6222_v23 = vld [vmem:[#allocation10 + $0xe0] ss:$16 sps:$4 sm:$0xff]   ;;  %7386 = vst [vmem:[#allocation61_spill] sm:$0xff] %v6225_v10 }
 0xb21   :  { %7385 = vst [vmem:[#allocation60_spill] sm:$0xff] %v6222_v23 }
 0xb22   :  { %2750 = vmatpush1.bf16.msra.mxu0 %v6190_v27  ;;  %2791 = vmatpush1.bf16.msra.mxu1 %v6193_v61  ;;  %v6211_v27 = vld [vmem:[#allocation8 + $0x8] ss:$16 sps:$4 sm:$0xff]   ;;  %v6216_v61 = vld [vmem:[#allocation10 + $0xe4] ss:$16 sps:$4 sm:$0xff]  }
 0xb23   :  { %2751 = vmatprep.subr.bf16.mxu0 %v6196_v15  ;;  %2792 = vmatprep.subr.bf16.mxu1 %v6199_v1  ;;  %7382 = vst [vmem:[#allocation57_spill] sm:$0xff] %v6211_v27  ;;  %v2736_v15 = vpack.c.bf16 %v6206_v3, %v6206_v3  ;;  %7383 = vst [vmem:[#allocation58_spill] sm:$0xff] %v6216_v61  ;;  %v6219_v1 = vld [vmem:[#allocation10 + $0xec] ss:$16 sps:$4 sm:$0xff]  }
 0xb24   :  { %7384 = vst [vmem:[#allocation59_spill] sm:$0xff] %v6219_v1 }
 0xb26   :  { %2752 = vmatpush1.bf16.msra.mxu0 %v6208_v48  ;;  %2793 = vmatpush1.bf16.msra.mxu1 %v6211_v27  ;;  %v6228_v27 = vld [vmem:[#allocation10 + $0xc4] ss:$16 sps:$4 sm:$0xff]   ;;  %v6231_v48 = vld [vmem:[#allocation10 + $0xcc] ss:$16 sps:$4 sm:$0xff]  }
 0xb27   :  { %2848 = vmatprep.subr.bf16.mxu0 %v6216_v61  ;;  %2889 = vmatprep.subr.bf16.mxu1 %v6219_v1  ;;  %7387 = vst [vmem:[#allocation62_spill] sm:$0xff] %v6228_v27  ;;  %7388 = vst [vmem:[#allocation63_spill] sm:$0xff] %v6231_v48  ;;  %v6251_v1 = vld [vmem:[#allocation10 + $0xa8] ss:$16 sps:$4 sm:$0xff]  }
 0xb28   :  { %7394 = vst [vmem:[#allocation69_spill] sm:$0xff] %v6251_v1 }
 0xb29   :  { %2770 = vmatmul.mubr.bf16.vlgmr.msra.gmra.mxu0 %v2736_v15  ;;  %2811 = vmatmul.mubr.bf16.vlgmr.msra.gmra.mxu1 %v2736_v15  ;;  %v6236_v15 = vld [vmem:[#allocation10 + $0xc0] ss:$16 sps:$4 sm:$0xff]  }
 0xb2a   :  { %2849 = vmatpush1.bf16.msra.mxu0 %v6222_v23  ;;  %2890 = vmatpush1.bf16.msra.mxu1 %v6225_v10  ;;  %7389 = vst [vmem:[#allocation64_spill] sm:$0xff] %v6236_v15  ;;  %v6239_v23 = vld [vmem:[#allocation10 + $0xc8] ss:$16 sps:$4 sm:$0xff]   ;;  %v6242_v10 = vld [vmem:[#allocation10 + $0xa4] ss:$16 sps:$4 sm:$0xff]  }
 0xb2b   :  { %2850 = vmatprep.subr.bf16.mxu0 %v6228_v27  ;;  %2891 = vmatprep.subr.bf16.mxu1 %v6231_v48  ;;  %7390 = vst [vmem:[#allocation65_spill] sm:$0xff] %v6239_v23  ;;  %7391 = vst [vmem:[#allocation66_spill] sm:$0xff] %v6242_v10  ;;  %v6245_v27 = vld [vmem:[#allocation10 + $0xac] ss:$16 sps:$4 sm:$0xff]   ;;  %v6248_v48 = vld [vmem:[#allocation10 + $0xa0] ss:$16 sps:$4 sm:$0xff]  }
 0xb2c   :  { %2880 = vmatprep.mubr.bf16.mxu0 %v7018_v31  ;;  %2921 = vmatprep.mubr.bf16.mxu1 %v7018_v31  ;;  %7392 = vst [vmem:[#allocation67_spill] sm:$0xff] %v6245_v27  ;;  %7393 = vst [vmem:[#allocation68_spill] sm:$0xff] %v6248_v48 }
 0xb2e   :  { %2851 = vmatpush1.bf16.msra.mxu0 %v6236_v15  ;;  %2892 = vmatpush1.bf16.msra.mxu1 %v6239_v23  ;;  %v7440_v11 = vld [vmem:[#allocation62_spill] sm:$0xff] }
 0xb2f   :  { %2852 = vmatprep.subr.bf16.mxu0 %v6242_v10  ;;  %2893 = vmatprep.subr.bf16.mxu1 %v6245_v27 }
 0xb32   :  { %2853 = vmatpush1.bf16.msra.mxu0 %v6248_v48  ;;  %2894 = vmatpush1.bf16.msra.mxu1 %v6251_v1 }
 0xb33   :  { %2854 = vmatprep.subr.bf16.mxu0 %v7320_v30  ;;  %2895 = vmatprep.subr.bf16.mxu1 %v7321_v33 }
 0xb36   :  { %2855 = vmatpush1.bf16.msra.mxu0 %v7322_v44  ;;  %2896 = vmatpush1.bf16.msra.mxu1 %v7323_v6 }
 0xb37   :  { %2856 = vmatprep.subr.bf16.mxu0 %v7324_v22  ;;  %2897 = vmatprep.subr.bf16.mxu1 %v7325_v45 }
 0xb3a   :  { %2857 = vmatpush1.bf16.msra.mxu0 %v7326_v18  ;;  %2898 = vmatpush1.bf16.msra.mxu1 %v7327_v53 }
 0xb3b   :  { %2858 = vmatprep.subr.bf16.mxu0 %v7328_v21  ;;  %2899 = vmatprep.subr.bf16.mxu1 %v7329_v24 }
 0xb3e   :  { %2859 = vmatpush1.bf16.msra.mxu0 %v7330_v17  ;;  %2900 = vmatpush1.bf16.msra.mxu1 %v7331_v50  ;;  %v7395_v17 = vld [vmem:[#allocation94_spill] sm:$0xff] }
 0xb3f   :  { %2860 = vmatprep.subr.bf16.mxu0 %v7332_v51  ;;  %2901 = vmatprep.subr.bf16.mxu1 %v7333_v52 }
 0xb42   :  { %2861 = vmatpush1.bf16.msra.mxu0 %v7334_v62  ;;  %2902 = vmatpush1.bf16.msra.mxu1 %v7335_v54  ;;  %v7396_v54 = vld [vmem:[#allocation96_spill] sm:$0xff] }
 0xb43   :  { %2862 = vmatprep.subr.bf16.mxu0 %v7336_v55  ;;  %2903 = vmatprep.subr.bf16.mxu1 %v7337_v9 }
 0xb46   :  { %2863 = vmatpush1.bf16.msra.mxu0 %v7338_v56  ;;  %2904 = vmatpush1.bf16.msra.mxu1 %v7339_v57 }
 0xb47   :  { %2964 = vmatprep.subr.bf16.mxu0 %v5968_v46  ;;  %3005 = vmatprep.subr.bf16.mxu1 %v5971_v60 }
 0xbc9   :  { %v6276_v30 = vpop.f32.mrf.mxu0  ;;  %v6278_v33 = vpop.f32.mrf.mxu1 }
 0xbcb   :  { %v6280_v44 = vpop.f32.mrf.mxu0  ;;  %v6282_v6 = vpop.f32.mrf.mxu1 }
 0xbcd   :  { %v2692_v22 = vpop.f32.mrf.mxu0  ;;  %v2733_v45 = vpop.f32.mrf.mxu1 }
 0xbce   :  { %v7397_v22 = vld [vmem:[#allocation97_spill] sm:$0xff] }
 0xbcf   :  { %v2693_v18 = vpop.f32.mrf.mxu0  ;;  %v2734_v53 = vpop.f32.mrf.mxu1 }
 0xbd0   :  { %v7398_v18 = vld [vmem:[#allocation95_spill] sm:$0xff] }
 0xbe9   :  { %v2771_v21 = vpop.f32.mrf.mxu0  ;;  %v2812_v24 = vpop.f32.mrf.mxu1 }
 0xbea   :  { %v2819_v50 = vadd.f32 %v2771_v21, %v7395_v17  ;;  %v2821_v53 = vadd.f32 %v2812_v24, %v7398_v18  ;;  %v7404_v18 = vld [vmem:[#allocation26_spill] sm:$0xff] }
 0xbeb   :  { %v2773_v51 = vpop.f32.mrf.mxu0  ;;  %v2814_v52 = vpop.f32.mrf.mxu1 }
 0xbec   :  { %v3785_v62 = vmul.f32 -1.442695, %v2819_v50  ;;  %v2820_v55 = vadd.f32 %v2773_v51, %v7396_v54  ;;  %v2822_v45 = vadd.f32 %v2814_v52, %v7397_v22  ;;  %v7402_v22 = vld [vmem:[#allocation89_spill] sm:$0xff] }
 0xbed   :  { %v2775_v9 = vpop.f32.mrf.mxu0  ;;  %v2816_v56 = vpop.f32.mrf.mxu1 }
 0xbee   :  { %4173 = vpow2.f32 %v3785_v62  ;;  %v3786_v57 = vmul.f32 -1.442695, %v2820_v55  ;;  %v3787_v1 = vmul.f32 -1.442695, %v2822_v45  ;;  %v7400_v56 = vld [vmem:[#allocation86_spill] sm:$0xff]  ;;  %v7403_v45 = vld [vmem:[#allocation87_spill] sm:$0xff] }
 0xbef   :  { %v2776_v60 = vpop.f32.mrf.mxu0  ;;  %v2817_v46 = vpop.f32.mrf.mxu1 }
 0xbf0   :  { %4175 = vpow2.f32 %v3786_v57  ;;  %v7401_v57 = vld [vmem:[#allocation88_spill] sm:$0xff] }
 0xbf1   :  { %4177 = vtanh.f32 %v2821_v53  ;;  %v7405_v53 = vld [vmem:[#allocation27_spill] sm:$0xff] }
 0xbf2   :  { %4179 = vpow2.f32 %v3787_v1 }
 0xbfb   :  { %v4174_v48 = vpop.eup %4173 }
 0xbfc   :  { %v2826_v27 = vadd.f32 1.0, %v4174_v48 }
 0xbfd   :  { %v4176_v21 = vpop.eup %4175 }
 0xbfe   :  { %4181 = vrcp.f32 %v2826_v27  ;;  %v2832_v17 = vadd.f32 1.0, %v4176_v21  ;;  %v4178_v50 = vpop.eup %4177  ;;  %v7406_v21 = vld [vmem:[#allocation28_spill] sm:$0xff] }
 0xbff   :  { %v4180_v51 = vpop.eup %4179 }
 0xc00   :  { %4183 = vrcp.f32 %v2832_v17  ;;  %v2839_v46 = vadd.f32 1.0, %v4180_v51  ;;  %v7407_v17 = vld [vmem:[#allocation29_spill] sm:$0xff]  ;;  %v7409_v51 = vld [vmem:[#allocation31_spill] sm:$0xff] }
 0xc02   :  { %4185 = vrcp.f32 %v2839_v46  ;;  %v7413_v46 = vld [vmem:[#allocation35_spill] sm:$0xff] }
 0xc0b   :  { %v4182_v62 = vpop.eup %4181 }
 0xc0c   :  { %v2843_v54 = vmul.f32 %v4182_v62, %v4178_v50  ;;  %v7408_v50 = vld [vmem:[#allocation30_spill] sm:$0xff]  ;;  %v7410_v62 = vld [vmem:[#allocation32_spill] sm:$0xff] }
 0xc0d   :  { %v4184_v60 = vpop.eup %4183 }
 0xc0e   :  { %v2842_v55 = vmul.f32 %v4184_v60, %v5991_v25  ;;  %v7412_v60 = vld [vmem:[#allocation34_spill] sm:$0xff] }
 0xc0f   :  { %v4186_v48 = vpop.eup %4185 }
 0xc10   :  { %v2844_v24 = vadd.f32 %v2843_v54, %v2842_v55  ;;  %v7411_v54 = vld [vmem:[#allocation33_spill] sm:$0xff]  ;;  %v7414_v55 = vld [vmem:[#allocation36_spill] sm:$0xff] }
 0xc12   :  { %4187 = vtanh.f32 %v2844_v24  ;;  %v6293_v1 = vsel %vm2958_vm6, %v2844_v24, %v5991_v25  ;;  %v7399_v25 = vld [vmem:[#allocation20_spill] sm:$0xff]  ;;  %v7415_v24 = vld [vmem:[#allocation37_spill] sm:$0xff] }
 0xc1f   :  { %v4188_v27 = vpop.eup %4187 }
 0xc20   :  { %v6295_v52 = vmul.f32 %v4188_v27, %v4186_v48  ;;  %v7416_v48 = vld [vmem:[#allocation38_spill] sm:$0xff]  ;;  %v7417_v27 = vld [vmem:[#allocation39_spill] sm:$0xff] }
 0xc22   :  { %v2847_v9 = vpack.c.bf16 %v6295_v52, %v6295_v52 }
 0xc24   :  { %2881 = vmatmul.mubr.bf16.vlgmr.msra.gmra.mxu0 %v2847_v9  ;;  %2922 = vmatmul.mubr.bf16.vlgmr.msra.gmra.mxu1 %v2847_v9  ;;  %v7418_v9 = vld [vmem:[#allocation40_spill] sm:$0xff] }
 0xc25   :  { %2965 = vmatpush1.bf16.msra.mxu0 %v5997_v39  ;;  %3006 = vmatpush1.bf16.msra.mxu1 %v6000_v12 }
 0xc26   :  { %2966 = vmatprep.subr.bf16.mxu0 %v6003_v2  ;;  %3007 = vmatprep.subr.bf16.mxu1 %v6006_v32 }
 0xc27   :  { %2996 = vmatprep.mubr.bf16.mxu0 %v7018_v31  ;;  %3037 = vmatprep.mubr.bf16.mxu1 %v7018_v31 }
 0xc29   :  { %2967 = vmatpush1.bf16.msra.mxu0 %v6011_v13  ;;  %3008 = vmatpush1.bf16.msra.mxu1 %v6014_v14 }
 0xc2a   :  { %2968 = vmatprep.subr.bf16.mxu0 %v6017_v28  ;;  %3009 = vmatprep.subr.bf16.mxu1 %v6020_v47 }
 0xc2d   :  { %2969 = vmatpush1.bf16.msra.mxu0 %v6023_v16  ;;  %3010 = vmatpush1.bf16.msra.mxu1 %v6026_v4 }
 0xc2e   :  { %2970 = vmatprep.subr.bf16.mxu0 %v6029_v29  ;;  %3011 = vmatprep.subr.bf16.mxu1 %v7399_v25 }
 0xc31   :  { %2971 = vmatpush1.bf16.msra.mxu0 %v7400_v56  ;;  %3012 = vmatpush1.bf16.msra.mxu1 %v7401_v57 }
 0xc32   :  { %2972 = vmatprep.subr.bf16.mxu0 %v7402_v22  ;;  %3013 = vmatprep.subr.bf16.mxu1 %v7403_v45 }
 0xc35   :  { %2973 = vmatpush1.bf16.msra.mxu0 %v7404_v18  ;;  %3014 = vmatpush1.bf16.msra.mxu1 %v7405_v53 }
 0xc36   :  { %2974 = vmatprep.subr.bf16.mxu0 %v7406_v21  ;;  %3015 = vmatprep.subr.bf16.mxu1 %v7407_v17 }
 0xc39   :  { %2975 = vmatpush1.bf16.msra.mxu0 %v7408_v50  ;;  %3016 = vmatpush1.bf16.msra.mxu1 %v7409_v51  ;;  %v7419_v50 = vld [vmem:[#allocation41_spill] sm:$0xff] }
 0xc3a   :  { %2976 = vmatprep.subr.bf16.mxu0 %v7410_v62  ;;  %3017 = vmatprep.subr.bf16.mxu1 %v7411_v54 }
 0xc3d   :  { %2977 = vmatpush1.bf16.msra.mxu0 %v7412_v60  ;;  %3018 = vmatpush1.bf16.msra.mxu1 %v7413_v46 }
 0xc3e   :  { %2978 = vmatprep.subr.bf16.mxu0 %v7414_v55  ;;  %3019 = vmatprep.subr.bf16.mxu1 %v7415_v24 }
 0xc41   :  { %2979 = vmatpush1.bf16.msra.mxu0 %v7416_v48  ;;  %3020 = vmatpush1.bf16.msra.mxu1 %v7417_v27 }
 0xc42   :  { %3047 = vmatprep.subr.bf16.mxu0 %v7418_v9  ;;  %3088 = vmatprep.subr.bf16.mxu1 %v7419_v50 }
 0xce4   :  { %v2882_v51 = vpop.f32.mrf.mxu0  ;;  %v2923_v62 = vpop.f32.mrf.mxu1 }
 0xce5   :  { %v2883_v54 = vadd.f32 %v2882_v51, %v6276_v30  ;;  %v2924_v51 = vadd.f32 %v2923_v62, %v6278_v33 }
 0xce6   :  { %v2884_v17 = vpop.f32.mrf.mxu0  ;;  %v2925_v60 = vpop.f32.mrf.mxu1 }
 0xce7   :  { %v2930_v46 = vadd.f32 %v2883_v54, %v5196_v38  ;;  %v2885_v55 = vadd.f32 %v2884_v17, %v6280_v44  ;;  %v2926_v50 = vadd.f32 %v2925_v60, %v6282_v6  ;;  %v2932_v44 = vadd.f32 %v2924_v51, %v5214_v63  ;;  %v7422_v51 = vld [vmem:[#allocation45_spill] sm:$0xff] }
 0xce8   :  { %v2886_v21 = vpop.f32.mrf.mxu0  ;;  %v2927_v24 = vpop.f32.mrf.mxu1 }
 0xce9   :  { %v3788_v53 = vmul.f32 -1.442695, %v2930_v46  ;;  %v2931_v48 = vadd.f32 %v2885_v55, %v5201_v43  ;;  %v2933_v30 = vadd.f32 %v2926_v50, %v5208_v58 }
 0xcea   :  { %v2887_v27 = vpop.f32.mrf.mxu0  ;;  %v2928_v18 = vpop.f32.mrf.mxu1 }
 0xceb   :  { %4189 = vpow2.f32 %v3788_v53  ;;  %v3789_v9 = vmul.f32 -1.442695, %v2931_v48  ;;  %v3790_v45 = vmul.f32 -1.442695, %v2933_v30 }
 0xced   :  { %4191 = vpow2.f32 %v3789_v9 }
 0xcee   :  { %4193 = vpow2.f32 %v3790_v45 }
 0xcf8   :  { %v4190_v54 = vpop.eup %4189 }
 0xcf9   :  { %v2937_v21 = vadd.f32 1.0, %v4190_v54  ;;  %v7423_v54 = vld [vmem:[#allocation46_spill] sm:$0xff] }
 0xcfa   :  { %v4192_v17 = vpop.eup %4191 }
 0xcfb   :  { %4195 = vrcp.f32 %v2937_v21  ;;  %v2943_v46 = vadd.f32 1.0, %v4192_v17  ;;  %v4194_v18 = vpop.eup %4193  ;;  %v7425_v21 = vld [vmem:[#allocation48_spill] sm:$0xff]  ;;  %v7426_v17 = vld [vmem:[#allocation49_spill] sm:$0xff] }
 0xcfc   :  { %4197 = vtanh.f32 %v2932_v44  ;;  %v2950_v6 = vadd.f32 1.0, %v4194_v18  ;;  %v7424_v44 = vld [vmem:[#allocation47_spill] sm:$0xff] }
 0xcfd   :  { %4199 = vrcp.f32 %v2943_v46  ;;  %v7427_v46 = vld [vmem:[#allocation50_spill] sm:$0xff]  ;;  %v7428_v18 = vld [vmem:[#allocation51_spill] sm:$0xff] }
 0xcfe   :  { %4201 = vrcp.f32 %v2950_v6  ;;  %v7432_v6 = vld [vmem:[#allocation55_spill] sm:$0xff] }
 0xd08   :  { %v4196_v53 = vpop.eup %4195 }
 0xd09   :  { %v4198_v55 = vpop.eup %4197 }
 0xd0a   :  { %v4200_v24 = vpop.eup %4199  ;;  %v2954_v60 = vmul.f32 %v4198_v55, %v4196_v53  ;;  %v7429_v53 = vld [vmem:[#allocation52_spill] sm:$0xff]  ;;  %v7430_v55 = vld [vmem:[#allocation53_spill] sm:$0xff] }
 0xd0b   :  { %v2953_v50 = vmul.f32 %v4200_v24, %v6107_v40  ;;  %v4202_v45 = vpop.eup %4201  ;;  %v7431_v24 = vld [vmem:[#allocation54_spill] sm:$0xff] }
 0xd0d   :  { %v2955_v33 = vadd.f32 %v2954_v60, %v2953_v50  ;;  %v7433_v60 = vld [vmem:[#allocation70_spill] sm:$0xff]  ;;  %v6388_v50 = vsel %vm2958_vm6, %v6295_v52, %v6206_v3  ;;  %v7441_v3 = vld [vmem:[#allocation63_spill] sm:$0xff] }
 0xd0e   :  { %7434 = vst [vmem:[#allocation71_spill] sm:$0xff] %v6388_v50  ;;  %v7442_v52 = vld [vmem:[#allocation67_spill] sm:$0xff] }
 0xd0f   :  { %4203 = vtanh.f32 %v2955_v33  ;;  %v6345_v62 = vsel %vm2958_vm6, %v2955_v33, %v6107_v40  ;;  %v7420_v40 = vld [vmem:[#allocation43_spill] sm:$0xff]  ;;  %v7435_v33 = vld [vmem:[#allocation56_spill] sm:$0xff] }
 0xd1c   :  { %v4204_v48 = vpop.eup %4203 }
 0xd1d   :  { %v2957_v27 = vmul.f32 %v4204_v48, %v4202_v45  ;;  %v7436_v45 = vld [vmem:[#allocation57_spill] sm:$0xff]  ;;  %v3046_v48 = vpack.c.bf16 %v6388_v50, %v6388_v50  ;;  %v7467_v50 = vld [vmem:[#allocation98_spill] sm:$0xff] }
 0xd1f   :  { %v6350_v9 = vsel %vm2958_vm6, %v2957_v27, %v6112_v0  ;;  %v7421_v0 = vld [vmem:[#allocation44_spill] sm:$0xff]  ;;  %v7437_v27 = vld [vmem:[#allocation59_spill] sm:$0xff] }
 0xd20   :  { %v2963_v30 = vpack.c.bf16 %v6350_v9, %v6350_v9 }
 0xd22   :  { %2997 = vmatmul.mubr.bf16.vlgmr.msra.gmra.mxu0 %v2963_v30  ;;  %3038 = vmatmul.mubr.bf16.vlgmr.msra.gmra.mxu1 %v2963_v30  ;;  %v7438_v30 = vld [vmem:[#allocation60_spill] sm:$0xff] }
 0xd23   :  { %3048 = vmatpush1.bf16.msra.mxu0 %v6116_v37  ;;  %3089 = vmatpush1.bf16.msra.mxu1 %v6119_v36 }
 0xd24   :  { %3049 = vmatprep.subr.bf16.mxu0 %v6122_v59  ;;  %3090 = vmatprep.subr.bf16.mxu1 %v6125_v42 }
 0xd25   :  { %3079 = vmatprep.mubr.bf16.mxu0 %v7018_v31  ;;  %3120 = vmatprep.mubr.bf16.mxu1 %v7018_v31 }
 0xd27   :  { %3050 = vmatpush1.bf16.msra.mxu0 %v6130_v26  ;;  %3091 = vmatpush1.bf16.msra.mxu1 %v6133_v8 }
 0xd28   :  { %3051 = vmatprep.subr.bf16.mxu0 %v6136_v35  ;;  %3092 = vmatprep.subr.bf16.mxu1 %v6139_v20 }
 0xd2b   :  { %3052 = vmatpush1.bf16.msra.mxu0 %v6142_v5  ;;  %3093 = vmatpush1.bf16.msra.mxu1 %v6145_v41 }
 0xd2c   :  { %3053 = vmatprep.subr.bf16.mxu0 %v6148_v7  ;;  %3094 = vmatprep.subr.bf16.mxu1 %v6151_v19 }
 0xd2f   :  { %3054 = vmatpush1.bf16.msra.mxu0 %v6154_v49  ;;  %3095 = vmatpush1.bf16.msra.mxu1 %v6157_v34 }
 0xd30   :  { %3055 = vmatprep.subr.bf16.mxu0 %v7420_v40  ;;  %3096 = vmatprep.subr.bf16.mxu1 %v7421_v0 }
 0xd33   :  { %3056 = vmatpush1.bf16.msra.mxu0 %v7422_v51  ;;  %3097 = vmatpush1.bf16.msra.mxu1 %v7423_v54 }
 0xd34   :  { %3057 = vmatprep.subr.bf16.mxu0 %v7424_v44  ;;  %3098 = vmatprep.subr.bf16.mxu1 %v7425_v21 }
 0xd37   :  { %3058 = vmatpush1.bf16.msra.mxu0 %v7426_v17  ;;  %3099 = vmatpush1.bf16.msra.mxu1 %v7427_v46 }
 0xd38   :  { %3059 = vmatprep.subr.bf16.mxu0 %v7428_v18  ;;  %3100 = vmatprep.subr.bf16.mxu1 %v7429_v53 }
 0xd3b   :  { %3060 = vmatpush1.bf16.msra.mxu0 %v7430_v55  ;;  %3101 = vmatpush1.bf16.msra.mxu1 %v7431_v24 }
 0xd3c   :  { %3061 = vmatprep.subr.bf16.mxu0 %v7432_v6  ;;  %3102 = vmatprep.subr.bf16.mxu1 %v7433_v60  ;;  %v7439_v60 = vld [vmem:[#allocation61_spill] sm:$0xff] }
 0xd3f   :  { %3062 = vmatpush1.bf16.msra.mxu0 %v7435_v33  ;;  %3103 = vmatpush1.bf16.msra.mxu1 %v7436_v45 }
 0xd40   :  { %3158 = vmatprep.subr.bf16.mxu0 %v6216_v61  ;;  %3199 = vmatprep.subr.bf16.mxu1 %v7437_v27 }
 0xd42   :  { %3080 = vmatmul.mubr.bf16.vlgmr.msra.gmra.mxu0 %v3046_v48  ;;  %3121 = vmatmul.mubr.bf16.vlgmr.msra.gmra.mxu1 %v3046_v48  ;;  %v7443_v48 = vld [vmem:[#allocation68_spill] sm:$0xff] }
 0xd43   :  { %3159 = vmatpush1.bf16.msra.mxu0 %v7438_v30  ;;  %3200 = vmatpush1.bf16.msra.mxu1 %v7439_v60  ;;  %v7444_v30 = vld [vmem:[#allocation69_spill] sm:$0xff]  ;;  %v6408_v60 = vld [vmem:[#allocation10 + $0x84] ss:$16 sps:$4 sm:$0xff]  }
 0xd44   :  { %3160 = vmatprep.subr.bf16.mxu0 %v7440_v11  ;;  %3201 = vmatprep.subr.bf16.mxu1 %v7441_v3  ;;  %7445 = vst [vmem:[#allocation72_spill] sm:$0xff] %v6408_v60  ;;  %v6411_v3 = vld [vmem:[#allocation10 + $0x8c] ss:$16 sps:$4 sm:$0xff]   ;;  %v6414_v11 = vld [vmem:[#allocation10 + $0x80] ss:$16 sps:$4 sm:$0xff]  }
 0xd45   :  { %3190 = vmatprep.mubr.bf16.mxu0 %v7018_v31  ;;  %3231 = vmatprep.mubr.bf16.mxu1 %v7018_v31  ;;  %7446 = vst [vmem:[#allocation73_spill] sm:$0xff] %v6411_v3  ;;  %7447 = vst [vmem:[#allocation74_spill] sm:$0xff] %v6414_v11 }
 0xd47   :  { %3161 = vmatpush1.bf16.msra.mxu0 %v6236_v15  ;;  %3202 = vmatpush1.bf16.msra.mxu1 %v6239_v23  ;;  %v6417_v23 = vld [vmem:[#allocation10 + $0x88] ss:$16 sps:$4 sm:$0xff]  }
 0xd48   :  { %3162 = vmatprep.subr.bf16.mxu0 %v6242_v10  ;;  %3203 = vmatprep.subr.bf16.mxu1 %v7442_v52  ;;  %7448 = vst [vmem:[#allocation75_spill] sm:$0xff] %v6417_v23  ;;  %v6420_v52 = vld [vmem:[#allocation10 + $0x64] ss:$16 sps:$4 sm:$0xff]  }
 0xd49   :  { %7449 = vst [vmem:[#allocation76_spill] sm:$0xff] %v6420_v52 }
 0xd4b   :  { %3163 = vmatpush1.bf16.msra.mxu0 %v7443_v48  ;;  %3204 = vmatpush1.bf16.msra.mxu1 %v7444_v30  ;;  %v6423_v30 = vld [vmem:[#allocation10 + $0x6c] ss:$16 sps:$4 sm:$0xff]  }
 0xd4c   :  { %3164 = vmatprep.subr.bf16.mxu0 %v6408_v60  ;;  %3205 = vmatprep.subr.bf16.mxu1 %v6411_v3  ;;  %7450 = vst [vmem:[#allocation77_spill] sm:$0xff] %v6423_v30  ;;  %v6426_v60 = vld [vmem:[#allocation10 + $0x60] ss:$16 sps:$4 sm:$0xff]   ;;  %v6429_v3 = vld [vmem:[#allocation10 + $0x68] ss:$16 sps:$4 sm:$0xff]  }
 0xd4d   :  { %7451 = vst [vmem:[#allocation78_spill] sm:$0xff] %v6426_v60  ;;  %7452 = vst [vmem:[#allocation80_spill] sm:$0xff] %v6429_v3  ;;  %v7466_v48 = vld [vmem:[#allocation19_spill] sm:$0xff] }
 0xd4f   :  { %3165 = vmatpush1.bf16.msra.mxu0 %v6414_v11  ;;  %3206 = vmatpush1.bf16.msra.mxu1 %v6417_v23  ;;  %v6432_v11 = vld [vmem:[#allocation10 + $0x44] ss:$16 sps:$4 sm:$0xff]   ;;  %v6435_v23 = vld [vmem:[#allocation10 + $0x4c] ss:$16 sps:$4 sm:$0xff]  }
 0xd50   :  { %3166 = vmatprep.subr.bf16.mxu0 %v6420_v52  ;;  %3207 = vmatprep.subr.bf16.mxu1 %v6423_v30  ;;  %7453 = vst [vmem:[#allocation81_spill] sm:$0xff] %v6432_v11  ;;  %7454 = vst [vmem:[#allocation79_spill] sm:$0xff] %v6435_v23  ;;  %v6438_v52 = vld [vmem:[#allocation10 + $0x40] ss:$16 sps:$4 sm:$0xff]   ;;  %v6441_v30 = vld [vmem:[#allocation10 + $0x48] ss:$16 sps:$4 sm:$0xff]  }
 0xd51   :  { %7455 = vst [vmem:[#allocation82_spill] sm:$0xff] %v6438_v52  ;;  %7456 = vst [vmem:[#allocation84_spill] sm:$0xff] %v6441_v30 }
 0xd53   :  { %3167 = vmatpush1.bf16.msra.mxu0 %v6426_v60  ;;  %3208 = vmatpush1.bf16.msra.mxu1 %v6429_v3  ;;  %v6444_v60 = vld [vmem:[#allocation10 + $0x24] ss:$16 sps:$4 sm:$0xff]   ;;  %v6447_v3 = vld [vmem:[#allocation10 + $0x2c] ss:$16 sps:$4 sm:$0xff]  }
 0xd54   :  { %3168 = vmatprep.subr.bf16.mxu0 %v6432_v11  ;;  %3209 = vmatprep.subr.bf16.mxu1 %v6435_v23  ;;  %7457 = vst [vmem:[#allocation85_spill] sm:$0xff] %v6444_v60  ;;  %7458 = vst [vmem:[#allocation83_spill] sm:$0xff] %v6447_v3  ;;  %v6450_v11 = vld [vmem:[#allocation10 + $0x20] ss:$16 sps:$4 sm:$0xff]   ;;  %v6453_v23 = vld [vmem:[#allocation10 + $0x28] ss:$16 sps:$4 sm:$0xff]  }
 0xd55   :  { %7459 = vst [vmem:[#allocation22_spill] sm:$0xff] %v6450_v11  ;;  %7460 = vst [vmem:[#allocation23_spill] sm:$0xff] %v6453_v23 }
 0xd57   :  { %3169 = vmatpush1.bf16.msra.mxu0 %v6438_v52  ;;  %3210 = vmatpush1.bf16.msra.mxu1 %v6441_v30  ;;  %v6456_v52 = vld [vmem:[#allocation10 + $0x4] ss:$16 sps:$4 sm:$0xff]   ;;  %v6459_v30 = vld [vmem:[#allocation10 + $0xc] ss:$16 sps:$4 sm:$0xff]  }
 0xd58   :  { %3170 = vmatprep.subr.bf16.mxu0 %v6444_v60  ;;  %3211 = vmatprep.subr.bf16.mxu1 %v6447_v3  ;;  %7461 = vst [vmem:[#allocation24_spill] sm:$0xff] %v6456_v52  ;;  %7462 = vst [vmem:[#allocation25_spill] sm:$0xff] %v6459_v30  ;;  %v6462_v60 = vld [vmem:[#allocation10] ss:$16 sps:$4 sm:$0xff]   ;;  %v6465_v3 = vld [vmem:[#allocation10 + $0x8] ss:$16 sps:$4 sm:$0xff]  }
 0xd59   :  { %7463 = vst [vmem:[#allocation42_spill] sm:$0xff] %v6462_v60  ;;  %7464 = vst [vmem:[#allocation90_spill] sm:$0xff] %v6465_v3 }
 0xd5b   :  { %3171 = vmatpush1.bf16.msra.mxu0 %v6450_v11  ;;  %3212 = vmatpush1.bf16.msra.mxu1 %v6453_v23  ;;  %v7465_v11 = vld [vmem:[#allocation21_spill] sm:$0xff] }
 0xd5c   :  { %3172 = vmatprep.subr.bf16.mxu0 %v6456_v52  ;;  %3213 = vmatprep.subr.bf16.mxu1 %v6459_v30 }
 0xd5f   :  { %3173 = vmatpush1.bf16.msra.mxu0 %v6462_v60  ;;  %3214 = vmatpush1.bf16.msra.mxu1 %v6465_v3 }
 0xd60   :  { %3274 = vmatprep.subr.bf16.mxu0 %v7465_v11  ;;  %3315 = vmatprep.subr.bf16.mxu1 %v7466_v48  ;;  %v7468_v48 = vld [vmem:[#allocation100_spill] sm:$0xff] }
 0xde2   :  { %v6470_v23 = vpop.f32.mrf.mxu0  ;;  %v6472_v10 = vpop.f32.mrf.mxu1 }
 0xde4   :  { %v6474_v52 = vpop.f32.mrf.mxu0  ;;  %v6476_v15 = vpop.f32.mrf.mxu1 }
 0xde6   :  { %v3002_v30 = vpop.f32.mrf.mxu0  ;;  %v3043_v27 = vpop.f32.mrf.mxu1 }
 0xde7   :  { %v7469_v30 = vld [vmem:[#allocation101_spill] sm:$0xff] }
 0xde8   :  { %v3003_v61 = vpop.f32.mrf.mxu0  ;;  %v3044_v60 = vpop.f32.mrf.mxu1 }
 0xde9   :  { %v7470_v61 = vld [vmem:[#allocation99_spill] sm:$0xff] }
 0xe02   :  { %v3081_v45 = vpop.f32.mrf.mxu0  ;;  %v3122_v33 = vpop.f32.mrf.mxu1 }
 0xe03   :  { %v3129_v3 = vadd.f32 %v3081_v45, %v7467_v50  ;;  %v3131_v60 = vadd.f32 %v3122_v33, %v7470_v61 }
 0xe04   :  { %v3083_v6 = vpop.f32.mrf.mxu0  ;;  %v3124_v11 = vpop.f32.mrf.mxu1 }
 0xe05   :  { %v3791_v24 = vmul.f32 -1.442695, %v3129_v3  ;;  %v3130_v55 = vadd.f32 %v3083_v6, %v7468_v48  ;;  %v3132_v27 = vadd.f32 %v3124_v11, %v7469_v30  ;;  %v6483_v6 = vld [vmem:[#allocation5] sm:$0xff] }
 0xe06   :  { %v3085_v53 = vpop.f32.mrf.mxu0  ;;  %v3126_v18 = vpop.f32.mrf.mxu1  ;;  %vm3268_vm7 = vcmp.gt.s32.totalorder %v6483_v6, 6  ;;  %v7487_v48 = vld [vmem:[#allocation41_spill] sm:$0xff]  ;;  %vm3578_vm8 = vcmp.gt.s32.totalorder %v6483_v6, 7 }
 0xe07   :  { %4205 = vpow2.f32 %v3791_v24  ;;  %v3792_v46 = vmul.f32 -1.442695, %v3130_v55  ;;  %v3793_v44 = vmul.f32 -1.442695, %v3132_v27 }
 0xe08   :  { %v3086_v17 = vpop.f32.mrf.mxu0  ;;  %v3127_v21 = vpop.f32.mrf.mxu1 }
 0xe09   :  { %4207 = vpow2.f32 %v3792_v46 }
 0xe0a   :  { %4209 = vtanh.f32 %v3131_v60 }
 0xe0b   :  { %4211 = vpow2.f32 %v3793_v44 }
 0xe14   :  { %v4206_v54 = vpop.eup %4205 }
 0xe15   :  { %v3136_v51 = vadd.f32 1.0, %v4206_v54 }
 0xe16   :  { %v4208_v50 = vpop.eup %4207 }
 0xe17   :  { %4213 = vrcp.f32 %v3136_v51  ;;  %v3142_v45 = vadd.f32 1.0, %v4208_v50  ;;  %v4210_v53 = vpop.eup %4209 }
 0xe18   :  { %v4212_v18 = vpop.eup %4211 }
 0xe19   :  { %4215 = vrcp.f32 %v3142_v45  ;;  %v3149_v21 = vadd.f32 1.0, %v4212_v18 }
 0xe1b   :  { %4217 = vrcp.f32 %v3149_v21 }
 0xe24   :  { %v4214_v24 = vpop.eup %4213 }
 0xe25   :  { %v3153_v55 = vmul.f32 %v4214_v24, %v4210_v53 }
 0xe26   :  { %v4216_v17 = vpop.eup %4215 }
 0xe27   :  { %v3152_v46 = vmul.f32 %v4216_v17, %v6293_v1 }
 0xe28   :  { %v4218_v54 = vpop.eup %4217 }
 0xe29   :  { %v3154_v33 = vadd.f32 %v3153_v55, %v3152_v46 }
 0xe2b   :  { %4219 = vtanh.f32 %v3154_v33  ;;  %v6489_v51 = vsel %vm3268_vm7, %v3154_v33, %v6293_v1  ;;  %v7482_v1 = vld [vmem:[#allocation36_spill] sm:$0xff] }
 0xe38   :  { %v4220_v44 = vpop.eup %4219 }
 0xe39   :  { %v6491_v3 = vmul.f32 %v4220_v44, %v4218_v54 }
 0xe3b   :  { %v3157_v11 = vpack.c.bf16 %v6491_v3, %v6491_v3 }
 0xe3d   :  { %3191 = vmatmul.mubr.bf16.vlgmr.msra.gmra.mxu0 %v3157_v11  ;;  %3232 = vmatmul.mubr.bf16.vlgmr.msra.gmra.mxu1 %v3157_v11 }
 0xe3e   :  { %3275 = vmatpush1.bf16.msra.mxu0 %v5997_v39  ;;  %3316 = vmatpush1.bf16.msra.mxu1 %v6000_v12  ;;  %v7471_v39 = vld [vmem:[#allocation87_spill] sm:$0xff]  ;;  %v7472_v12 = vld [vmem:[#allocation26_spill] sm:$0xff] }
 0xe3f   :  { %3276 = vmatprep.subr.bf16.mxu0 %v6003_v2  ;;  %3317 = vmatprep.subr.bf16.mxu1 %v6006_v32  ;;  %v7473_v2 = vld [vmem:[#allocation27_spill] sm:$0xff]  ;;  %v7474_v32 = vld [vmem:[#allocation28_spill] sm:$0xff] }
 0xe40   :  { %3306 = vmatprep.mubr.bf16.mxu0 %v7018_v31  ;;  %3347 = vmatprep.mubr.bf16.mxu1 %v7018_v31 }
 0xe42   :  { %3277 = vmatpush1.bf16.msra.mxu0 %v6011_v13  ;;  %3318 = vmatpush1.bf16.msra.mxu1 %v6014_v14  ;;  %v7475_v13 = vld [vmem:[#allocation29_spill] sm:$0xff]  ;;  %v7476_v14 = vld [vmem:[#allocation30_spill] sm:$0xff] }
 0xe43   :  { %3278 = vmatprep.subr.bf16.mxu0 %v6017_v28  ;;  %3319 = vmatprep.subr.bf16.mxu1 %v6020_v47  ;;  %v7477_v28 = vld [vmem:[#allocation31_spill] sm:$0xff]  ;;  %v7478_v47 = vld [vmem:[#allocation32_spill] sm:$0xff] }
 0xe46   :  { %3279 = vmatpush1.bf16.msra.mxu0 %v6023_v16  ;;  %3320 = vmatpush1.bf16.msra.mxu1 %v6026_v4  ;;  %v7479_v16 = vld [vmem:[#allocation33_spill] sm:$0xff]  ;;  %v7480_v4 = vld [vmem:[#allocation34_spill] sm:$0xff] }
 0xe47   :  { %3280 = vmatprep.subr.bf16.mxu0 %v6029_v29  ;;  %3321 = vmatprep.subr.bf16.mxu1 %v7399_v25  ;;  %v7481_v29 = vld [vmem:[#allocation35_spill] sm:$0xff]  ;;  %v7483_v25 = vld [vmem:[#allocation37_spill] sm:$0xff] }
 0xe4a   :  { %3281 = vmatpush1.bf16.msra.mxu0 %v7400_v56  ;;  %3322 = vmatpush1.bf16.msra.mxu1 %v7401_v57  ;;  %v7484_v56 = vld [vmem:[#allocation38_spill] sm:$0xff]  ;;  %v7485_v57 = vld [vmem:[#allocation39_spill] sm:$0xff] }
 0xe4b   :  { %3282 = vmatprep.subr.bf16.mxu0 %v7402_v22  ;;  %3323 = vmatprep.subr.bf16.mxu1 %v7471_v39  ;;  %v7486_v22 = vld [vmem:[#allocation40_spill] sm:$0xff] }
 0xe4e   :  { %3283 = vmatpush1.bf16.msra.mxu0 %v7472_v12  ;;  %3324 = vmatpush1.bf16.msra.mxu1 %v7473_v2 }
 0xe4f   :  { %3284 = vmatprep.subr.bf16.mxu0 %v7474_v32  ;;  %3325 = vmatprep.subr.bf16.mxu1 %v7475_v13 }
 0xe52   :  { %3285 = vmatpush1.bf16.msra.mxu0 %v7476_v14  ;;  %3326 = vmatpush1.bf16.msra.mxu1 %v7477_v28 }
 0xe53   :  { %3286 = vmatprep.subr.bf16.mxu0 %v7478_v47  ;;  %3327 = vmatprep.subr.bf16.mxu1 %v7479_v16 }
 0xe56   :  { %3287 = vmatpush1.bf16.msra.mxu0 %v7480_v4  ;;  %3328 = vmatpush1.bf16.msra.mxu1 %v7481_v29 }
 0xe57   :  { %3288 = vmatprep.subr.bf16.mxu0 %v7482_v1  ;;  %3329 = vmatprep.subr.bf16.mxu1 %v7483_v25 }
 0xe5a   :  { %3289 = vmatpush1.bf16.msra.mxu0 %v7484_v56  ;;  %3330 = vmatpush1.bf16.msra.mxu1 %v7485_v57 }
 0xe5b   :  { %3357 = vmatprep.subr.bf16.mxu0 %v7486_v22  ;;  %3398 = vmatprep.subr.bf16.mxu1 %v7487_v48  ;;  %v7504_v48 = vld [vmem:[#allocation59_spill] sm:$0xff] }
 0xefd   :  { %v3192_v30 = vpop.f32.mrf.mxu0  ;;  %v3233_v27 = vpop.f32.mrf.mxu1 }
 0xefe   :  { %v3193_v61 = vadd.f32 %v3192_v30, %v6470_v23  ;;  %v3234_v44 = vadd.f32 %v3233_v27, %v6472_v10  ;;  %v7505_v30 = vld [vmem:[#allocation60_spill] sm:$0xff]  ;;  %v7506_v27 = vld [vmem:[#allocation61_spill] sm:$0xff] }
 0xeff   :  { %v3194_v60 = vpop.f32.mrf.mxu0  ;;  %v3235_v50 = vpop.f32.mrf.mxu1 }
 0xf00   :  { %v3240_v45 = vadd.f32 %v3193_v61, %v5196_v38  ;;  %v3195_v53 = vadd.f32 %v3194_v60, %v6474_v52  ;;  %v3236_v54 = vadd.f32 %v3235_v50, %v6476_v15  ;;  %v3242_v52 = vadd.f32 %v3234_v44, %v5214_v63  ;;  %v7507_v61 = vld [vmem:[#allocation62_spill] sm:$0xff]  ;;  %v7508_v60 = vld [vmem:[#allocation63_spill] sm:$0xff]  ;;  %v7510_v50 = vld [vmem:[#allocation65_spill] sm:$0xff] }
 0xf01   :  { %v3196_v18 = vpop.f32.mrf.mxu0  ;;  %v3237_v24 = vpop.f32.mrf.mxu1  ;;  %v7523_v44 = vld [vmem:[#allocation81_spill] sm:$0xff] }
 0xf02   :  { %v3794_v55 = vmul.f32 -1.442695, %v3240_v45  ;;  %v3241_v17 = vadd.f32 %v3195_v53, %v5201_v43  ;;  %v3243_v23 = vadd.f32 %v3236_v54, %v5208_v58  ;;  %v7511_v45 = vld [vmem:[#allocation66_spill] sm:$0xff]  ;;  %v7512_v53 = vld [vmem:[#allocation67_spill] sm:$0xff]  ;;  %v7513_v18 = vld [vmem:[#allocation68_spill] sm:$0xff] }
 0xf03   :  { %v3197_v21 = vpop.f32.mrf.mxu0  ;;  %v3238_v46 = vpop.f32.mrf.mxu1  ;;  %v7514_v24 = vld [vmem:[#allocation69_spill] sm:$0xff]  ;;  %v7521_v54 = vld [vmem:[#allocation78_spill] sm:$0xff] }
 0xf04   :  { %4221 = vpow2.f32 %v3794_v55  ;;  %v3795_v33 = vmul.f32 -1.442695, %v3241_v17  ;;  %v3796_v11 = vmul.f32 -1.442695, %v3243_v23  ;;  %v7515_v55 = vld [vmem:[#allocation72_spill] sm:$0xff]  ;;  %v7516_v17 = vld [vmem:[#allocation73_spill] sm:$0xff] }
 0xf05   :  { %v7517_v21 = vld [vmem:[#allocation74_spill] sm:$0xff]  ;;  %v7518_v46 = vld [vmem:[#allocation75_spill] sm:$0xff]  ;;  %v7522_v23 = vld [vmem:[#allocation80_spill] sm:$0xff] }
 0xf06   :  { %4223 = vpow2.f32 %v3795_v33  ;;  %v7520_v33 = vld [vmem:[#allocation77_spill] sm:$0xff] }
 0xf07   :  { %4225 = vpow2.f32 %v3796_v11  ;;  %v7524_v11 = vld [vmem:[#allocation79_spill] sm:$0xff] }
 0xf11   :  { %v4222_v39 = vpop.eup %4221 }
 0xf12   :  { %v3247_v12 = vadd.f32 1.0, %v4222_v39  ;;  %v7525_v39 = vld [vmem:[#allocation82_spill] sm:$0xff] }
 0xf13   :  { %v4224_v2 = vpop.eup %4223 }
 0xf14   :  { %4227 = vrcp.f32 %v3247_v12  ;;  %v3253_v32 = vadd.f32 1.0, %v4224_v2  ;;  %v4226_v13 = vpop.eup %4225  ;;  %v7527_v12 = vld [vmem:[#allocation85_spill] sm:$0xff]  ;;  %v7528_v2 = vld [vmem:[#allocation83_spill] sm:$0xff] }
 0xf15   :  { %4229 = vtanh.f32 %v3242_v52  ;;  %v3260_v15 = vadd.f32 1.0, %v4226_v13  ;;  %v7526_v52 = vld [vmem:[#allocation84_spill] sm:$0xff]  ;;  %v7530_v13 = vld [vmem:[#allocation23_spill] sm:$0xff] }
 0xf16   :  { %4231 = vrcp.f32 %v3253_v32  ;;  %v7529_v32 = vld [vmem:[#allocation22_spill] sm:$0xff] }
 0xf17   :  { %4233 = vrcp.f32 %v3260_v15  ;;  %v7534_v15 = vld [vmem:[#allocation90_spill] sm:$0xff] }
 0xf21   :  { %v4228_v14 = vpop.eup %4227 }
 0xf22   :  { %v4230_v28 = vpop.eup %4229 }
 0xf23   :  { %v4232_v47 = vpop.eup %4231  ;;  %v3264_v16 = vmul.f32 %v4230_v28, %v4228_v14  ;;  %v7531_v14 = vld [vmem:[#allocation24_spill] sm:$0xff]  ;;  %v7532_v28 = vld [vmem:[#allocation25_spill] sm:$0xff] }
 0xf24   :  { %v3263_v4 = vmul.f32 %v4232_v47, %v6345_v62  ;;  %v4234_v1 = vpop.eup %4233  ;;  %v7533_v47 = vld [vmem:[#allocation42_spill] sm:$0xff] }
 0xf26   :  { %v3265_v10 = vadd.f32 %v3264_v16, %v3263_v4 }
 0xf28   :  { %4235 = vtanh.f32 %v3265_v10  ;;  %v6541_v29 = vsel %vm3268_vm7, %v3265_v10, %v6345_v62  ;;  %v7501_v62 = vld [vmem:[#allocation56_spill] sm:$0xff] }
 0xf35   :  { %v4236_v25 = vpop.eup %4235 }
 0xf36   :  { %v3267_v56 = vmul.f32 %v4236_v25, %v4234_v1 }
 0xf38   :  { %v6546_v57 = vsel %vm3268_vm7, %v3267_v56, %v6350_v9  ;;  %v7502_v9 = vld [vmem:[#allocation57_spill] sm:$0xff] }
 0xf39   :  { %v3273_v22 = vpack.c.bf16 %v6546_v57, %v6546_v57 }
 0xf3b   :  { %3307 = vmatmul.mubr.bf16.vlgmr.msra.gmra.mxu0 %v3273_v22  ;;  %3348 = vmatmul.mubr.bf16.vlgmr.msra.gmra.mxu1 %v3273_v22 }
 0xf3c   :  { %3358 = vmatpush1.bf16.msra.mxu0 %v6116_v37  ;;  %3399 = vmatpush1.bf16.msra.mxu1 %v6119_v36  ;;  %v7488_v37 = vld [vmem:[#allocation45_spill] sm:$0xff]  ;;  %v7489_v36 = vld [vmem:[#allocation46_spill] sm:$0xff] }
 0xf3d   :  { %3359 = vmatprep.subr.bf16.mxu0 %v6122_v59  ;;  %3400 = vmatprep.subr.bf16.mxu1 %v6125_v42  ;;  %v7490_v59 = vld [vmem:[#allocation47_spill] sm:$0xff]  ;;  %v7491_v42 = vld [vmem:[#allocation48_spill] sm:$0xff] }
 0xf3e   :  { %3389 = vmatprep.mubr.bf16.mxu0 %v7018_v31  ;;  %3430 = vmatprep.mubr.bf16.mxu1 %v7018_v31 }
 0xf40   :  { %3360 = vmatpush1.bf16.msra.mxu0 %v6130_v26  ;;  %3401 = vmatpush1.bf16.msra.mxu1 %v6133_v8  ;;  %v7492_v26 = vld [vmem:[#allocation49_spill] sm:$0xff]  ;;  %v7493_v8 = vld [vmem:[#allocation50_spill] sm:$0xff] }
 0xf41   :  { %3361 = vmatprep.subr.bf16.mxu0 %v6136_v35  ;;  %3402 = vmatprep.subr.bf16.mxu1 %v6139_v20  ;;  %v7494_v35 = vld [vmem:[#allocation51_spill] sm:$0xff]  ;;  %v7495_v20 = vld [vmem:[#allocation52_spill] sm:$0xff] }
 0xf44   :  { %3362 = vmatpush1.bf16.msra.mxu0 %v6142_v5  ;;  %3403 = vmatpush1.bf16.msra.mxu1 %v6145_v41  ;;  %v7496_v5 = vld [vmem:[#allocation53_spill] sm:$0xff]  ;;  %v7497_v41 = vld [vmem:[#allocation54_spill] sm:$0xff] }
 0xf45   :  { %3363 = vmatprep.subr.bf16.mxu0 %v6148_v7  ;;  %3404 = vmatprep.subr.bf16.mxu1 %v6151_v19  ;;  %v7498_v7 = vld [vmem:[#allocation55_spill] sm:$0xff]  ;;  %v7499_v19 = vld [vmem:[#allocation70_spill] sm:$0xff] }
 0xf48   :  { %3364 = vmatpush1.bf16.msra.mxu0 %v6154_v49  ;;  %3405 = vmatpush1.bf16.msra.mxu1 %v6157_v34  ;;  %v7500_v49 = vld [vmem:[#allocation71_spill] sm:$0xff] }
 0xf49   :  { %3365 = vmatprep.subr.bf16.mxu0 %v7420_v40  ;;  %3406 = vmatprep.subr.bf16.mxu1 %v7421_v0  ;;  %v3269_v34 = vsel %vm3268_vm7, %v6491_v3, %v7500_v49  ;;  %v7503_v0 = vld [vmem:[#allocation58_spill] sm:$0xff]  ;;  %v7509_v3 = vld [vmem:[#allocation64_spill] sm:$0xff] }
 0xf4a   :  { %v3356_v40 = vpack.c.bf16 %v3269_v34, %v3269_v34 }
 0xf4c   :  { %3366 = vmatpush1.bf16.msra.mxu0 %v7488_v37  ;;  %3407 = vmatpush1.bf16.msra.mxu1 %v7489_v36 }
 0xf4d   :  { %3367 = vmatprep.subr.bf16.mxu0 %v7490_v59  ;;  %3408 = vmatprep.subr.bf16.mxu1 %v7491_v42  ;;  %v7535_v42 = vld [vmem:[#allocation102_spill] sm:$0xff] }
 0xf50   :  { %3368 = vmatpush1.bf16.msra.mxu0 %v7492_v26  ;;  %3409 = vmatpush1.bf16.msra.mxu1 %v7493_v8 }
 0xf51   :  { %3369 = vmatprep.subr.bf16.mxu0 %v7494_v35  ;;  %3410 = vmatprep.subr.bf16.mxu1 %v7495_v20 }
 0xf54   :  { %3370 = vmatpush1.bf16.msra.mxu0 %v7496_v5  ;;  %3411 = vmatpush1.bf16.msra.mxu1 %v7497_v41  ;;  %v7536_v5 = vld [vmem:[#allocation104_spill] sm:$0xff] }
 0xf55   :  { %3371 = vmatprep.subr.bf16.mxu0 %v7498_v7  ;;  %3412 = vmatprep.subr.bf16.mxu1 %v7499_v19 }
 0xf58   :  { %3372 = vmatpush1.bf16.msra.mxu0 %v7501_v62  ;;  %3413 = vmatpush1.bf16.msra.mxu1 %v7502_v9  ;;  %v7537_v9 = vld [vmem:[#allocation105_spill] sm:$0xff] }
 0xf59   :  { %3468 = vmatprep.subr.bf16.mxu0 %v7503_v0  ;;  %3509 = vmatprep.subr.bf16.mxu1 %v7504_v48  ;;  %v7538_v0 = vld [vmem:[#allocation103_spill] sm:$0xff] }
 0xf5b   :  { %3390 = vmatmul.mubr.bf16.vlgmr.msra.gmra.mxu0 %v3356_v40  ;;  %3431 = vmatmul.mubr.bf16.vlgmr.msra.gmra.mxu1 %v3356_v40 }
 0xf5c   :  { %3469 = vmatpush1.bf16.msra.mxu0 %v7505_v30  ;;  %3510 = vmatpush1.bf16.msra.mxu1 %v7506_v27 }
 0xf5d   :  { %3470 = vmatprep.subr.bf16.mxu0 %v7507_v61  ;;  %3511 = vmatprep.subr.bf16.mxu1 %v7508_v60 }
 0xf5e   :  { %3500 = vmatprep.mubr.bf16.mxu0 %v7018_v31  ;;  %3541 = vmatprep.mubr.bf16.mxu1 %v7018_v31  ;;  %v7519_v31 = vld [vmem:[#allocation76_spill] sm:$0xff] }
 0xf60   :  { %3471 = vmatpush1.bf16.msra.mxu0 %v7509_v3  ;;  %3512 = vmatpush1.bf16.msra.mxu1 %v7510_v50 }
 0xf61   :  { %3472 = vmatprep.subr.bf16.mxu0 %v7511_v45  ;;  %3513 = vmatprep.subr.bf16.mxu1 %v7512_v53 }
 0xf64   :  { %3473 = vmatpush1.bf16.msra.mxu0 %v7513_v18  ;;  %3514 = vmatpush1.bf16.msra.mxu1 %v7514_v24 }
 0xf65   :  { %3474 = vmatprep.subr.bf16.mxu0 %v7515_v55  ;;  %3515 = vmatprep.subr.bf16.mxu1 %v7516_v17 }
 0xf68   :  { %3475 = vmatpush1.bf16.msra.mxu0 %v7517_v21  ;;  %3516 = vmatpush1.bf16.msra.mxu1 %v7518_v46 }
 0xf69   :  { %3476 = vmatprep.subr.bf16.mxu0 %v7519_v31  ;;  %3517 = vmatprep.subr.bf16.mxu1 %v7520_v33 }
 0xf6c   :  { %3477 = vmatpush1.bf16.msra.mxu0 %v7521_v54  ;;  %3518 = vmatpush1.bf16.msra.mxu1 %v7522_v23 }
 0xf6d   :  { %3478 = vmatprep.subr.bf16.mxu0 %v7523_v44  ;;  %3519 = vmatprep.subr.bf16.mxu1 %v7524_v11 }
 0xf70   :  { %3479 = vmatpush1.bf16.msra.mxu0 %v7525_v39  ;;  %3520 = vmatpush1.bf16.msra.mxu1 %v7526_v52 }
 0xf71   :  { %3480 = vmatprep.subr.bf16.mxu0 %v7527_v12  ;;  %3521 = vmatprep.subr.bf16.mxu1 %v7528_v2 }
 0xf74   :  { %3481 = vmatpush1.bf16.msra.mxu0 %v7529_v32  ;;  %3522 = vmatpush1.bf16.msra.mxu1 %v7530_v13 }
 0xf75   :  { %3482 = vmatprep.subr.bf16.mxu0 %v7531_v14  ;;  %3523 = vmatprep.subr.bf16.mxu1 %v7532_v28 }
 0xf78   :  { %3483 = vmatpush1.bf16.msra.mxu0 %v7533_v47  ;;  %3524 = vmatpush1.bf16.msra.mxu1 %v7534_v15 }
 0xffb   :  { %v3308_v16 = vpop.f32.mrf.mxu0  ;;  %v6620_v4 = vpop.f32.mrf.mxu1 }
 0xffd   :  { %v3310_v10 = vpop.f32.mrf.mxu0  ;;  %v3351_v1 = vpop.f32.mrf.mxu1 }
 0xfff   :  { %v3312_v25 = vpop.f32.mrf.mxu0  ;;  %v3353_v56 = vpop.f32.mrf.mxu1 }
0x1001   :  { %v3313_v22 = vpop.f32.mrf.mxu0  ;;  %v3354_v37 = vpop.f32.mrf.mxu1 }
0x101b   :  { %v3391_v36 = vpop.f32.mrf.mxu0  ;;  %v3432_v59 = vpop.f32.mrf.mxu1 }
0x101c   :  { %v3439_v26 = vadd.f32 %v3391_v36, %v7535_v42  ;;  %v3441_v48 = vadd.f32 %v3432_v59, %v7538_v0 }
0x101d   :  { %v3393_v8 = vpop.f32.mrf.mxu0  ;;  %v3434_v35 = vpop.f32.mrf.mxu1 }
0x101e   :  { %v3797_v20 = vmul.f32 -1.442695, %v3439_v26  ;;  %v3440_v41 = vadd.f32 %v3393_v8, %v7536_v5  ;;  %v3442_v40 = vadd.f32 %v3434_v35, %v7537_v9 }
0x101f   :  { %v3395_v7 = vpop.f32.mrf.mxu0  ;;  %v3436_v19 = vpop.f32.mrf.mxu1 }
0x1020   :  { %4237 = vpow2.f32 %v3797_v20  ;;  %v3798_v49 = vmul.f32 -1.442695, %v3440_v41  ;;  %v3799_v30 = vmul.f32 -1.442695, %v3442_v40  ;;  %v3803_v41 = vld [vmem:[%s6652_s8] ss:$0 sm:$0xff] }
0x1021   :  { %v3396_v34 = vpop.f32.mrf.mxu0  ;;  %v3437_v62 = vpop.f32.mrf.mxu1  ;;  %v3804_v19 = vld [vmem:[%s6652_s8 + $0x1] ss:$0 sm:$0xff] }
0x1022   :  { %4239 = vpow2.f32 %v3798_v49 }
0x1023   :  { %4241 = vtanh.f32 %v3441_v48 }
0x1024   :  { %4243 = vpow2.f32 %v3799_v30 }
0x102d   :  { %v4238_v27 = vpop.eup %4237 }
0x102e   :  { %v3446_v61 = vadd.f32 1.0, %v4238_v27 }
0x102f   :  { %v4240_v60 = vpop.eup %4239 }
0x1030   :  { %4245 = vrcp.f32 %v3446_v61  ;;  %v3452_v3 = vadd.f32 1.0, %v4240_v60  ;;  %v4242_v50 = vpop.eup %4241 }
0x1031   :  { %v4244_v45 = vpop.eup %4243 }
0x1032   :  { %4247 = vrcp.f32 %v3452_v3  ;;  %v3459_v55 = vadd.f32 1.0, %v4244_v45 }
0x1034   :  { %4249 = vrcp.f32 %v3459_v55 }
0x103d   :  { %v4246_v53 = vpop.eup %4245 }
0x103e   :  { %v3463_v18 = vmul.f32 %v4246_v53, %v4242_v50 }
0x103f   :  { %v4248_v24 = vpop.eup %4247 }
0x1040   :  { %v3462_v17 = vmul.f32 %v4248_v24, %v6489_v51 }
0x1041   :  { %v4250_v46 = vpop.eup %4249 }
0x1042   :  { %v3464_v21 = vadd.f32 %v3463_v18, %v3462_v17 }
0x1044   :  { %4251 = vtanh.f32 %v3464_v21 }
0x1051   :  { %v4252_v31 = vpop.eup %4251 }
0x1052   :  { %v3466_v33 = vmul.f32 %v4252_v31, %v4250_v46 }
0x1054   :  { %v3467_v54 = vpack.c.bf16 %v3466_v33, %v3466_v33 }
0x1056   :  { %3501 = vmatmul.mubr.bf16.vlgmr.msra.gmra.mxu0 %v3467_v54  ;;  %3542 = vmatmul.mubr.bf16.vlgmr.msra.gmra.mxu1 %v3467_v54 }
0x1116   :  { %v3502_v23 = vpop.f32.mrf.mxu0  ;;  %v3543_v44 = vpop.f32.mrf.mxu1 }
0x1117   :  { %v3503_v11 = vadd.f32 %v3502_v23, %v3308_v16  ;;  %v3544_v16 = vadd.f32 %v3543_v44, %v6620_v4 }
0x1118   :  { %v3504_v39 = vpop.f32.mrf.mxu0  ;;  %v3545_v52 = vpop.f32.mrf.mxu1 }
0x1119   :  { %v3550_v12 = vadd.f32 %v3503_v11, %v5196_v38  ;;  %v3505_v2 = vadd.f32 %v3504_v39, %v3310_v10  ;;  %v3546_v25 = vadd.f32 %v3545_v52, %v3351_v1  ;;  %v3552_v38 = vadd.f32 %v3544_v16, %v5214_v63 }
0x111a   :  { %v3506_v32 = vpop.f32.mrf.mxu0  ;;  %v3547_v13 = vpop.f32.mrf.mxu1 }
0x111b   :  { %v3800_v51 = vmul.f32 -1.442695, %v3550_v12  ;;  %v3551_v14 = vadd.f32 %v3505_v2, %v5201_v43  ;;  %v3553_v56 = vadd.f32 %v3546_v25, %v5208_v58 }
0x111c   :  { %v3507_v28 = vpop.f32.mrf.mxu0  ;;  %v3548_v47 = vpop.f32.mrf.mxu1 }
0x111d   :  { %4253 = vpow2.f32 %v3800_v51  ;;  %v3801_v15 = vmul.f32 -1.442695, %v3551_v14  ;;  %v3802_v22 = vmul.f32 -1.442695, %v3553_v56 }
0x111f   :  { %4255 = vpow2.f32 %v3801_v15 }
0x1120   :  { %4257 = vpow2.f32 %v3802_v22 }
0x112a   :  { %v4254_v37 = vpop.eup %4253 }
0x112b   :  { %v3557_v10 = vadd.f32 1.0, %v4254_v37 }
0x112c   :  { %v4256_v36 = vpop.eup %4255 }
0x112d   :  { %4259 = vrcp.f32 %v3557_v10  ;;  %v3563_v59 = vadd.f32 1.0, %v4256_v36  ;;  %v4258_v43 = vpop.eup %4257 }
0x112e   :  { %4261 = vtanh.f32 %v3552_v38  ;;  %v3570_v1 = vadd.f32 1.0, %v4258_v43 }
0x112f   :  { %4263 = vrcp.f32 %v3563_v59 }
0x1130   :  { %4265 = vrcp.f32 %v3570_v1 }
0x113a   :  { %v4260_v42 = vpop.eup %4259 }
0x113b   :  { %v4262_v26 = vpop.eup %4261 }
0x113c   :  { %v4264_v8 = vpop.eup %4263  ;;  %v3574_v35 = vmul.f32 %v4262_v26, %v4260_v42 }
0x113d   :  { %v3573_v58 = vmul.f32 %v4264_v8, %v6541_v29  ;;  %v4266_v20 = vpop.eup %4265 }
0x113f   :  { %v3575_v4 = vadd.f32 %v3574_v35, %v3573_v58 }
0x1141   :  { %4267 = vtanh.f32 %v3575_v4 }
0x114e   :  { %v4268_v63 = vpop.eup %4267 }
0x114f   :  { %v3577_v5 = vmul.f32 %v4268_v63, %v4266_v20 }
0x1151   :  { %v3579_v7 = vsel %vm3578_vm8, %v3577_v5, %v6546_v57 }
0x1152   :  { %v3585_v29 = vmul.f32 %v3803_v41, %v3579_v7 }
0x1154   :  { %v3591_v49 = vadd.f32 %v3804_v19, %v3585_v29 }
0x1156   :  { %3592 = vst [vmem:[#allocation13] sm:$0xff] %v3591_v49 }
0x1157   :  { %4594 = shalt.err (!%p4591_p6)
}
0x1158   :  { %3602 = dma.vmem_to_hbm [thread:$0]  %s3600_s1, 128, %s6653_s9, [#allocation4]  }
0x1159   :  { %4611 = dma.done.wait [#allocation4], 128  }
0x115a   :  { %4612 = vsyncadd [#allocation4], 4294967168 }
0x115b   :  { %3606 = vsyncpa [#allocation3], 1 }
0x115c   :  { %3607 = vsyncpa [#allocation6], 1 }
0x115d   :  { %3608 = vsyncpa [#allocation9], 1 }
0x115e   :  { %3609 = vsyncpa [#allocation12], 1 }
0x115f   :  { %3610 = vsyncpa [#allocation4], 1 }

</bundles_post_ra>
